<compile_context>
chip_gen: v6e
topology: v6e:2x2x1
jax: 0.10.0
libtpu: 0.0.40
codegen_flags: <defaults>
</compile_context>

<pallas_src>
import functools

import jax
import jax.numpy as jnp
from jax.experimental import pallas as pl
from jax.experimental.pallas import tpu as pltpu

SELU_ALPHA = 1.6732632423543772
SELU_SCALE = 1.0507009873554805

_LANE = 128


def _selu(x):
    # exp(min(x, 0)) guards the unselected branch against inf for huge activations.
    return SELU_SCALE * jnp.where(
        x > 0, x, SELU_ALPHA * (jnp.exp(jnp.minimum(x, 0.0)) - 1.0))


def _round_up(n, m):
    return ((n + m - 1) // m) * m


@functools.lru_cache(maxsize=1)
def _vmem_capacity_bytes():
    """Physical VMEM per core; conservative 64 MiB (v7x) fallback if the query fails."""
    try:
        return int(pltpu.get_tpu_info().vmem_capacity_bytes)
    except Exception:
        return 64 * 1024 * 1024


# --------------------------- Pallas kernel ---------------------------
def _deconv_selu_kernel(x_ref, w_ref, b_ref, o_ref, xcol_ref, *, K, Win, Cin):
    """Fused ConvTranspose2d((1,K), stride 1, pad 0) + bias + SELU via im2col.

    x_ref:    (Bb, Win, Cin)        f32 or bf16 -- Bb rows of the N*H axis
    w_ref:    (K*Cin, Cout_p)       bf16        -- w[k*Cin+ci, co] = W[ci, co, 0, k]
    b_ref:    (1, Cout_p)           f32
    o_ref:    (Bb, Wout, Cout_p)                -- Wout = Win + K - 1
    xcol_ref: (Bb, Wout, K*Cin)     bf16 VMEM   -- im2col buffer
    """
    Bb, Wout, Cp = o_ref.shape
    Kc = K * Cin

    # Zero only the rows that are not fully rewritten by the tap stores below
    # ([0, K-1) and [Win, Wout)); the interior rows are overwritten in every lane band.
    if Win >= K - 1:
        xcol_ref[:, : K - 1, :] = jnp.zeros((Bb, K - 1, Kc), jnp.bfloat16)
        xcol_ref[:, Win:, :] = jnp.zeros((Bb, Wout - Win, Kc), jnp.bfloat16)
    else:
        xcol_ref[...] = jnp.zeros_like(xcol_ref)

    # K sublane-shifted copies of the input: xcol[:, k+w, k*Cin:(k+1)*Cin] = x[:, w, :].
    x = x_ref[...].astype(jnp.bfloat16)
    for k in range(K):  # static unroll
        xcol_ref[:, k:k + Win, k * Cin:(k + 1) * Cin] = x

    # Single deep-contraction MXU pass over all taps, then bias + SELU epilogue.
    y = jnp.dot(xcol_ref[...].reshape(Bb * Wout, Kc), w_ref[...],
                preferred_element_type=jnp.float32)              # (Bb*Wout, Cp) f32
    y = y.reshape(Bb, Wout, Cp) + b_ref[...].reshape(1, 1, Cp)
    o_ref[...] = _selu(y).astype(o_ref.dtype)


def _deconv_selu_layer(x_nhwc, layer_arrays, layer_meta):
    """x_nhwc: (N, H, W, Cin). Returns (N, H, Wout, Cout) in the layer's output dtype."""
    w_stack, bias2d = layer_arrays
    K, Cout, Cout_p, out_dtype_str = layer_meta
    out_dtype = jnp.dtype(out_dtype_str)

    N, H, W, Cin = x_nhwc.shape
    Wout = W + K - 1
    B = N * H
    Kc = K * Cin

    x_b = x_nhwc.reshape(B, W, Cin)  # bf16 cast happens inside the kernel

    # ---- generation-aware VMEM budgeting / block sizing ----
    vmem_cap = _vmem_capacity_bytes()
    budget = (2 * vmem_cap) // 5                       # ~40% of physical for the working set
    vmem_limit = min((3 * vmem_cap) // 4, 100 * 1024 * 1024)

    in_bytes = W * Cin * x_b.dtype.itemsize
    out_bytes = Wout * Cout_p * out_dtype.itemsize
    xcol_bytes = Wout * Kc * 2
    y_bytes = Wout * Cout_p * 4
    # in/out double-buffered; count xcol twice (scratch + possible value copy feeding the dot)
    per_row = 2 * in_bytes + 2 * out_bytes + 2 * xcol_bytes + y_bytes
    fixed = 2 * (w_stack.size * 2) + 2 * (bias2d.size * 4)

    rows_fit = max(1, (budget - fixed) // per_row)
    # >=4 grid steps when B allows it (2 TCs on v7x, each double-buffered).
    block_b = int(max(1, min(B, rows_fit, (B + 3) // 4, 1024)))

    # No divisor search: pad B up to a multiple of block_b (padded rows discarded below).
    Bp = _round_up(B, block_b)
    if Bp != B:
        x_b = jnp.pad(x_b, ((0, Bp - B), (0, 0), (0, 0)))
    grid = (Bp // block_b,)

    cost = pl.CostEstimate(
        flops=2 * Bp * Wout * Kc * Cout_p,
        transcendentals=Bp * Wout * Cout_p,
        bytes_accessed=(Bp * W * Cin * x_b.dtype.itemsize + w_stack.size * 2
                        + bias2d.size * 4 + Bp * Wout * Cout_p * out_dtype.itemsize),
    )

    out = pl.pallas_call(
        functools.partial(_deconv_selu_kernel, K=K, Win=W, Cin=Cin),
        out_shape=jax.ShapeDtypeStruct((Bp, Wout, Cout_p), out_dtype),
        grid=grid,
        in_specs=[
            pl.BlockSpec((block_b, W, Cin), lambda i: (i, 0, 0)),
            pl.BlockSpec((Kc, Cout_p), lambda i: (0, 0)),
            pl.BlockSpec((1, Cout_p), lambda i: (0, 0)),
        ],
        out_specs=pl.BlockSpec((block_b, Wout, Cout_p), lambda i: (i, 0, 0)),
        scratch_shapes=[pltpu.VMEM((block_b, Wout, Kc), jnp.bfloat16)],
        compiler_params=pltpu.CompilerParams(
            dimension_semantics=("parallel",),
            vmem_limit_bytes=int(vmem_limit)),
        cost_estimate=cost,
    )(x_b, w_stack, bias2d)

    if Bp != B:
        out = out[:B]
    if Cout_p != Cout:
        out = out[:, :, :Cout]  # XLA fuses this with the following reshape/transpose
    return out.reshape(N, H, Wout, Cout)


# --------------------------- plain-JAX glue ---------------------------
def _max_unpool_nhwc(x_nhwc, idx_nchw, Ho, Wo):
    """PyTorch MaxUnpool2d semantics in channels-last layout: scatter x into zeros;
    `indices` index the flattened (Ho*Wo) plane of each (n, c). Duplicate indices use
    last-writer-wins, matching PyTorch's (undefined) behavior."""
    # TODO(synk): data-dependent scatter kept in plain JAX (no clean Pallas TPU scatter).
    N, H, W, C = x_nhwc.shape
    vals = x_nhwc.reshape(N, H * W, C)
    idx = jnp.transpose(idx_nchw, (0, 2, 3, 1)).reshape(N, H * W, C)
    cols = jnp.broadcast_to(jnp.arange(C, dtype=idx.dtype)[None, :], (H * W, C))

    def scatter_one(v, i):
        return jnp.zeros((Ho * Wo, C), v.dtype).at[i, cols].set(v)

    out = jax.vmap(scatter_one)(vals, idx)
    return out.reshape(N, Ho, Wo, C)


# --------------------------- parameter prep (hoisted) ---------------------------
def prepare_params(params):
    """Re-lay ConvTranspose2d weights once: (Cin,Cout,1,K) -> bf16 (K*Cin, Cout_p) matrix
    (taps folded into the contraction dim), Cout lane-padded to a multiple of 128;
    biases -> f32 (1, Cout_p) with zero padding (keep the zero-pad invariant)."""
    weights, meta = [], []
    for wi, bi, out_dtype_str in (("w1", "b1", "bfloat16"),
                                  ("w2", "b2", "bfloat16"),
                                  ("w3", "b3", "float32")):
        w = params[wi]                      # (Cin, Cout, 1, K)
        b = params[bi]                      # (Cout,)
        Cin, Cout, _, K = w.shape
        Cout_p = _round_up(Cout, _LANE)
        w_t = jnp.transpose(w[:, :, 0, :], (2, 0, 1))        # (K, Cin, Cout)
        w_stack = w_t.reshape(K * Cin, Cout)                  # [k*Cin+ci, co]
        if Cout_p != Cout:
            w_stack = jnp.pad(w_stack, ((0, 0), (0, Cout_p - Cout)))
            b = jnp.pad(b, (0, Cout_p - Cout))
        weights.append((w_stack.astype(jnp.bfloat16),
                        b.reshape(1, Cout_p).astype(jnp.float32)))
        meta.append((int(K), int(Cout), int(Cout_p), out_dtype_str))
    return tuple(weights), tuple(meta)


# --------------------------- full forward ---------------------------
def _forward_impl(weights, x, indices1, indices2, *, meta, shape1, shape2):
    # Keep the whole decoder channels-last: one transpose in, one transpose out.
    y = jnp.transpose(x, (0, 2, 3, 1))                                  # NHWC
    y = _deconv_selu_layer(y, weights[0], meta[0])                      # selu1(deconv1(x))
    y = _max_unpool_nhwc(y, indices2, int(shape2[-2]), int(shape2[-1])) # unpool1
    y = _deconv_selu_layer(y, weights[1], meta[1])                      # selu2(deconv2(x))
    y = _max_unpool_nhwc(y, indices1, int(shape1[-2]), int(shape1[-1])) # unpool2
    y = _deconv_selu_layer(y, weights[2], meta[2])                      # selu3(deconv3(x))
    return jnp.transpose(y, (0, 3, 1, 2))                               # back to NCHW


acc_deconvolution_forward = jax.jit(
    _forward_impl, static_argnames=("meta", "shape1", "shape2"))


# ---------------- pure-JAX f32 reference (validation only) ----------------
def _deconv_selu_ref(x_nchw, weight, bias):
    N, Cin, H, W = x_nchw.shape
    Cout, K = weight.shape[1], weight.shape[3]
    out = jnp.zeros((N, Cout, H, W + K - 1), jnp.float32)
    for k in range(K):
        contrib = jnp.einsum("nihw,io->nohw", x_nchw.astype(jnp.float32), weight[:, :, 0, k])
        out = out.at[:, :, :, k:k + W].add(contrib)
    out = out + bias[None, :, None, None]
    return _selu(out)


def _max_unpool2d_ref(x, indices, output_size):
    N, C, H, W = x.shape
    Ho, Wo = int(output_size[-2]), int(output_size[-1])
    vals = x.reshape(N, C, H * W)
    idx = indices.reshape(N, C, H * W)
    out = jnp.zeros((N, C, Ho * Wo), x.dtype)
    out = jax.vmap(jax.vmap(lambda o, i, v: o.at[i].set(v)))(out, idx, vals)
    return out.reshape(N, C, Ho, Wo)


def _forward_ref(params, x, indices1, indices2, shape1, shape2):
    x = _deconv_selu_ref(x, params["w1"], params["b1"])
    x = _max_unpool2d_ref(x, indices2, shape2)
    x = _deconv_selu_ref(x, params["w2"], params["b2"])
    x = _max_unpool2d_ref(x, indices1, shape1)
    x = _deconv_selu_ref(x, params["w3"], params["b3"])
    return x


if __name__ == "__main__":
    key = jax.random.PRNGKey(0)
    N = 2
    W0 = 8  # decoder input width
    # Shapes consistent with an encoder using (1,9) convs + (1,2)/stride-2 max pools.
    shape2 = (N, 128, 1, 32)
    shape1 = (N, 64, 1, 80)

    k_x, k1, k2, k3, kb1, kb2, kb3 = jax.random.split(key, 7)

    def uinit(k, shape, fan):
        bound = 1.0 / float(fan) ** 0.5
        return jax.random.uniform(k, shape, jnp.float32, -bound, bound)

    params = {
        "w1": uinit(k1, (256, 128, 1, 9), 256 * 9), "b1": uinit(kb1, (128,), 256 * 9),
        "w2": uinit(k2, (128, 64, 1, 9), 128 * 9), "b2": uinit(kb2, (64,), 128 * 9),
        "w3": uinit(k3, (64, 3, 1, 9), 64 * 9), "b3": uinit(kb3, (3,), 64 * 9),
    }

    x = jax.random.normal(k_x, (N, 256, 1, W0), jnp.float32)

    # Pooling indices (into flattened H*W planes), as MaxPool2d(return_indices=True) would give.
    w2_ids = jnp.arange(16, dtype=jnp.int32)
    c2_ids = jnp.arange(128, dtype=jnp.int32)
    indices2 = 2 * w2_ids[None, None, None, :] + (
        (c2_ids[None, :, None, None] + w2_ids[None, None, None, :]) % 2)
    indices2 = jnp.broadcast_to(indices2, (N, 128, 1, 16)).astype(jnp.int32)

    w1_ids = jnp.arange(40, dtype=jnp.int32)
    c1_ids = jnp.arange(64, dtype=jnp.int32)
    indices1 = 2 * w1_ids[None, None, None, :] + (
        (c1_ids[None, :, None, None] + w1_ids[None, None, None, :]) % 2)
    indices1 = jnp.broadcast_to(indices1, (N, 64, 1, 40)).astype(jnp.int32)

    weights, meta = prepare_params(params)  # hoisted weight re-layout / padding / bf16 cast

    out = acc_deconvolution_forward(weights, x, indices1, indices2,
                                    meta=meta, shape1=shape1, shape2=shape2)
    out = jax.block_until_ready(out)
    assert out.shape == (N, 3, 1, 88), out.shape

    # Tolerance accounts for bf16 input/weight quantization (accumulation stays f32).
    ref = _forward_ref(params, x, indices1, indices2, shape1, shape2)
    assert jnp.allclose(out, ref, rtol=2e-2, atol=2e-2), "mismatch vs pure-JAX reference"

    print("KERNEL_OK")
</pallas_src>

<mosaic_0001>
module attributes {stable_mosaic.version = 11 : i64} {
  func.func @_deconv_selu_kernel(%arg0: i32, %arg1: memref<1x8x256xf32, #tpu.memory_space<vmem>>, %arg2: memref<2304x128xbf16, #tpu.memory_space<vmem>>, %arg3: memref<1x128xf32, #tpu.memory_space<vmem>>, %arg4: memref<1x16x128xbf16, #tpu.memory_space<vmem>>, %arg5: memref<1x16x2304xbf16, #tpu.memory_space<vmem>>) attributes {dimension_semantics = [#tpu.dimension_semantics<parallel>], iteration_bounds = array<i64: 2>, scalar_prefetch = 0 : i64, scratch_operands = 1 : i64, tpu.core_type = #tpu.core_type<tc>, window_params = [{transform_indices = @transform_0, window_bounds = array<i64: 1, 8, 256>}, {pipeline_mode = #tpu.pipeline_mode<synchronous>, transform_indices = @transform_1, window_bounds = array<i64: 2304, 128>}, {pipeline_mode = #tpu.pipeline_mode<synchronous>, transform_indices = @transform_2, window_bounds = array<i64: 1, 128>}, {transform_indices = @transform_3, window_bounds = array<i64: 1, 16, 128>}]} {
    %cst = arith.constant 0.000000e+00 : bf16
    %0 = vector.broadcast %cst : bf16 to vector<1x8x2304xbf16>
    %c0 = arith.constant 0 : index
    %c0_0 = arith.constant 0 : index
    %c0_1 = arith.constant 0 : index
    %1 = vector.load %arg5[%c0, %c0_0, %c0_1] : memref<1x16x2304xbf16, #tpu.memory_space<vmem>>, vector<1x8x2304xbf16>
    tpu.vector_store %arg5[%c0, %c0_0, %c0_1], %0 {strides = array<i32>} : memref<1x16x2304xbf16, #tpu.memory_space<vmem>>, vector<1x8x2304xbf16>,
    %cst_2 = arith.constant 0.000000e+00 : bf16
    %2 = vector.broadcast %cst_2 : bf16 to vector<1x8x2304xbf16>
    %c0_3 = arith.constant 0 : index
    %c8 = arith.constant 8 : index
    %c0_4 = arith.constant 0 : index
    %3 = vector.load %arg5[%c0_3, %c8, %c0_4] : memref<1x16x2304xbf16, #tpu.memory_space<vmem>>, vector<1x8x2304xbf16>
    tpu.vector_store %arg5[%c0_3, %c8, %c0_4], %2 {strides = array<i32>} : memref<1x16x2304xbf16, #tpu.memory_space<vmem>>, vector<1x8x2304xbf16>,
    %c0_5 = arith.constant 0 : index
    %c0_6 = arith.constant 0 : index
    %c0_7 = arith.constant 0 : index
    %4 = vector.load %arg1[%c0_5, %c0_6, %c0_7] : memref<1x8x256xf32, #tpu.memory_space<vmem>>, vector<1x8x256xf32>
    %5 = arith.truncf %4 : vector<1x8x256xf32> to vector<1x8x256xbf16>
    %c0_8 = arith.constant 0 : index
    %c0_9 = arith.constant 0 : index
    %c0_10 = arith.constant 0 : index
    %6 = vector.load %arg5[%c0_8, %c0_9, %c0_10] : memref<1x16x2304xbf16, #tpu.memory_space<vmem>>, vector<1x8x256xbf16>
    tpu.vector_store %arg5[%c0_8, %c0_9, %c0_10], %5 {strides = array<i32>} : memref<1x16x2304xbf16, #tpu.memory_space<vmem>>, vector<1x8x256xbf16>,
    %c0_11 = arith.constant 0 : index
    %c1 = arith.constant 1 : index
    %c256 = arith.constant 256 : index
    %7 = vector.load %arg5[%c0_11, %c1, %c256] : memref<1x16x2304xbf16, #tpu.memory_space<vmem>>, vector<1x8x256xbf16>
    tpu.vector_store %arg5[%c0_11, %c1, %c256], %5 {strides = array<i32>} : memref<1x16x2304xbf16, #tpu.memory_space<vmem>>, vector<1x8x256xbf16>,
    %c0_12 = arith.constant 0 : index
    %c2 = arith.constant 2 : index
    %c512 = arith.constant 512 : index
    %8 = vector.load %arg5[%c0_12, %c2, %c512] : memref<1x16x2304xbf16, #tpu.memory_space<vmem>>, vector<1x8x256xbf16>
    tpu.vector_store %arg5[%c0_12, %c2, %c512], %5 {strides = array<i32>} : memref<1x16x2304xbf16, #tpu.memory_space<vmem>>, vector<1x8x256xbf16>,
    %c0_13 = arith.constant 0 : index
    %c3 = arith.constant 3 : index
    %c768 = arith.constant 768 : index
    %9 = vector.load %arg5[%c0_13, %c3, %c768] : memref<1x16x2304xbf16, #tpu.memory_space<vmem>>, vector<1x8x256xbf16>
    tpu.vector_store %arg5[%c0_13, %c3, %c768], %5 {strides = array<i32>} : memref<1x16x2304xbf16, #tpu.memory_space<vmem>>, vector<1x8x256xbf16>,
    %c0_14 = arith.constant 0 : index
    %c4 = arith.constant 4 : index
    %c1024 = arith.constant 1024 : index
    %10 = vector.load %arg5[%c0_14, %c4, %c1024] : memref<1x16x2304xbf16, #tpu.memory_space<vmem>>, vector<1x8x256xbf16>
    tpu.vector_store %arg5[%c0_14, %c4, %c1024], %5 {strides = array<i32>} : memref<1x16x2304xbf16, #tpu.memory_space<vmem>>, vector<1x8x256xbf16>,
    %c0_15 = arith.constant 0 : index
    %c5 = arith.constant 5 : index
    %c1280 = arith.constant 1280 : index
    %11 = vector.load %arg5[%c0_15, %c5, %c1280] : memref<1x16x2304xbf16, #tpu.memory_space<vmem>>, vector<1x8x256xbf16>
    tpu.vector_store %arg5[%c0_15, %c5, %c1280], %5 {strides = array<i32>} : memref<1x16x2304xbf16, #tpu.memory_space<vmem>>, vector<1x8x256xbf16>,
    %c0_16 = arith.constant 0 : index
    %c6 = arith.constant 6 : index
    %c1536 = arith.constant 1536 : index
    %12 = vector.load %arg5[%c0_16, %c6, %c1536] : memref<1x16x2304xbf16, #tpu.memory_space<vmem>>, vector<1x8x256xbf16>
    tpu.vector_store %arg5[%c0_16, %c6, %c1536], %5 {strides = array<i32>} : memref<1x16x2304xbf16, #tpu.memory_space<vmem>>, vector<1x8x256xbf16>,
    %c0_17 = arith.constant 0 : index
    %c7 = arith.constant 7 : index
    %c1792 = arith.constant 1792 : index
    %13 = vector.load %arg5[%c0_17, %c7, %c1792] : memref<1x16x2304xbf16, #tpu.memory_space<vmem>>, vector<1x8x256xbf16>
    tpu.vector_store %arg5[%c0_17, %c7, %c1792], %5 {strides = array<i32>} : memref<1x16x2304xbf16, #tpu.memory_space<vmem>>, vector<1x8x256xbf16>,
    %c0_18 = arith.constant 0 : index
    %c8_19 = arith.constant 8 : index
    %c2048 = arith.constant 2048 : index
    %14 = vector.load %arg5[%c0_18, %c8_19, %c2048] : memref<1x16x2304xbf16, #tpu.memory_space<vmem>>, vector<1x8x256xbf16>
    tpu.vector_store %arg5[%c0_18, %c8_19, %c2048], %5 {strides = array<i32>} : memref<1x16x2304xbf16, #tpu.memory_space<vmem>>, vector<1x8x256xbf16>,
    %c0_20 = arith.constant 0 : index
    %c0_21 = arith.constant 0 : index
    %c0_22 = arith.constant 0 : index
    %15 = vector.load %arg5[%c0_20, %c0_21, %c0_22] : memref<1x16x2304xbf16, #tpu.memory_space<vmem>>, vector<1x16x2304xbf16>
    %16 = vector.shape_cast %15 : vector<1x16x2304xbf16> to vector<16x2304xbf16>
    %c0_23 = arith.constant 0 : index
    %c0_24 = arith.constant 0 : index
    %17 = vector.load %arg2[%c0_23, %c0_24] : memref<2304x128xbf16, #tpu.memory_space<vmem>>, vector<2304x128xbf16>
    %cst_25 = arith.constant dense<0.000000e+00> : vector<16x128xf32>
    %18 = tpu.matmul %16, %17, %cst_25 {dimension_numbers = #tpu.dot_dimension_numbers<[1], [0], [0], [1], [0, 0, 1, 1], [], []>} : vector<16x2304xbf16>, vector<2304x128xbf16>, vector<16x128xf32> -> vector<16x128xf32>
    %19 = vector.shape_cast %18 : vector<16x128xf32> to vector<1x16x128xf32>
    %c0_26 = arith.constant 0 : index
    %c0_27 = arith.constant 0 : index
    %20 = vector.load %arg3[%c0_26, %c0_27] : memref<1x128xf32, #tpu.memory_space<vmem>>, vector<1x128xf32>
    %21 = vector.shape_cast %20 : vector<1x128xf32> to vector<1x1x128xf32>
    %22 = vector.broadcast %21 : vector<1x1x128xf32> to vector<1x16x128xf32>
    %23 = arith.addf %19, %22 : vector<1x16x128xf32>
    %cst_28 = arith.constant 0.000000e+00 : f32
    %24 = vector.broadcast %cst_28 : f32 to vector<1x16x128xf32>
    %25 = arith.cmpf ogt, %23, %24 : vector<1x16x128xf32>
    %cst_29 = arith.constant 0.000000e+00 : f32
    %26 = vector.broadcast %cst_29 : f32 to vector<1x16x128xf32>
    %27 = arith.minimumf %23, %26 : vector<1x16x128xf32>
    %28 = math.exp %27 : vector<1x16x128xf32>
    %cst_30 = arith.constant 1.000000e+00 : f32
    %29 = vector.broadcast %cst_30 : f32 to vector<1x16x128xf32>
    %30 = arith.subf %28, %29 : vector<1x16x128xf32>
    %cst_31 = arith.constant 1.67326319 : f32
    %31 = vector.broadcast %cst_31 : f32 to vector<1x16x128xf32>
    %32 = arith.mulf %31, %30 : vector<1x16x128xf32>
    %33 = arith.select %25, %23, %32 : vector<1x16x128xi1>, vector<1x16x128xf32>
    %cst_32 = arith.constant 1.05070102 : f32
    %34 = vector.broadcast %cst_32 : f32 to vector<1x16x128xf32>
    %35 = arith.mulf %34, %33 : vector<1x16x128xf32>
    %36 = arith.truncf %35 : vector<1x16x128xf32> to vector<1x16x128xbf16>
    %c0_33 = arith.constant 0 : index
    %c0_34 = arith.constant 0 : index
    %c0_35 = arith.constant 0 : index
    %37 = vector.load %arg4[%c0_33, %c0_34, %c0_35] : memref<1x16x128xbf16, #tpu.memory_space<vmem>>, vector<1x16x128xbf16>
    tpu.vector_store %arg4[%c0_33, %c0_34, %c0_35], %36 {strides = array<i32>} : memref<1x16x128xbf16, #tpu.memory_space<vmem>>, vector<1x16x128xbf16>,
    return
  }
  func.func @transform_0(%arg0: i32) -> (i32, i32, i32) {
    %c0_i32 = arith.constant 0 : i32
    %c0_i32_0 = arith.constant 0 : i32
    %c0_i32_1 = arith.constant 0 : i32
    return %arg0, %c0_i32, %c0_i32_0 : i32, i32, i32
  }
  func.func @transform_1(%arg0: i32) -> (i32, i32) {
    %c0_i32 = arith.constant 0 : i32
    %c0_i32_0 = arith.constant 0 : i32
    %c0_i32_1 = arith.constant 0 : i32
    return %c0_i32, %c0_i32_0 : i32, i32
  }
  func.func @transform_2(%arg0: i32) -> (i32, i32) {
    %c0_i32 = arith.constant 0 : i32
    %c0_i32_0 = arith.constant 0 : i32
    %c0_i32_1 = arith.constant 0 : i32
    return %c0_i32, %c0_i32_0 : i32, i32
  }
  func.func @transform_3(%arg0: i32) -> (i32, i32, i32) {
    %c0_i32 = arith.constant 0 : i32
    %c0_i32_0 = arith.constant 0 : i32
    %c0_i32_1 = arith.constant 0 : i32
    return %arg0, %c0_i32, %c0_i32_0 : i32, i32, i32
  }
}

module attributes {stable_mosaic.version = 11 : i64} {
  func.func @_deconv_selu_kernel(%arg0: i32, %arg1: memref<1x32x128xbf16, #tpu.memory_space<vmem>>, %arg2: memref<1152x128xbf16, #tpu.memory_space<vmem>>, %arg3: memref<1x128xf32, #tpu.memory_space<vmem>>, %arg4: memref<1x40x128xbf16, #tpu.memory_space<vmem>>, %arg5: memref<1x40x1152xbf16, #tpu.memory_space<vmem>>) attributes {dimension_semantics = [#tpu.dimension_semantics<parallel>], iteration_bounds = array<i64: 2>, scalar_prefetch = 0 : i64, scratch_operands = 1 : i64, tpu.core_type = #tpu.core_type<tc>, window_params = [{transform_indices = @transform_0, window_bounds = array<i64: 1, 32, 128>}, {pipeline_mode = #tpu.pipeline_mode<synchronous>, transform_indices = @transform_1, window_bounds = array<i64: 1152, 128>}, {pipeline_mode = #tpu.pipeline_mode<synchronous>, transform_indices = @transform_2, window_bounds = array<i64: 1, 128>}, {transform_indices = @transform_3, window_bounds = array<i64: 1, 40, 128>}]} {
    %cst = arith.constant 0.000000e+00 : bf16
    %0 = vector.broadcast %cst : bf16 to vector<1x8x1152xbf16>
    %c0 = arith.constant 0 : index
    %c0_0 = arith.constant 0 : index
    %c0_1 = arith.constant 0 : index
    %1 = vector.load %arg5[%c0, %c0_0, %c0_1] : memref<1x40x1152xbf16, #tpu.memory_space<vmem>>, vector<1x8x1152xbf16>
    tpu.vector_store %arg5[%c0, %c0_0, %c0_1], %0 {strides = array<i32>} : memref<1x40x1152xbf16, #tpu.memory_space<vmem>>, vector<1x8x1152xbf16>,
    %cst_2 = arith.constant 0.000000e+00 : bf16
    %2 = vector.broadcast %cst_2 : bf16 to vector<1x8x1152xbf16>
    %c0_3 = arith.constant 0 : index
    %c32 = arith.constant 32 : index
    %c0_4 = arith.constant 0 : index
    %3 = vector.load %arg5[%c0_3, %c32, %c0_4] : memref<1x40x1152xbf16, #tpu.memory_space<vmem>>, vector<1x8x1152xbf16>
    tpu.vector_store %arg5[%c0_3, %c32, %c0_4], %2 {strides = array<i32>} : memref<1x40x1152xbf16, #tpu.memory_space<vmem>>, vector<1x8x1152xbf16>,
    %c0_5 = arith.constant 0 : index
    %c0_6 = arith.constant 0 : index
    %c0_7 = arith.constant 0 : index
    %4 = vector.load %arg1[%c0_5, %c0_6, %c0_7] : memref<1x32x128xbf16, #tpu.memory_space<vmem>>, vector<1x32x128xbf16>
    %c0_8 = arith.constant 0 : index
    %c0_9 = arith.constant 0 : index
    %c0_10 = arith.constant 0 : index
    %5 = vector.load %arg5[%c0_8, %c0_9, %c0_10] : memref<1x40x1152xbf16, #tpu.memory_space<vmem>>, vector<1x32x128xbf16>
    tpu.vector_store %arg5[%c0_8, %c0_9, %c0_10], %4 {strides = array<i32>} : memref<1x40x1152xbf16, #tpu.memory_space<vmem>>, vector<1x32x128xbf16>,
    %c0_11 = arith.constant 0 : index
    %c1 = arith.constant 1 : index
    %c128 = arith.constant 128 : index
    %6 = vector.load %arg5[%c0_11, %c1, %c128] : memref<1x40x1152xbf16, #tpu.memory_space<vmem>>, vector<1x32x128xbf16>
    tpu.vector_store %arg5[%c0_11, %c1, %c128], %4 {strides = array<i32>} : memref<1x40x1152xbf16, #tpu.memory_space<vmem>>, vector<1x32x128xbf16>,
    %c0_12 = arith.constant 0 : index
    %c2 = arith.constant 2 : index
    %c256 = arith.constant 256 : index
    %7 = vector.load %arg5[%c0_12, %c2, %c256] : memref<1x40x1152xbf16, #tpu.memory_space<vmem>>, vector<1x32x128xbf16>
    tpu.vector_store %arg5[%c0_12, %c2, %c256], %4 {strides = array<i32>} : memref<1x40x1152xbf16, #tpu.memory_space<vmem>>, vector<1x32x128xbf16>,
    %c0_13 = arith.constant 0 : index
    %c3 = arith.constant 3 : index
    %c384 = arith.constant 384 : index
    %8 = vector.load %arg5[%c0_13, %c3, %c384] : memref<1x40x1152xbf16, #tpu.memory_space<vmem>>, vector<1x32x128xbf16>
    tpu.vector_store %arg5[%c0_13, %c3, %c384], %4 {strides = array<i32>} : memref<1x40x1152xbf16, #tpu.memory_space<vmem>>, vector<1x32x128xbf16>,
    %c0_14 = arith.constant 0 : index
    %c4 = arith.constant 4 : index
    %c512 = arith.constant 512 : index
    %9 = vector.load %arg5[%c0_14, %c4, %c512] : memref<1x40x1152xbf16, #tpu.memory_space<vmem>>, vector<1x32x128xbf16>
    tpu.vector_store %arg5[%c0_14, %c4, %c512], %4 {strides = array<i32>} : memref<1x40x1152xbf16, #tpu.memory_space<vmem>>, vector<1x32x128xbf16>,
    %c0_15 = arith.constant 0 : index
    %c5 = arith.constant 5 : index
    %c640 = arith.constant 640 : index
    %10 = vector.load %arg5[%c0_15, %c5, %c640] : memref<1x40x1152xbf16, #tpu.memory_space<vmem>>, vector<1x32x128xbf16>
    tpu.vector_store %arg5[%c0_15, %c5, %c640], %4 {strides = array<i32>} : memref<1x40x1152xbf16, #tpu.memory_space<vmem>>, vector<1x32x128xbf16>,
    %c0_16 = arith.constant 0 : index
    %c6 = arith.constant 6 : index
    %c768 = arith.constant 768 : index
    %11 = vector.load %arg5[%c0_16, %c6, %c768] : memref<1x40x1152xbf16, #tpu.memory_space<vmem>>, vector<1x32x128xbf16>
    tpu.vector_store %arg5[%c0_16, %c6, %c768], %4 {strides = array<i32>} : memref<1x40x1152xbf16, #tpu.memory_space<vmem>>, vector<1x32x128xbf16>,
    %c0_17 = arith.constant 0 : index
    %c7 = arith.constant 7 : index
    %c896 = arith.constant 896 : index
    %12 = vector.load %arg5[%c0_17, %c7, %c896] : memref<1x40x1152xbf16, #tpu.memory_space<vmem>>, vector<1x32x128xbf16>
    tpu.vector_store %arg5[%c0_17, %c7, %c896], %4 {strides = array<i32>} : memref<1x40x1152xbf16, #tpu.memory_space<vmem>>, vector<1x32x128xbf16>,
    %c0_18 = arith.constant 0 : index
    %c8 = arith.constant 8 : index
    %c1024 = arith.constant 1024 : index
    %13 = vector.load %arg5[%c0_18, %c8, %c1024] : memref<1x40x1152xbf16, #tpu.memory_space<vmem>>, vector<1x32x128xbf16>
    tpu.vector_store %arg5[%c0_18, %c8, %c1024], %4 {strides = array<i32>} : memref<1x40x1152xbf16, #tpu.memory_space<vmem>>, vector<1x32x128xbf16>,
    %c0_19 = arith.constant 0 : index
    %c0_20 = arith.constant 0 : index
    %c0_21 = arith.constant 0 : index
    %14 = vector.load %arg5[%c0_19, %c0_20, %c0_21] : memref<1x40x1152xbf16, #tpu.memory_space<vmem>>, vector<1x40x1152xbf16>
    %15 = vector.shape_cast %14 : vector<1x40x1152xbf16> to vector<40x1152xbf16>
    %c0_22 = arith.constant 0 : index
    %c0_23 = arith.constant 0 : index
    %16 = vector.load %arg2[%c0_22, %c0_23] : memref<1152x128xbf16, #tpu.memory_space<vmem>>, vector<1152x128xbf16>
    %cst_24 = arith.constant dense<0.000000e+00> : vector<40x128xf32>
    %17 = tpu.matmul %15, %16, %cst_24 {dimension_numbers = #tpu.dot_dimension_numbers<[1], [0], [0], [1], [0, 0, 1, 1], [], []>} : vector<40x1152xbf16>, vector<1152x128xbf16>, vector<40x128xf32> -> vector<40x128xf32>
    %18 = vector.shape_cast %17 : vector<40x128xf32> to vector<1x40x128xf32>
    %c0_25 = arith.constant 0 : index
    %c0_26 = arith.constant 0 : index
    %19 = vector.load %arg3[%c0_25, %c0_26] : memref<1x128xf32, #tpu.memory_space<vmem>>, vector<1x128xf32>
    %20 = vector.shape_cast %19 : vector<1x128xf32> to vector<1x1x128xf32>
    %21 = vector.broadcast %20 : vector<1x1x128xf32> to vector<1x40x128xf32>
    %22 = arith.addf %18, %21 : vector<1x40x128xf32>
    %cst_27 = arith.constant 0.000000e+00 : f32
    %23 = vector.broadcast %cst_27 : f32 to vector<1x40x128xf32>
    %24 = arith.cmpf ogt, %22, %23 : vector<1x40x128xf32>
    %cst_28 = arith.constant 0.000000e+00 : f32
    %25 = vector.broadcast %cst_28 : f32 to vector<1x40x128xf32>
    %26 = arith.minimumf %22, %25 : vector<1x40x128xf32>
    %27 = math.exp %26 : vector<1x40x128xf32>
    %cst_29 = arith.constant 1.000000e+00 : f32
    %28 = vector.broadcast %cst_29 : f32 to vector<1x40x128xf32>
    %29 = arith.subf %27, %28 : vector<1x40x128xf32>
    %cst_30 = arith.constant 1.67326319 : f32
    %30 = vector.broadcast %cst_30 : f32 to vector<1x40x128xf32>
    %31 = arith.mulf %30, %29 : vector<1x40x128xf32>
    %32 = arith.select %24, %22, %31 : vector<1x40x128xi1>, vector<1x40x128xf32>
    %cst_31 = arith.constant 1.05070102 : f32
    %33 = vector.broadcast %cst_31 : f32 to vector<1x40x128xf32>
    %34 = arith.mulf %33, %32 : vector<1x40x128xf32>
    %35 = arith.truncf %34 : vector<1x40x128xf32> to vector<1x40x128xbf16>
    %c0_32 = arith.constant 0 : index
    %c0_33 = arith.constant 0 : index
    %c0_34 = arith.constant 0 : index
    %36 = vector.load %arg4[%c0_32, %c0_33, %c0_34] : memref<1x40x128xbf16, #tpu.memory_space<vmem>>, vector<1x40x128xbf16>
    tpu.vector_store %arg4[%c0_32, %c0_33, %c0_34], %35 {strides = array<i32>} : memref<1x40x128xbf16, #tpu.memory_space<vmem>>, vector<1x40x128xbf16>,
    return
  }
  func.func @transform_0(%arg0: i32) -> (i32, i32, i32) {
    %c0_i32 = arith.constant 0 : i32
    %c0_i32_0 = arith.constant 0 : i32
    %c0_i32_1 = arith.constant 0 : i32
    return %arg0, %c0_i32, %c0_i32_0 : i32, i32, i32
  }
  func.func @transform_1(%arg0: i32) -> (i32, i32) {
    %c0_i32 = arith.constant 0 : i32
    %c0_i32_0 = arith.constant 0 : i32
    %c0_i32_1 = arith.constant 0 : i32
    return %c0_i32, %c0_i32_0 : i32, i32
  }
  func.func @transform_2(%arg0: i32) -> (i32, i32) {
    %c0_i32 = arith.constant 0 : i32
    %c0_i32_0 = arith.constant 0 : i32
    %c0_i32_1 = arith.constant 0 : i32
    return %c0_i32, %c0_i32_0 : i32, i32
  }
  func.func @transform_3(%arg0: i32) -> (i32, i32, i32) {
    %c0_i32 = arith.constant 0 : i32
    %c0_i32_0 = arith.constant 0 : i32
    %c0_i32_1 = arith.constant 0 : i32
    return %arg0, %c0_i32, %c0_i32_0 : i32, i32, i32
  }
}

module attributes {stable_mosaic.version = 11 : i64} {
  func.func @_deconv_selu_kernel(%arg0: i32, %arg1: memref<1x80x64xbf16, #tpu.memory_space<vmem>>, %arg2: memref<576x128xbf16, #tpu.memory_space<vmem>>, %arg3: memref<1x128xf32, #tpu.memory_space<vmem>>, %arg4: memref<1x88x128xf32, #tpu.memory_space<vmem>>, %arg5: memref<1x88x576xbf16, #tpu.memory_space<vmem>>) attributes {dimension_semantics = [#tpu.dimension_semantics<parallel>], iteration_bounds = array<i64: 2>, scalar_prefetch = 0 : i64, scratch_operands = 1 : i64, tpu.core_type = #tpu.core_type<tc>, window_params = [{transform_indices = @transform_0, window_bounds = array<i64: 1, 80, 64>}, {pipeline_mode = #tpu.pipeline_mode<synchronous>, transform_indices = @transform_1, window_bounds = array<i64: 576, 128>}, {pipeline_mode = #tpu.pipeline_mode<synchronous>, transform_indices = @transform_2, window_bounds = array<i64: 1, 128>}, {transform_indices = @transform_3, window_bounds = array<i64: 1, 88, 128>}]} {
    %cst = arith.constant 0.000000e+00 : bf16
    %0 = vector.broadcast %cst : bf16 to vector<1x8x576xbf16>
    %c0 = arith.constant 0 : index
    %c0_0 = arith.constant 0 : index
    %c0_1 = arith.constant 0 : index
    %1 = vector.load %arg5[%c0, %c0_0, %c0_1] : memref<1x88x576xbf16, #tpu.memory_space<vmem>>, vector<1x8x576xbf16>
    tpu.vector_store %arg5[%c0, %c0_0, %c0_1], %0 {strides = array<i32>} : memref<1x88x576xbf16, #tpu.memory_space<vmem>>, vector<1x8x576xbf16>,
    %cst_2 = arith.constant 0.000000e+00 : bf16
    %2 = vector.broadcast %cst_2 : bf16 to vector<1x8x576xbf16>
    %c0_3 = arith.constant 0 : index
    %c80 = arith.constant 80 : index
    %c0_4 = arith.constant 0 : index
    %3 = vector.load %arg5[%c0_3, %c80, %c0_4] : memref<1x88x576xbf16, #tpu.memory_space<vmem>>, vector<1x8x576xbf16>
    tpu.vector_store %arg5[%c0_3, %c80, %c0_4], %2 {strides = array<i32>} : memref<1x88x576xbf16, #tpu.memory_space<vmem>>, vector<1x8x576xbf16>,
    %c0_5 = arith.constant 0 : index
    %c0_6 = arith.constant 0 : index
    %c0_7 = arith.constant 0 : index
    %4 = vector.load %arg1[%c0_5, %c0_6, %c0_7] : memref<1x80x64xbf16, #tpu.memory_space<vmem>>, vector<1x80x64xbf16>
    %c0_8 = arith.constant 0 : index
    %c0_9 = arith.constant 0 : index
    %c0_10 = arith.constant 0 : index
    %5 = vector.load %arg5[%c0_8, %c0_9, %c0_10] : memref<1x88x576xbf16, #tpu.memory_space<vmem>>, vector<1x80x64xbf16>
    tpu.vector_store %arg5[%c0_8, %c0_9, %c0_10], %4 {strides = array<i32>} : memref<1x88x576xbf16, #tpu.memory_space<vmem>>, vector<1x80x64xbf16>,
    %c0_11 = arith.constant 0 : index
    %c1 = arith.constant 1 : index
    %c64 = arith.constant 64 : index
    %6 = vector.load %arg5[%c0_11, %c1, %c64] : memref<1x88x576xbf16, #tpu.memory_space<vmem>>, vector<1x80x64xbf16>
    tpu.vector_store %arg5[%c0_11, %c1, %c64], %4 {strides = array<i32>} : memref<1x88x576xbf16, #tpu.memory_space<vmem>>, vector<1x80x64xbf16>,
    %c0_12 = arith.constant 0 : index
    %c2 = arith.constant 2 : index
    %c128 = arith.constant 128 : index
    %7 = vector.load %arg5[%c0_12, %c2, %c128] : memref<1x88x576xbf16, #tpu.memory_space<vmem>>, vector<1x80x64xbf16>
    tpu.vector_store %arg5[%c0_12, %c2, %c128], %4 {strides = array<i32>} : memref<1x88x576xbf16, #tpu.memory_space<vmem>>, vector<1x80x64xbf16>,
    %c0_13 = arith.constant 0 : index
    %c3 = arith.constant 3 : index
    %c192 = arith.constant 192 : index
    %8 = vector.load %arg5[%c0_13, %c3, %c192] : memref<1x88x576xbf16, #tpu.memory_space<vmem>>, vector<1x80x64xbf16>
    tpu.vector_store %arg5[%c0_13, %c3, %c192], %4 {strides = array<i32>} : memref<1x88x576xbf16, #tpu.memory_space<vmem>>, vector<1x80x64xbf16>,
    %c0_14 = arith.constant 0 : index
    %c4 = arith.constant 4 : index
    %c256 = arith.constant 256 : index
    %9 = vector.load %arg5[%c0_14, %c4, %c256] : memref<1x88x576xbf16, #tpu.memory_space<vmem>>, vector<1x80x64xbf16>
    tpu.vector_store %arg5[%c0_14, %c4, %c256], %4 {strides = array<i32>} : memref<1x88x576xbf16, #tpu.memory_space<vmem>>, vector<1x80x64xbf16>,
    %c0_15 = arith.constant 0 : index
    %c5 = arith.constant 5 : index
    %c320 = arith.constant 320 : index
    %10 = vector.load %arg5[%c0_15, %c5, %c320] : memref<1x88x576xbf16, #tpu.memory_space<vmem>>, vector<1x80x64xbf16>
    tpu.vector_store %arg5[%c0_15, %c5, %c320], %4 {strides = array<i32>} : memref<1x88x576xbf16, #tpu.memory_space<vmem>>, vector<1x80x64xbf16>,
    %c0_16 = arith.constant 0 : index
    %c6 = arith.constant 6 : index
    %c384 = arith.constant 384 : index
    %11 = vector.load %arg5[%c0_16, %c6, %c384] : memref<1x88x576xbf16, #tpu.memory_space<vmem>>, vector<1x80x64xbf16>
    tpu.vector_store %arg5[%c0_16, %c6, %c384], %4 {strides = array<i32>} : memref<1x88x576xbf16, #tpu.memory_space<vmem>>, vector<1x80x64xbf16>,
    %c0_17 = arith.constant 0 : index
    %c7 = arith.constant 7 : index
    %c448 = arith.constant 448 : index
    %12 = vector.load %arg5[%c0_17, %c7, %c448] : memref<1x88x576xbf16, #tpu.memory_space<vmem>>, vector<1x80x64xbf16>
    tpu.vector_store %arg5[%c0_17, %c7, %c448], %4 {strides = array<i32>} : memref<1x88x576xbf16, #tpu.memory_space<vmem>>, vector<1x80x64xbf16>,
    %c0_18 = arith.constant 0 : index
    %c8 = arith.constant 8 : index
    %c512 = arith.constant 512 : index
    %13 = vector.load %arg5[%c0_18, %c8, %c512] : memref<1x88x576xbf16, #tpu.memory_space<vmem>>, vector<1x80x64xbf16>
    tpu.vector_store %arg5[%c0_18, %c8, %c512], %4 {strides = array<i32>} : memref<1x88x576xbf16, #tpu.memory_space<vmem>>, vector<1x80x64xbf16>,
    %c0_19 = arith.constant 0 : index
    %c0_20 = arith.constant 0 : index
    %c0_21 = arith.constant 0 : index
    %14 = vector.load %arg5[%c0_19, %c0_20, %c0_21] : memref<1x88x576xbf16, #tpu.memory_space<vmem>>, vector<1x88x576xbf16>
    %15 = vector.shape_cast %14 : vector<1x88x576xbf16> to vector<88x576xbf16>
    %c0_22 = arith.constant 0 : index
    %c0_23 = arith.constant 0 : index
    %16 = vector.load %arg2[%c0_22, %c0_23] : memref<576x128xbf16, #tpu.memory_space<vmem>>, vector<576x128xbf16>
    %cst_24 = arith.constant dense<0.000000e+00> : vector<88x128xf32>
    %17 = tpu.matmul %15, %16, %cst_24 {dimension_numbers = #tpu.dot_dimension_numbers<[1], [0], [0], [1], [0, 0, 1, 1], [], []>} : vector<88x576xbf16>, vector<576x128xbf16>, vector<88x128xf32> -> vector<88x128xf32>
    %18 = vector.shape_cast %17 : vector<88x128xf32> to vector<1x88x128xf32>
    %c0_25 = arith.constant 0 : index
    %c0_26 = arith.constant 0 : index
    %19 = vector.load %arg3[%c0_25, %c0_26] : memref<1x128xf32, #tpu.memory_space<vmem>>, vector<1x128xf32>
    %20 = vector.shape_cast %19 : vector<1x128xf32> to vector<1x1x128xf32>
    %21 = vector.broadcast %20 : vector<1x1x128xf32> to vector<1x88x128xf32>
    %22 = arith.addf %18, %21 : vector<1x88x128xf32>
    %cst_27 = arith.constant 0.000000e+00 : f32
    %23 = vector.broadcast %cst_27 : f32 to vector<1x88x128xf32>
    %24 = arith.cmpf ogt, %22, %23 : vector<1x88x128xf32>
    %cst_28 = arith.constant 0.000000e+00 : f32
    %25 = vector.broadcast %cst_28 : f32 to vector<1x88x128xf32>
    %26 = arith.minimumf %22, %25 : vector<1x88x128xf32>
    %27 = math.exp %26 : vector<1x88x128xf32>
    %cst_29 = arith.constant 1.000000e+00 : f32
    %28 = vector.broadcast %cst_29 : f32 to vector<1x88x128xf32>
    %29 = arith.subf %27, %28 : vector<1x88x128xf32>
    %cst_30 = arith.constant 1.67326319 : f32
    %30 = vector.broadcast %cst_30 : f32 to vector<1x88x128xf32>
    %31 = arith.mulf %30, %29 : vector<1x88x128xf32>
    %32 = arith.select %24, %22, %31 : vector<1x88x128xi1>, vector<1x88x128xf32>
    %cst_31 = arith.constant 1.05070102 : f32
    %33 = vector.broadcast %cst_31 : f32 to vector<1x88x128xf32>
    %34 = arith.mulf %33, %32 : vector<1x88x128xf32>
    %c0_32 = arith.constant 0 : index
    %c0_33 = arith.constant 0 : index
    %c0_34 = arith.constant 0 : index
    %35 = vector.load %arg4[%c0_32, %c0_33, %c0_34] : memref<1x88x128xf32, #tpu.memory_space<vmem>>, vector<1x88x128xf32>
    tpu.vector_store %arg4[%c0_32, %c0_33, %c0_34], %34 {strides = array<i32>} : memref<1x88x128xf32, #tpu.memory_space<vmem>>, vector<1x88x128xf32>,
    return
  }
  func.func @transform_0(%arg0: i32) -> (i32, i32, i32) {
    %c0_i32 = arith.constant 0 : i32
    %c0_i32_0 = arith.constant 0 : i32
    %c0_i32_1 = arith.constant 0 : i32
    return %arg0, %c0_i32, %c0_i32_0 : i32, i32, i32
  }
  func.func @transform_1(%arg0: i32) -> (i32, i32) {
    %c0_i32 = arith.constant 0 : i32
    %c0_i32_0 = arith.constant 0 : i32
    %c0_i32_1 = arith.constant 0 : i32
    return %c0_i32, %c0_i32_0 : i32, i32
  }
  func.func @transform_2(%arg0: i32) -> (i32, i32) {
    %c0_i32 = arith.constant 0 : i32
    %c0_i32_0 = arith.constant 0 : i32
    %c0_i32_1 = arith.constant 0 : i32
    return %c0_i32, %c0_i32_0 : i32, i32
  }
  func.func @transform_3(%arg0: i32) -> (i32, i32, i32) {
    %c0_i32 = arith.constant 0 : i32
    %c0_i32_0 = arith.constant 0 : i32
    %c0_i32_1 = arith.constant 0 : i32
    return %arg0, %c0_i32, %c0_i32_0 : i32, i32, i32
  }
}

</mosaic_0001>

<bundles_post_ra>
// kernel: _forward_impl.3
= control target key start
LH: loop header
LB: loop body
LE: loop exit
PB: predicated region body
PF: predicated region fallthrough
CT: control target
= control target key end

     0   :  { %s2634_s12 = smov 0   ;;  %s3194_s0 = inlined_call_operand.vmem [shape: f32[2,8,256], index: 0, kind: input, shape index: {}]   ;;  %s3195_s1 = inlined_call_operand.vmem [shape: bf16[2304,128], index: 1, kind: input, shape index: {}]   ;;  %s3196_s2 = inlined_call_operand.vmem [shape: f32[1,128], index: 2, kind: input, shape index: {}]   ;;  %s3197_s3 = inlined_call_operand.vmem [shape: bf16[2,16,128], index: 3, kind: output, shape index: {}]  }
   0x1 LB: > { %s2045_s13 = sadd.s32 4294967295, %s2611_s12   ;;  %p2049_p0 = scmp.ge.s32.totalorder %s2611_s12, 1  ;;  %s2611_s12 = sphi %s2634_s12, %s13_s12  }
   0x2   : > { %p137_p1 = scmp.lt.s32.totalorder %s2611_s12, 3 }
   0x4   : > { %p138_p2 = pnand %p2049_p0, %p137_p1 }
   0x5   : > { %p161_p3 = scmp.lt.s32.totalorder (!%p138_p2), %s2045_s13, 1 }
   0x6   : > { %141 = sbr.rel (%p138_p2) target bundleno = 406 (0x196), region = 32 }
   0xb   : > { %v2441_v0 = vld [vmem:[%s3195_s1 + $0x78] sm:$0xff]   ;;  %v2613_v3 = vmov 0   ;;  %v2445_v5 = vld [vmem:[%s3195_s1 + $0x70] sm:$0xff]   ;;  %v2449_v9 = vld [vmem:[%s3195_s1 + $0x68] sm:$0xff]   ;;  %s3211_s13 = smov (!%p161_p3, %s2045_s13), 1  ;;  %vm211_vm0 = vcmask 1043456  }
   0xc   : > { %v2442_v1 = vld [vmem:[%s3195_s1 + $0xf8] sm:$0xff]   ;;  %2234 = vmatprep.subr.bf16.mxu0 %v2441_v0  ;;  %181 = vst [vmem:[#allocation2 + $0x40] sm:$0xff] %v2613_v3  ;;  %174 = vst [vmem:[#allocation2 + $0x78] sm:$0xff] %v2613_v3  ;;  %v2446_v6 = vld [vmem:[%s3195_s1 + $0xf0] sm:$0xff]   ;;  %s2224_s18 = sshll.u32 %s3211_s13, 4  ;;  %vm214_vm1 = vcmask 1047556  }
   0xd   : > { %v2443_v2 = vld [vmem:[%s3195_s1 + $0x38] sm:$0xff]   ;;  %175 = vst [vmem:[#allocation2 + $0x58] sm:$0xff] %v2613_v3  ;;  %176 = vst [vmem:[#allocation2 + $0x20] sm:$0xff] %v2613_v3  ;;  %2256 = vmatprep.subr.bf16.mxu1 %v2442_v1  ;;  %v2447_v7 = vld [vmem:[%s3195_s1 + $0x30] sm:$0xff]   ;;  %s165_s27 = scalar_lea.vmem %s3194_s0, %s2224_s18  ;;  %vm212_vm2 = vsmask.f32 7938 }
   0xe   : > { %177 = vst [vmem:[#allocation2 + $0x8] sm:$0xff] %v2613_v3  ;;  %178 = vst [vmem:[#allocation2 + $0x70] sm:$0xff] %v2613_v3  ;;  %v2444_v4 = vld [vmem:[%s3195_s1 + $0xb8] sm:$0xff]   ;;  %2235 = vmatpush3.bf16.msra.mxu0 %v2443_v2  ;;  %v2448_v8 = vld [vmem:[%s3195_s1 + $0xb0] sm:$0xff]   ;;  %vm215_vm3 = vsmask.f32 7954 }
   0xf   : > { %179 = vst [vmem:[#allocation2 + $0x80] sm:$0xff] %v2613_v3  ;;  %182 = vst [vmem:[#allocation2 + $0x50] sm:$0xff] %v2613_v3  ;;  %2257 = vmatpush3.bf16.msra.mxu1 %v2444_v4  ;;  %2236 = vmatprep.subr.bf16.mxu0 %v2445_v5  ;;  %v2450_v10 = vld [vmem:[%s3195_s1 + $0xe8] sm:$0xff]   ;;  %v2453_v13 = vld [vmem:[%s3195_s1 + $0x60] sm:$0xff]   ;;  %vm221_vm5 = vcmask 1040384   ;;  %vm224_vm8 = vcmask 1044484  }
  0x10   : > { %183 = vst [vmem:[#allocation2 + $0x28] sm:$0xff] %v2613_v3  ;;  %184 = vst [vmem:[#allocation2 + $0x10] sm:$0xff] %v2613_v3  ;;  %2258 = vmatprep.subr.bf16.mxu1 %v2446_v6  ;;  %v2451_v11 = vld [vmem:[%s3195_s1 + $0x28] sm:$0xff]   ;;  %v2454_v14 = vld [vmem:[%s3195_s1 + $0xe0] sm:$0xff]   ;;  %vm222_vm6 = vsmask.f32 256 }
  0x11   : > { %185 = vst [vmem:[#allocation2 + $0x48] sm:$0xff] %v2613_v3  ;;  %186 = vst [vmem:[#allocation2 + $0x30] sm:$0xff] %v2613_v3  ;;  %v2452_v12 = vld [vmem:[%s3195_s1 + $0xa8] sm:$0xff]   ;;  %v2455_v15 = vld [vmem:[%s3195_s1 + $0x20] sm:$0xff]   ;;  %vm225_vm9 = vsmask.f32 4352 }
  0x12   : > { %187 = vst [vmem:[#allocation2 + $0x18] sm:$0xff] %v2613_v3  ;;  %2237 = vmatpush3.bf16.msra.mxu0 %v2447_v7  ;;  %v2456_v16 = vld [vmem:[%s3195_s1 + $0xa0] sm:$0xff]   ;;  %v2457_v17 = vld [vmem:[%s3195_s1 + $0x58] sm:$0xff]   ;;  %v2461_v21 = vld [vmem:[%s3195_s1 + $0x50] sm:$0xff]   ;;  %vm244_vm14 = vsmask.f32 7942 }
  0x13   : > { %2259 = vmatpush3.bf16.msra.mxu1 %v2448_v8  ;;  %2238 = vmatprep.subr.bf16.mxu0 %v2449_v9  ;;  %v2458_v18 = vld [vmem:[%s3195_s1 + $0xd8] sm:$0xff]   ;;  %v2462_v22 = vld [vmem:[%s3195_s1 + $0xd0] sm:$0xff]   ;;  %v2465_v25 = vld [vmem:[%s3195_s1 + $0x48] sm:$0xff]   ;;  %vm243_vm15 = vcmask 1043457   ;;  %s2225_s6 = sshll.u32 %s3211_s13, 3 }
  0x14   : > { %2260 = vmatprep.subr.bf16.mxu1 %v2450_v10  ;;  %v2459_v19 = vld [vmem:[%s3195_s1 + $0x18] sm:$0xff]   ;;  %v2463_v23 = vld [vmem:[%s3195_s1 + $0x10] sm:$0xff]   ;;  %v2466_v26 = vld [vmem:[%s3195_s1 + $0xc8] sm:$0xff]   ;;  %s170_s9 = scalar_lea.vmem %s3197_s3, %s2225_s6 }
  0x15   : > { %v2460_v20 = vld [vmem:[%s3195_s1 + $0x98] sm:$0xff]   ;;  %v2464_v24 = vld [vmem:[%s3195_s1 + $0x90] sm:$0xff]   ;;  %v2467_v27 = vld [vmem:[%s3195_s1 + $0x8] sm:$0xff]  }
  0x16   : > { %2239 = vmatpush3.bf16.msra.mxu0 %v2451_v11  ;;  %v2468_v28 = vld [vmem:[%s3195_s1 + $0x88] sm:$0xff]   ;;  %v2469_v29 = vld [vmem:[%s3195_s1 + $0x40] sm:$0xff]   ;;  %vm2762_vm4 = vmand %vm211_vm0, %vm212_vm2  ;;  %vm246_vm2 = vcmask 1047557  }
  0x17   : > { %2261 = vmatpush3.bf16.msra.mxu1 %v2452_v12  ;;  %2240 = vmatprep.subr.bf16.mxu0 %v2453_v13  ;;  %v2470_v30 = vld [vmem:[%s3195_s1 + $0xc0] sm:$0xff]   ;;  %v191_v34 = vld [vmem:[%s165_s27 + $0x8] sm:$0xff]  ;;  %vm2767_vm7 = vmand %vm214_vm1, %vm215_vm3  ;;  %vm247_vm3 = vsmask.f32 7958 }
  0x18   : > { %2262 = vmatprep.subr.bf16.mxu1 %v2454_v14  ;;  %v2471_v31 = vld [vmem:[%s3195_s1] sm:$0xff]   ;;  %vm217_vm10 = vmor %vm2767_vm7, %vm2762_vm4  ;;  %v2473_v42 = vld [vmem:[%s3195_s1 + $0x178] sm:$0xff]   ;;  %vm253_vm4 = vcmask 1041408   ;;  %vm256_vm7 = vcmask 1045508  }
  0x19   : > { %v2472_v32 = vld [vmem:[%s3195_s1 + $0x80] sm:$0xff]   ;;  %vm2784_vm11 = vmand %vm221_vm5, %vm222_vm6  ;;  %v228_v44 = vld [vmem:[#allocation2 + $0x50] sm:$0x11]  ;;  %vm254_vm6 = vsmask.f32 1280 }
  0x1a   : > { %2241 = vmatpush3.bf16.msra.mxu0 %v2455_v15  ;;  %v190_v33 = vld [vmem:[%s165_s27] sm:$0xff]  ;;  %vm2790_vm12 = vmand %vm224_vm8, %vm225_vm9  ;;  %v2474_v49 = vld [vmem:[%s3195_s1 + $0x138] sm:$0xff]   ;;  %vm257_vm9 = vsmask.f32 5376 }
  0x1b   : > { %2263 = vmatpush3.bf16.msra.mxu1 %v2456_v16  ;;  %2242 = vmatprep.subr.bf16.mxu0 %v2457_v17  ;;  %v2226_v35 = vpack.c.bf16 %v191_v34, %v190_v33  ;;  %vm227_vm13 = vmor %vm2790_vm12, %vm2784_vm11  ;;  %v2475_v50 = vld [vmem:[%s3195_s1 + $0x1f8] sm:$0xff]   ;;  %v2477_v58 = vld [vmem:[%s3195_s1 + $0x170] sm:$0xff]  }
  0x1c   : > { %2264 = vmatprep.subr.bf16.mxu1 %v2458_v18  ;;  %v2478_v59 = vld [vmem:[%s3195_s1 + $0x130] sm:$0xff]   ;;  %v2481_v63 = vld [vmem:[%s3195_s1 + $0x168] sm:$0xff]   ;;  %v2476_v4 = vld [vmem:[%s3195_s1 + $0x1b8] sm:$0xff]  }
  0x1d   : > { %v2055_v38 = vcombine.low %v2226_v35, %v2613_v3  ;;  %v2056_v39 = vcombine.high %v2226_v35, %v2613_v3  ;;  %v2773_v40 = vshrl.u32 %v2226_v35, 16  ;;  %v2775_v41 = vshll.u32 %v2226_v35, 16  ;;  %325 = vst [vmem:[#allocation2 + $0x60] sm:$0xff] %v2226_v35  ;;  %v2482_v1 = vld [vmem:[%s3195_s1 + $0x128] sm:$0xff]   ;;  %v2485_v6 = vld [vmem:[%s3195_s1 + $0x160] sm:$0xff]   ;;  %v2479_v11 = vld [vmem:[%s3195_s1 + $0x1f0] sm:$0xff]  }
  0x1e   : > { %2243 = vmatpush3.bf16.msra.mxu0 %v2459_v19  ;;  %v231_v45 = vrot.slane %v2226_v35, 7  ;;  %v263_v46 = vrot.slane %v2226_v35, 6  ;;  %v295_v61 = vrot.slane %v2226_v35, 5  ;;  %v2486_v10 = vld [vmem:[%s3195_s1 + $0x120] sm:$0xff]   ;;  %v2480_v12 = vld [vmem:[%s3195_s1 + $0x1b0] sm:$0xff]   ;;  %v2489_v13 = vld [vmem:[%s3195_s1 + $0x158] sm:$0xff]  }
  0x1f   : > { %2265 = vmatpush3.bf16.msra.mxu1 %v2460_v20  ;;  %2244 = vmatprep.subr.bf16.mxu0 %v2461_v21  ;;  %v204_v47 = vrot.slane %v2773_v40, 7  ;;  %v269_v55 = vrot.slane %v2773_v40, 5  ;;  %v270_v60 = vrot.slane %v2775_v41, 6  ;;  %v301_v2 = vrot.slane %v2775_v41, 5  ;;  %v2490_v14 = vld [vmem:[%s3195_s1 + $0x118] sm:$0xff]   ;;  %v2483_v15 = vld [vmem:[%s3195_s1 + $0x1e8] sm:$0xff]   ;;  %vm245_vm5 = vmand %vm243_vm15, %vm244_vm14 }
  0x20   : > { %2266 = vmatprep.subr.bf16.mxu1 %v2462_v22  ;;  %1618 = vmatprep.mubr.bf16.mxu0 %v2056_v39  ;;  %v232_v51 = vrot.slane %v231_v45, 4  ;;  %235 = vst [vmem:[#allocation2 + $0x78] sm:$0xee] %v231_v45  ;;  %267 = vst [vmem:[#allocation2 + $0x20] sm:$0xcc] %v263_v46  ;;  %v264_v54 = vrot.slane %v263_v46, 4 }
  0x21   : > { %v207_v52 = vor.u32 %v2775_v41, %v204_v47  ;;  %v208_v53 = vrot.slane %v204_v47, 4  ;;  %v2818_v62 = vor.u32 %v270_v60, %v269_v55  ;;  %v296_v0 = vrot.slane %v295_v61, 4  ;;  %299 = vst [vmem:[#allocation2 + $0x70] sm:$0x88] %v295_v61  ;;  %v2484_v16 = vld [vmem:[%s3195_s1 + $0x1a8] sm:$0xff]   ;;  %v2493_v17 = vld [vmem:[%s3195_s1 + $0x150] sm:$0xff]   ;;  %vm248_vm8 = vmand %vm246_vm2, %vm247_vm3 }
  0x22   : > { %2245 = vmatpush3.bf16.msra.mxu0 %v2463_v23  ;;  %236 = vst [vmem:[#allocation2 + $0x28] sm:$0x11] %v232_v51  ;;  %268 = vst [vmem:[#allocation2 + $0x48] sm:$0x33] %v264_v54  ;;  %v302_v3 = vrot.slane %v2773_v40, 4  ;;  %v2494_v18 = vld [vmem:[%s3195_s1 + $0x110] sm:$0xff]  }
  0x23   : > { %2267 = vmatpush3.bf16.msra.mxu1 %v2464_v24  ;;  %2246 = vmatprep.subr.bf16.mxu0 %v2465_v25  ;;  %v219_v56 = vsel %vm217_vm10, %v207_v52, 0  ;;  %v229_v57 = vsel %vm227_vm13, %v208_v53, %v228_v44  ;;  %300 = vst [vmem:[#allocation2 + $0x18] sm:$0x77] %v296_v0  ;;  %v2487_v19 = vld [vmem:[%s3195_s1 + $0x1e0] sm:$0xff]   ;;  %v2497_v21 = vld [vmem:[%s3195_s1 + $0x148] sm:$0xff]   ;;  %v2491_v23 = vld [vmem:[%s3195_s1 + $0x1d8] sm:$0xff]  }
  0x24   : > { %2268 = vmatprep.subr.bf16.mxu1 %v2466_v26  ;;  %230 = vst [vmem:[#allocation2 + $0x50] sm:$0x11] %v229_v57  ;;  %v2836_v7 = vor.u32 %v302_v3, %v301_v2  ;;  %v2488_v20 = vld [vmem:[%s3195_s1 + $0x1a0] sm:$0xff]   ;;  %v2498_v22 = vld [vmem:[%s3195_s1 + $0x108] sm:$0xff]   ;;  %v2492_v24 = vld [vmem:[%s3195_s1 + $0x198] sm:$0xff]   ;;  %v237_v25 = vrot.slane %v2773_v40, 6 }
  0x25   : > { %v2501_v26 = vld [vmem:[%s3195_s1 + $0x140] sm:$0xff]   ;;  %v2499_v34 = vld [vmem:[%s3195_s1 + $0x1c8] sm:$0xff]   ;;  %v2508_v35 = vld [vmem:[%s3195_s1 + $0x278] sm:$0xff]   ;;  %vm276_vm14 = vsmask.f32 7946  ;;  %vm275_vm15 = vcmask 1043458  }
  0x26   : > { %2247 = vmatpush3.bf16.msra.mxu0 %v2467_v27  ;;  %v238_v27 = vrot.slane %v2775_v41, 7  ;;  %v250_v36 = vld [vmem:[#allocation2 + $0x58] sm:$0xee]  ;;  %v2500_v37 = vld [vmem:[%s3195_s1 + $0x188] sm:$0xff]   ;;  %vm249_vm10 = vmor %vm248_vm8, %vm245_vm5  ;;  %vm278_vm2 = vcmask 1047558  }
  0x27   : > { %2269 = vmatpush3.bf16.msra.mxu1 %v2468_v28  ;;  %2248 = vmatprep.subr.bf16.mxu0 %v2469_v29  ;;  %v2502_v28 = vld [vmem:[%s3195_s1 + $0x100] sm:$0xff]   ;;  %v2495_v29 = vld [vmem:[%s3195_s1 + $0x1d0] sm:$0xff]   ;;  %v2512_v40 = vld [vmem:[%s3195_s1 + $0x238] sm:$0xff]   ;;  %vm279_vm3 = vsmask.f32 7962 }
  0x28   : > { %2270 = vmatprep.subr.bf16.mxu1 %v2470_v30  ;;  %v2496_v30 = vld [vmem:[%s3195_s1 + $0x190] sm:$0xff]   ;;  %v239_v33 = vor.u32 %v238_v27, %v237_v25  ;;  %vm255_vm11 = vmand %vm253_vm4, %vm254_vm6  ;;  %v2503_v43 = vld [vmem:[%s3195_s1 + $0x1c0] sm:$0xff]   ;;  %vm285_vm4 = vcmask 1042432   ;;  %vm286_vm6 = vsmask.f32 2304 }
  0x29   : > { %vm258_vm12 = vmand %vm256_vm7, %vm257_vm9  ;;  %v2507_v44 = vld [vmem:[%s3195_s1 + $0x180] sm:$0xff]   ;;  %v2515_v46 = vld [vmem:[%s3195_s1 + $0x270] sm:$0xff]   ;;  %vm288_vm7 = vcmask 1046532   ;;  %vm289_vm9 = vsmask.f32 6400 }
  0x2a   : > { %2249 = vmatpush3.bf16.msra.mxu0 %v2471_v31  ;;  %v2504_v31 = vld [vmem:[#allocation2 + $0x78] ss:$-80 sps:$4 sm:$0xff]   ;;  %v240_v39 = vrot.slane %v239_v33, 4  ;;  %vm259_vm13 = vmor %vm258_vm12, %vm255_vm11  ;;  %v2516_v47 = vld [vmem:[%s3195_s1 + $0x230] sm:$0xff]  }
  0x2b   : > { %2271 = vmatpush3.bf16.msra.mxu1 %v2472_v32  ;;  %2278 = vmatprep.subr.bf16.mxu0 %v2473_v42  ;;  %v336_v5 = vld [vmem:[#allocation2 + $0x50] sm:$0xff]  ;;  %v2506_v32 = vld [vmem:[#allocation2 + $0x7c] ss:$-80 sps:$4 sm:$0xff]   ;;  %v251_v42 = vsel %vm249_vm10, %v239_v33, %v250_v36  ;;  %v2523_v55 = vld [vmem:[%s3195_s1 + $0x260] sm:$0xff]  }
  0x2c   : > { %2300 = vmatprep.subr.bf16.mxu1 %v2475_v50  ;;  %v2057_v8 = vcombine.low %v219_v56, %v336_v5  ;;  %v2058_v9 = vcombine.high %v219_v56, %v336_v5  ;;  %252 = vst [vmem:[#allocation2 + $0x58] sm:$0xee] %v251_v42  ;;  %v2513_v48 = vld [vmem:[%s3195_s1 + $0x2f8] sm:$0xff]   ;;  %v2520_v50 = vld [vmem:[%s3195_s1 + $0x228] sm:$0xff]   ;;  %v2517_v54 = vld [vmem:[%s3195_s1 + $0x2f0] sm:$0xff]  }
  0x2d   : > { %1619 = vmatmul.mubr.bf16.vlgmr.msra.gmra.mxu0 %v2055_v38  ;;  %v260_v38 = vld [vmem:[#allocation2 + $0x10] sm:$0x33]  ;;  %v2514_v51 = vld [vmem:[%s3195_s1 + $0x2b8] sm:$0xff]   ;;  %v2524_v56 = vld [vmem:[%s3195_s1 + $0x220] sm:$0xff]  }
  0x2e   : > { %2279 = vmatpush3.bf16.msra.mxu0 %v2474_v49  ;;  %1659 = vmatprep.mubr.bf16.mxu1 %v2058_v9  ;;  %v261_v45 = vsel %vm259_vm13, %v240_v39, %v260_v38  ;;  %v2519_v49 = vld [vmem:[%s3195_s1 + $0x268] sm:$0xff]   ;;  %v2518_v57 = vld [vmem:[%s3195_s1 + $0x2b0] sm:$0xff]   ;;  %v2528_v60 = vld [vmem:[%s3195_s1 + $0x218] sm:$0xff]  }
  0x2f   : > { %2280 = vmatprep.subr.bf16.mxu0 %v2477_v58  ;;  %1660 = vmatmul.mubr.bf16.vlgmr.msra.gmra.mxu1 %v2057_v8  ;;  %262 = vst [vmem:[#allocation2 + $0x10] sm:$0x33] %v261_v45  ;;  %v2521_v58 = vld [vmem:[%s3195_s1 + $0x2e8] sm:$0xff]   ;;  %v2531_v0 = vld [vmem:[%s3195_s1 + $0x250] sm:$0xff]   ;;  %v2526_v3 = vld [vmem:[%s3195_s1 + $0x2a0] sm:$0xff]  }
  0x30   : > { %2301 = vmatpush3.bf16.msra.mxu1 %v2476_v4  ;;  %1700 = vmatprep.mubr.bf16.mxu0 %v2506_v32  ;;  %v2522_v61 = vld [vmem:[%s3195_s1 + $0x2a8] sm:$0xff]   ;;  %v2529_v4 = vld [vmem:[%s3195_s1 + $0x2d8] sm:$0xff]   ;;  %v2533_v9 = vld [vmem:[%s3195_s1 + $0x2d0] sm:$0xff]  }
  0x31   : > { %2302 = vmatprep.subr.bf16.mxu1 %v2479_v11  ;;  %v2535_v5 = vld [vmem:[%s3195_s1 + $0x248] sm:$0xff]   ;;  %v2530_v8 = vld [vmem:[%s3195_s1 + $0x298] sm:$0xff]   ;;  %v2539_v11 = vld [vmem:[%s3195_s1 + $0x240] sm:$0xff]  }
  0x32   : > { %2281 = vmatpush3.bf16.msra.mxu0 %v2478_v59  ;;  %v2527_v59 = vld [vmem:[%s3195_s1 + $0x258] sm:$0xff]   ;;  %vm277_vm5 = vmand %vm275_vm15, %vm276_vm14  ;;  %v2554_v27 = vld [vmem:[%s3195_s1 + $0x330] sm:$0xff]   ;;  %vm317_vm14 = vsmask.f32 3328  ;;  %vm319_vm15 = vsmask.f32 7424 }
  0x33   : > { %2282 = vmatprep.subr.bf16.mxu0 %v2481_v63  ;;  %v2525_v63 = vld [vmem:[%s3195_s1 + $0x2e0] sm:$0xff]   ;;  %vm280_vm8 = vmand %vm278_vm2, %vm279_vm3  ;;  %v2555_v33 = vld [vmem:[%s3195_s1 + $0x3f0] sm:$0xff]   ;;  %vm308_vm2 = vsmask.f32 7950 }
  0x34   : > { %2303 = vmatpush3.bf16.msra.mxu1 %v2480_v12  ;;  %v2540_v12 = vld [vmem:[%s3195_s1 + $0x200] sm:$0xff]   ;;  %vm281_vm10 = vmor %vm280_vm8, %vm277_vm5  ;;  %v2556_v36 = vld [vmem:[%s3195_s1 + $0x3b0] sm:$0xff]   ;;  %vm310_vm5 = vcmask 1047559  }
  0x35   : > { %2304 = vmatprep.subr.bf16.mxu1 %v2483_v15  ;;  %v2544_v15 = vld [vmem:[#allocation2 + $0x24] ss:$40 sps:$4 sm:$0xff]   ;;  %vm287_vm11 = vmand %vm285_vm4, %vm286_vm6  ;;  %v2565_v38 = vld [vmem:[%s3195_s1 + $0x358] sm:$0xff]  }
  0x36   : > { %2283 = vmatpush3.bf16.msra.mxu0 %v2482_v1  ;;  %v2509_v52 = vld [vmem:[#allocation2 + $0x58] ss:$-72 sps:$4 sm:$0xff]   ;;  %v2511_v53 = vld [vmem:[#allocation2 + $0x5c] ss:$-72 sps:$4 sm:$0xff]   ;;  %vm290_vm12 = vmand %vm288_vm7, %vm289_vm9 }
  0x37   : > { %2284 = vmatprep.subr.bf16.mxu0 %v2485_v6  ;;  %1741 = vmatprep.mubr.bf16.mxu1 %v2511_v53  ;;  %v2532_v1 = vld [vmem:[%s3195_s1 + $0x210] sm:$0xff]   ;;  %v2536_v6 = vld [vmem:[%s3195_s1 + $0x208] sm:$0xff]   ;;  %vm291_vm13 = vmor %vm290_vm12, %vm287_vm11 }
  0x38   : > { %2305 = vmatpush3.bf16.msra.mxu1 %v2484_v16  ;;  %v2538_v16 = vld [vmem:[%s3195_s1 + $0x288] sm:$0xff]   ;;  %v2566_v39 = vld [vmem:[%s3195_s1 + $0x318] sm:$0xff]   ;;  %v2563_v42 = vld [vmem:[%s3195_s1 + $0x3e0] sm:$0xff]  }
  0x39   : > { %2306 = vmatprep.subr.bf16.mxu1 %v2487_v19  ;;  %v282_v19 = vld [vmem:[#allocation2 + $0x8] sm:$0xcc]  ;;  %v2564_v45 = vld [vmem:[%s3195_s1 + $0x3a0] sm:$0xff]   ;;  %vm3090_vm3 = vmand %vm211_vm0, %vm317_vm14  ;;  %vm311_vm0 = vsmask.f32 7966 }
  0x3a   : > { %2285 = vmatpush3.bf16.msra.mxu0 %v2486_v10  ;;  %v2534_v10 = vld [vmem:[%s3195_s1 + $0x290] sm:$0xff]   ;;  %vm3096_vm4 = vmand %vm214_vm1, %vm319_vm15  ;;  %vm307_vm1 = vcmask 1043459   ;;  %v2588_v41 = vld [vmem:[%s3195_s1 + $0x468] sm:$0xff]  }
  0x3b   : > { %2286 = vmatprep.subr.bf16.mxu0 %v2489_v13  ;;  %v2537_v13 = vld [vmem:[%s3195_s1 + $0x2c8] sm:$0xff]   ;;  %v2572_v53 = vld [vmem:[%s3195_s1 + $0x390] sm:$0xff]   ;;  %vm309_vm6 = vmand %vm307_vm1, %vm308_vm2 }
  0x3c   : > { %2307 = vmatpush3.bf16.msra.mxu1 %v2488_v20  ;;  %v292_v20 = vld [vmem:[#allocation2 + $0x30] sm:$0x77]  ;;  %vm312_vm7 = vmand %vm310_vm5, %vm311_vm0 }
  0x3d   : > { %2308 = vmatprep.subr.bf16.mxu1 %v2491_v23  ;;  %v2550_v23 = vld [vmem:[%s3195_s1 + $0x338] sm:$0xff]   ;;  %vm313_vm8 = vmor %vm312_vm7, %vm309_vm6 }
  0x3e   : > { %2287 = vmatpush3.bf16.msra.mxu0 %v2490_v14  ;;  %v2542_v14 = vld [vmem:[#allocation2 + $0x20] ss:$40 sps:$4 sm:$0xff]   ;;  %vm321_vm9 = vmor %vm3096_vm4, %vm3090_vm3 }
  0x3f   : > { %2288 = vmatprep.subr.bf16.mxu0 %v2493_v17  ;;  %v2541_v17 = vld [vmem:[%s3195_s1 + $0x2c0] sm:$0xff]  }
  0x40   : > { %2309 = vmatpush3.bf16.msra.mxu1 %v2492_v24  ;;  %v2545_v24 = vld [vmem:[%s3195_s1 + $0x280] sm:$0xff]  }
  0x41   : > { %2310 = vmatprep.subr.bf16.mxu1 %v2495_v29  ;;  %v2558_v29 = vld [vmem:[%s3195_s1 + $0x328] sm:$0xff]  }
  0x42   : > { %2289 = vmatpush3.bf16.msra.mxu0 %v2494_v18  ;;  %v2546_v18 = vld [vmem:[%s3195_s1 + $0x378] sm:$0xff]  }
  0x43   : > { %2290 = vmatprep.subr.bf16.mxu0 %v2497_v21  ;;  %v272_v21 = vrot.slane %v2818_v62, 4 }
  0x44   : > { %2311 = vmatpush3.bf16.msra.mxu1 %v2496_v30  ;;  %v2552_v30 = vld [vmem:[%s3195_s1 + $0x3b8] sm:$0xff]  }
  0x45   : > { %2312 = vmatprep.subr.bf16.mxu1 %v2499_v34  ;;  %v293_v25 = vsel %vm291_vm13, %v272_v21, %v292_v20  ;;  %v2561_v34 = vld [vmem:[%s3195_s1 + $0x360] sm:$0xff]   ;;  %v2596_v20 = vld [vmem:[%s3195_s1 + $0x448] sm:$0xff]  }
  0x46   : > { %2291 = vmatpush3.bf16.msra.mxu0 %v2498_v22  ;;  %v283_v22 = vsel %vm281_vm10, %v2818_v62, %v282_v19  ;;  %v2551_v62 = vld [vmem:[%s3195_s1 + $0x3f8] sm:$0xff]   ;;  %294 = vst [vmem:[#allocation2 + $0x30] sm:$0x77] %v293_v25  ;;  %v2595_v19 = vld [vmem:[%s3195_s1 + $0x410] sm:$0xff]   ;;  %v2597_v21 = vld [vmem:[%s3195_s1 + $0x408] sm:$0xff]  }
  0x47   : > { %2292 = vmatprep.subr.bf16.mxu0 %v2501_v26  ;;  %284 = vst [vmem:[#allocation2 + $0x8] sm:$0xcc] %v283_v22  ;;  %v2553_v26 = vld [vmem:[%s3195_s1 + $0x370] sm:$0xff]   ;;  %v2598_v22 = vld [vmem:[%s3195_s1 + $0x440] sm:$0xff]  }
  0x48   : > { %2313 = vmatpush3.bf16.msra.mxu1 %v2500_v37  ;;  %v2559_v37 = vld [vmem:[%s3195_s1 + $0x3e8] sm:$0xff]  }
  0x49   : > { %2314 = vmatprep.subr.bf16.mxu1 %v2503_v43  ;;  %v2569_v43 = vld [vmem:[%s3195_s1 + $0x350] sm:$0xff]  }
  0x4a   : > { %2293 = vmatpush3.bf16.msra.mxu0 %v2502_v28  ;;  %v2557_v28 = vld [vmem:[%s3195_s1 + $0x368] sm:$0xff]  }
  0x4b   : > { %2322 = vmatprep.subr.bf16.mxu0 %v2508_v35  ;;  %v2562_v35 = vld [vmem:[%s3195_s1 + $0x320] sm:$0xff]  }
  0x4c   : > { %2315 = vmatpush3.bf16.msra.mxu1 %v2507_v44  ;;  %v2570_v44 = vld [vmem:[%s3195_s1 + $0x310] sm:$0xff]  }
  0x4d   : > { %1701 = vmatmul.mubr.bf16.vlgmr.msra.gmra.mxu0 %v2504_v31  ;;  %2344 = vmatprep.subr.bf16.mxu1 %v2513_v48  ;;  %v2574_v48 = vld [vmem:[%s3195_s1 + $0x308] sm:$0xff]  }
  0x4e   : > { %2323 = vmatpush3.bf16.msra.mxu0 %v2512_v40  ;;  %1782 = vmatprep.mubr.bf16.mxu0 %v2544_v15  ;;  %v2547_v31 = vld [vmem:[#allocation2 + $0x8] ss:$40 sps:$4 sm:$0xff]   ;;  %v2549_v32 = vld [vmem:[#allocation2 + $0xc] ss:$40 sps:$4 sm:$0xff]   ;;  %v2593_v15 = vld [vmem:[%s3195_s1 + $0x418] sm:$0xff]  }
  0x4f   : > { %2324 = vmatprep.subr.bf16.mxu0 %v2515_v46  ;;  %1742 = vmatmul.mubr.bf16.vlgmr.msra.gmra.mxu1 %v2509_v52  ;;  %v2560_v40 = vld [vmem:[%s3195_s1 + $0x3a8] sm:$0xff]   ;;  %v2567_v46 = vld [vmem:[%s3195_s1 + $0x3d8] sm:$0xff]   ;;  %v2571_v52 = vld [vmem:[%s3195_s1 + $0x3d0] sm:$0xff]  }
  0x50   : > { %2345 = vmatpush3.bf16.msra.mxu1 %v2514_v51  ;;  %1823 = vmatprep.mubr.bf16.mxu1 %v2549_v32  ;;  %v2568_v51 = vld [vmem:[%s3195_s1 + $0x398] sm:$0xff]  }
  0x51   : > { %2346 = vmatprep.subr.bf16.mxu1 %v2517_v54  ;;  %v2577_v54 = vld [vmem:[%s3195_s1 + $0x340] sm:$0xff]  }
  0x52   : > { %2325 = vmatpush3.bf16.msra.mxu0 %v2516_v47  ;;  %v2573_v47 = vld [vmem:[%s3195_s1 + $0x348] sm:$0xff]  }
  0x53   : > { %2326 = vmatprep.subr.bf16.mxu0 %v2519_v49 }
  0x54   : > { %2347 = vmatpush3.bf16.msra.mxu1 %v2518_v57  ;;  %v2580_v57 = vld [vmem:[#allocation2 + $0x70] ss:$-88 sps:$4 sm:$0xff]  }
  0x55   : > { %2348 = vmatprep.subr.bf16.mxu1 %v2521_v58  ;;  %v2582_v58 = vld [vmem:[#allocation2 + $0x74] ss:$-88 sps:$4 sm:$0xff]  }
  0x56   : > { %2327 = vmatpush3.bf16.msra.mxu0 %v2520_v50 }
  0x57   : > { %2328 = vmatprep.subr.bf16.mxu0 %v2523_v55  ;;  %v2578_v55 = vld [vmem:[%s3195_s1 + $0x300] sm:$0xff]  }
  0x58   : > { %2349 = vmatpush3.bf16.msra.mxu1 %v2522_v61  ;;  %v2584_v61 = vld [vmem:[%s3195_s1 + $0x478] sm:$0xff]  }
  0x59   : > { %2350 = vmatprep.subr.bf16.mxu1 %v2525_v63  ;;  %v304_v63 = vrot.slane %v2836_v7, 4  ;;  %v2586_v7 = vld [vmem:[%s3195_s1 + $0x470] sm:$0xff]  }
  0x5a   : > { %2329 = vmatpush3.bf16.msra.mxu0 %v2524_v56  ;;  %v2575_v56 = vld [vmem:[%s3195_s1 + $0x3c8] sm:$0xff]  }
  0x5b   : > { %2330 = vmatprep.subr.bf16.mxu0 %v2527_v59  ;;  %v2576_v59 = vld [vmem:[%s3195_s1 + $0x388] sm:$0xff]  }
  0x5c   : > { %2351 = vmatpush3.bf16.msra.mxu1 %v2526_v3  ;;  %v2583_v3 = vld [vmem:[%s3195_s1 + $0x380] sm:$0xff]  }
  0x5d   : > { %2352 = vmatprep.subr.bf16.mxu1 %v2529_v4 }
  0x5e   : > { %2331 = vmatpush3.bf16.msra.mxu0 %v2528_v60  ;;  %v2579_v60 = vld [vmem:[%s3195_s1 + $0x3c0] sm:$0xff]  }
  0x5f   : > { %2332 = vmatprep.subr.bf16.mxu0 %v2531_v0  ;;  %v314_v0 = vld [vmem:[#allocation2 + $0x80] sm:$0x88] }
  0x60   : > { %2353 = vmatpush3.bf16.msra.mxu1 %v2530_v8  ;;  %v315_v4 = vsel %vm313_vm8, %v301_v2, %v314_v0  ;;  %v2587_v8 = vld [vmem:[%s3195_s1 + $0x430] sm:$0xff]   ;;  %v2589_v2 = vld [vmem:[%s3195_s1 + $0x428] sm:$0xff]  }
  0x61   : > { %2354 = vmatprep.subr.bf16.mxu1 %v2533_v9  ;;  %316 = vst [vmem:[#allocation2 + $0x80] sm:$0x88] %v315_v4  ;;  %v2590_v9 = vld [vmem:[%s3195_s1 + $0x460] sm:$0xff]  }
  0x62   : > { %2333 = vmatpush3.bf16.msra.mxu0 %v2532_v1  ;;  %v2585_v1 = vld [vmem:[%s3195_s1 + $0x438] sm:$0xff]  }
  0x63   : > { %2334 = vmatprep.subr.bf16.mxu0 %v2535_v5  ;;  %v2604_v5 = vld [vmem:[#allocation2 + $0x40] sm:$0xff] }
  0x64   : > { %2355 = vmatpush3.bf16.msra.mxu1 %v2534_v10 }
  0x65   : > { %2356 = vmatprep.subr.bf16.mxu1 %v2537_v13 }
  0x66   : > { %2335 = vmatpush3.bf16.msra.mxu0 %v2536_v6  ;;  %v323_v6 = vsel %vm321_vm9, %v304_v63, %v2604_v5 }
  0x67   : > { %2336 = vmatprep.subr.bf16.mxu0 %v2539_v11  ;;  %v2591_v11 = vld [vmem:[%s3195_s1 + $0x420] sm:$0xff]  }
  0x68   : > { %2357 = vmatpush3.bf16.msra.mxu1 %v2538_v16  ;;  %v333_v10 = vld [vmem:[#allocation2 + $0x80] sm:$0xff]  ;;  %v2594_v16 = vld [vmem:[%s3195_s1 + $0x450] sm:$0xff]  }
  0x69   : > { %2358 = vmatprep.subr.bf16.mxu1 %v2541_v17  ;;  %v2070_v13 = vcombine.high %v333_v10, %v323_v6  ;;  %v343_v17 = vld [vmem:[#allocation2 + $0x60] sm:$0xff] }
  0x6a   : > { %2337 = vmatpush3.bf16.msra.mxu0 %v2540_v12  ;;  %v2069_v12 = vcombine.low %v333_v10, %v323_v6 }
  0x6b   : > { %2366 = vmatprep.subr.bf16.mxu0 %v2546_v18  ;;  %v2072_v18 = vcombine.high %v2604_v5, %v343_v17 }
  0x6c   : > { %2359 = vmatpush3.bf16.msra.mxu1 %v2545_v24  ;;  %v2071_v24 = vcombine.low %v2604_v5, %v343_v17 }
  0x6d   : > { %1783 = vmatmul.mubr.bf16.vlgmr.msra.gmra.mxu0 %v2542_v14  ;;  %2388 = vmatprep.subr.bf16.mxu1 %v2551_v62  ;;  %v2592_v14 = vld [vmem:[%s3195_s1 + $0x458] sm:$0xff]  }
  0x6e   : > { %2367 = vmatpush3.bf16.msra.mxu0 %v2550_v23  ;;  %1864 = vmatprep.mubr.bf16.mxu0 %v2582_v58  ;;  %v2599_v23 = vld [vmem:[%s3195_s1 + $0x400] sm:$0xff]  }
  0x6f   : > { %2368 = vmatprep.subr.bf16.mxu0 %v2553_v26  ;;  %1824 = vmatmul.mubr.bf16.vlgmr.msra.gmra.mxu1 %v2547_v31 }
  0x70   : > { %2389 = vmatpush3.bf16.msra.mxu1 %v2552_v30  ;;  %1905 = vmatprep.mubr.bf16.mxu1 %v2070_v13 }
  0x71   : > { %2390 = vmatprep.subr.bf16.mxu1 %v2555_v33 }
  0x72   : > { %2369 = vmatpush3.bf16.msra.mxu0 %v2554_v27 }
  0x73   : > { %2370 = vmatprep.subr.bf16.mxu0 %v2557_v28 }
  0x74   : > { %2391 = vmatpush3.bf16.msra.mxu1 %v2556_v36 }
  0x75   : > { %2392 = vmatprep.subr.bf16.mxu1 %v2559_v37 }
  0x76   : > { %2371 = vmatpush3.bf16.msra.mxu0 %v2558_v29 }
  0x77   : > { %2372 = vmatprep.subr.bf16.mxu0 %v2561_v34 }
  0x78   : > { %2393 = vmatpush3.bf16.msra.mxu1 %v2560_v40 }
  0x79   : > { %2394 = vmatprep.subr.bf16.mxu1 %v2563_v42 }
  0x7a   : > { %2373 = vmatpush3.bf16.msra.mxu0 %v2562_v35 }
  0x7b   : > { %2374 = vmatprep.subr.bf16.mxu0 %v2565_v38 }
  0x7c   : > { %2395 = vmatpush3.bf16.msra.mxu1 %v2564_v45 }
  0x7d   : > { %2396 = vmatprep.subr.bf16.mxu1 %v2567_v46 }
  0x7e   : > { %2375 = vmatpush3.bf16.msra.mxu0 %v2566_v39 }
  0x7f   : > { %2376 = vmatprep.subr.bf16.mxu0 %v2569_v43 }
  0x80   : > { %2397 = vmatpush3.bf16.msra.mxu1 %v2568_v51 }
  0x81   : > { %2398 = vmatprep.subr.bf16.mxu1 %v2571_v52 }
  0x82   : > { %2377 = vmatpush3.bf16.msra.mxu0 %v2570_v44 }
  0x83   : > { %2378 = vmatprep.subr.bf16.mxu0 %v2573_v47 }
  0x84   : > { %2399 = vmatpush3.bf16.msra.mxu1 %v2572_v53 }
  0x85   : > { %2400 = vmatprep.subr.bf16.mxu1 %v2575_v56 }
  0x86   : > { %2379 = vmatpush3.bf16.msra.mxu0 %v2574_v48 }
  0x87   : > { %2380 = vmatprep.subr.bf16.mxu0 %v2577_v54 }
  0x88   : > { %2401 = vmatpush3.bf16.msra.mxu1 %v2576_v59 }
  0x89   : > { %2402 = vmatprep.subr.bf16.mxu1 %v2579_v60 }
  0x8a   : > { %2381 = vmatpush3.bf16.msra.mxu0 %v2578_v55 }
  0x8b   : > { %2410 = vmatprep.subr.bf16.mxu0 %v2584_v61 }
  0x8c   : > { %2403 = vmatpush3.bf16.msra.mxu1 %v2583_v3 }
  0x8d   : > { %1865 = vmatmul.mubr.bf16.vlgmr.msra.gmra.mxu0 %v2580_v57 }
  0x8e   : > { %2411 = vmatpush3.bf16.msra.mxu0 %v2585_v1  ;;  %1946 = vmatprep.mubr.bf16.mxu0 %v2072_v18 }
  0x8f   : > { %2412 = vmatprep.subr.bf16.mxu0 %v2586_v7  ;;  %1906 = vmatmul.mubr.bf16.vlgmr.msra.gmra.mxu1 %v2069_v12 }
  0x92   : > { %2413 = vmatpush3.bf16.msra.mxu0 %v2587_v8 }
  0x93   : > { %2414 = vmatprep.subr.bf16.mxu0 %v2588_v41 }
  0x96   : > { %2415 = vmatpush3.bf16.msra.mxu0 %v2589_v2 }
  0x97   : > { %2416 = vmatprep.subr.bf16.mxu0 %v2590_v9 }
  0x9a   : > { %2417 = vmatpush3.bf16.msra.mxu0 %v2591_v11 }
  0x9b   : > { %2418 = vmatprep.subr.bf16.mxu0 %v2592_v14 }
  0x9e   : > { %2419 = vmatpush3.bf16.msra.mxu0 %v2593_v15 }
  0x9f   : > { %2420 = vmatprep.subr.bf16.mxu0 %v2594_v16 }
  0xa2   : > { %2421 = vmatpush3.bf16.msra.mxu0 %v2595_v19 }
  0xa3   : > { %2422 = vmatprep.subr.bf16.mxu0 %v2596_v20 }
  0xa6   : > { %2423 = vmatpush3.bf16.msra.mxu0 %v2597_v21 }
  0xa7   : > { %2424 = vmatprep.subr.bf16.mxu0 %v2598_v22 }
  0xaa   : > { %2425 = vmatpush3.bf16.msra.mxu0 %v2599_v23 }
  0xad   : > { %1947 = vmatmul.mubr.bf16.vlgmr.msra.gmra.mxu0 %v2071_v24 }
  0xed   : > { %v2250_v25 = vpop.f32.mrf.mxu0 }
  0xef   : > { %v2272_v62 = vpop.f32.mrf.mxu1  ;;  %v2251_v26 = vpop.f32.mrf.mxu0 }
  0xf0   : > { %v2252_v46 = vadd.f32 %v2251_v26, %v2250_v25  ;;  %v2217_v25 = vld [vmem:[%s3196_s2] ss:$0 sm:$0xff] }
  0xf1   : > { %v2273_v27 = vpop.f32.mrf.mxu1  ;;  %v2253_v28 = vpop.f32.mrf.mxu0 }
  0xf2   : > { %v2274_v47 = vadd.f32 %v2273_v27, %v2272_v62 }
  0xf3   : > { %v2275_v29 = vpop.f32.mrf.mxu1  ;;  %v2254_v30 = vpop.f32.mrf.mxu0 }
  0xf4   : > { %v1662_v52 = vadd.f32 %v2274_v47, %v2252_v46  ;;  %v2255_v53 = vadd.f32 %v2254_v30, %v2253_v28 }
  0xf5   : > { %v2276_v32 = vpop.f32.mrf.mxu1 }
  0xf6   : > { %v2277_v54 = vadd.f32 %v2276_v32, %v2275_v29 }
  0xf8   : > { %v1665_v61 = vadd.f32 %v2277_v54, %v2255_v53 }
 0x10d   : > { %v2294_v31 = vpop.f32.mrf.mxu0 }
 0x10f   : > { %v2295_v33 = vpop.f32.mrf.mxu0  ;;  %v2316_v34 = vpop.f32.mrf.mxu1 }
 0x110   : > { %v2296_v50 = vadd.f32 %v2295_v33, %v2294_v31 }
 0x111   : > { %v2297_v35 = vpop.f32.mrf.mxu0  ;;  %v2317_v36 = vpop.f32.mrf.mxu1 }
 0x112   : > { %v1703_v56 = vadd.f32 %v2296_v50, %v1662_v52  ;;  %v2318_v57 = vadd.f32 %v2317_v36, %v2316_v34 }
 0x113   : > { %v2298_v37 = vpop.f32.mrf.mxu0  ;;  %v2319_v38 = vpop.f32.mrf.mxu1 }
 0x114   : > { %v2299_v58 = vadd.f32 %v2298_v37, %v2297_v35  ;;  %v1744_v0 = vadd.f32 %v2318_v57, %v1703_v56 }
 0x115   : > { %v2320_v40 = vpop.f32.mrf.mxu1 }
 0x116   : > { %v1706_v1 = vadd.f32 %v2299_v58, %v1665_v61  ;;  %v2321_v3 = vadd.f32 %v2320_v40, %v2319_v38 }
 0x118   : > { %v1747_v41 = vadd.f32 %v2321_v3, %v1706_v1 }
 0x12d   : > { %v2338_v39 = vpop.f32.mrf.mxu0 }
 0x12f   : > { %v2339_v42 = vpop.f32.mrf.mxu0  ;;  %v2360_v43 = vpop.f32.mrf.mxu1 }
 0x130   : > { %v2340_v63 = vadd.f32 %v2339_v42, %v2338_v39 }
 0x131   : > { %v2341_v44 = vpop.f32.mrf.mxu0  ;;  %v2361_v45 = vpop.f32.mrf.mxu1 }
 0x132   : > { %v1785_v5 = vadd.f32 %v2340_v63, %v1744_v0  ;;  %v2362_v6 = vadd.f32 %v2361_v45, %v2360_v43 }
 0x133   : > { %v2342_v48 = vpop.f32.mrf.mxu0  ;;  %v2363_v49 = vpop.f32.mrf.mxu1 }
 0x134   : > { %v2343_v8 = vadd.f32 %v2342_v48, %v2341_v44  ;;  %v1826_v11 = vadd.f32 %v2362_v6, %v1785_v5 }
 0x135   : > { %v2364_v55 = vpop.f32.mrf.mxu1 }
 0x136   : > { %v1788_v12 = vadd.f32 %v2343_v8, %v1747_v41  ;;  %v2365_v13 = vadd.f32 %v2364_v55, %v2363_v49 }
 0x138   : > { %v1829_v19 = vadd.f32 %v2365_v13, %v1788_v12 }
 0x14d   : > { %v2382_v51 = vpop.f32.mrf.mxu0 }
 0x14f   : > { %v2383_v59 = vpop.f32.mrf.mxu0  ;;  %v2404_v60 = vpop.f32.mrf.mxu1 }
 0x150   : > { %v2384_v2 = vadd.f32 %v2383_v59, %v2382_v51 }
 0x151   : > { %v2385_v4 = vpop.f32.mrf.mxu0  ;;  %v2405_v7 = vpop.f32.mrf.mxu1 }
 0x152   : > { %v1867_v14 = vadd.f32 %v2384_v2, %v1826_v11  ;;  %v2406_v15 = vadd.f32 %v2405_v7, %v2404_v60 }
 0x153   : > { %v2386_v9 = vpop.f32.mrf.mxu0  ;;  %v2407_v10 = vpop.f32.mrf.mxu1 }
 0x154   : > { %v2387_v16 = vadd.f32 %v2386_v9, %v2385_v4  ;;  %v1908_v21 = vadd.f32 %v2406_v15, %v1867_v14 }
 0x155   : > { %v2408_v17 = vpop.f32.mrf.mxu1 }
 0x156   : > { %v1870_v22 = vadd.f32 %v2387_v16, %v1829_v19  ;;  %v2409_v23 = vadd.f32 %v2408_v17, %v2407_v10 }
 0x158   : > { %v1911_v28 = vadd.f32 %v2409_v23, %v1870_v22 }
 0x16d   : > { %v2426_v18 = vpop.f32.mrf.mxu0 }
 0x16f   : > { %v2427_v20 = vpop.f32.mrf.mxu0 }
 0x170   : > { %v2428_v24 = vadd.f32 %v2427_v20, %v2426_v18 }
 0x171   : > { %v2429_v62 = vpop.f32.mrf.mxu0 }
 0x172   : > { %v1949_v26 = vadd.f32 %v2428_v24, %v1908_v21 }
 0x173   : > { %v2430_v27 = vpop.f32.mrf.mxu0 }
 0x174   : > { %v1962_v29 = vadd.f32 %v2217_v25, %v1949_v26  ;;  %v2431_v30 = vadd.f32 %v2430_v27, %v2429_v62 }
 0x176   : > { %v1966_v31 = vmin.f32 %v1962_v29, 0.0  ;;  %v1952_v32 = vadd.f32 %v2431_v30, %v1911_v28  ;;  %vm1964_vm10 = vcmp.gt.f32.partialorder %v1962_v29, 0.0 }
 0x178   : > { %v1968_v33 = vmul.f32 1.442695, %v1966_v31  ;;  %v1963_v34 = vadd.f32 %v2217_v25, %v1952_v32 }
 0x17a   : > { %2600 = vpow2.f32 %v1968_v33  ;;  %v1967_v35 = vmin.f32 %v1963_v34, 0.0  ;;  %vm1965_vm11 = vcmp.gt.f32.partialorder %v1963_v34, 0.0 }
 0x17c   : > { %v1970_v36 = vmul.f32 1.442695, %v1967_v35 }
 0x17e   : > { %2602 = vpow2.f32 %v1970_v36 }
 0x187   : > { %v2601_v37 = vpop.eup %2600 }
 0x188   : > { %v2218_v38 = vadd.f32 -1.0, %v2601_v37 }
 0x18a   : > { %v1974_v39 = vmul.f32 1.6732632, %v2218_v38 }
 0x18b   : > { %v2603_v40 = vpop.eup %2602 }
 0x18c   : > { %v2219_v42 = vadd.f32 -1.0, %v2603_v40  ;;  %v1976_v43 = vsel %vm1964_vm10, %v1962_v29, %v1974_v39 }
 0x18d   : > { %v1978_v46 = vmul.f32 1.050701, %v1976_v43 }
 0x18e   : > { %v1975_v44 = vmul.f32 1.6732632, %v2219_v42 }
 0x190   : > { %v1977_v45 = vsel %vm1965_vm11, %v1963_v34, %v1975_v44 }
 0x191   : > { %v1979_v47 = vmul.f32 1.050701, %v1977_v45 }
 0x193   : > { %v2232_v48 = vpack.c.bf16 %v1979_v47, %v1978_v46 }
 0x195   : > { %2233 = vst [vmem:[%s170_s9] sm:$0xff] %v2232_v48  }
 0x196 PF: > { %s13_s12 = sadd.s32 1, %s2611_s12  }
 0x197   : > { %p10_p4 = scmp.ge.s32.totalorder %s13_s12, 4  }
 0x199   :  { %12 = sbr.rel (!%p10_p4) target bundleno = 1 (0x1), region = 62 }

// kernel: _forward_impl.4
= control target key start
LH: loop header
LB: loop body
LE: loop exit
PB: predicated region body
PF: predicated region fallthrough
CT: control target
= control target key end

     0   :  { %s2071_s12 = smov 0   ;;  %s2590_s0 = inlined_call_operand.vmem [shape: bf16[2,32,128], index: 0, kind: input, shape index: {}]   ;;  %s2591_s1 = inlined_call_operand.vmem [shape: bf16[1152,128], index: 1, kind: input, shape index: {}]   ;;  %s2592_s2 = inlined_call_operand.vmem [shape: f32[1,128], index: 2, kind: input, shape index: {}]   ;;  %s2593_s3 = inlined_call_operand.vmem [shape: bf16[2,40,128], index: 3, kind: output, shape index: {}]  }
   0x1 LB: > { %s1584_s13 = sadd.s32 4294967295, %s2046_s12   ;;  %p1588_p0 = scmp.ge.s32.totalorder %s2046_s12, 1  ;;  %s2046_s12 = sphi %s2071_s12, %s13_s12  }
   0x2   : > { %p137_p1 = scmp.lt.s32.totalorder %s2046_s12, 3 }
   0x4   : > { %p138_p2 = pnand %p1588_p0, %p137_p1 }
   0x5   : > { %p161_p3 = scmp.lt.s32.totalorder (!%p138_p2), %s1584_s13, 1 }
   0x6   : > { %141 = sbr.rel (%p138_p2) target bundleno = 344 (0x158), region = 32 }
   0xb   : > { %v1924_v0 = vld [vmem:[%s2591_s1 + $0x78] sm:$0xff]   ;;  %v2048_v3 = vmov 0   ;;  %v1928_v5 = vld [vmem:[%s2591_s1 + $0x70] sm:$0xff]   ;;  %v1932_v9 = vld [vmem:[%s2591_s1 + $0x68] sm:$0xff]   ;;  %s2617_s13 = smov (!%p161_p3, %s1584_s13), 1  ;;  %vm233_vm0 = vcmask 1043456  }
   0xc   : > { %v1925_v1 = vld [vmem:[%s2591_s1 + $0xf8] sm:$0xff]   ;;  %1721 = vmatprep.subr.bf16.mxu0 %v1924_v0  ;;  %172 = vst [vmem:[#allocation2] sm:$0xff] %v2048_v3  ;;  %173 = vst [vmem:[#allocation2 + $0x8] sm:$0xff] %v2048_v3  ;;  %v1929_v6 = vld [vmem:[%s2591_s1 + $0xf0] sm:$0xff]   ;;  %s1704_s18 = sshll.u32 %s2617_s13, 4  ;;  %vm242_vm1 = vcmask 1040384  }
   0xd   : > { %v1926_v2 = vld [vmem:[%s2591_s1 + $0x38] sm:$0xff]   ;;  %174 = vst [vmem:[#allocation2 + $0x10] sm:$0xff] %v2048_v3  ;;  %175 = vst [vmem:[#allocation2 + $0x18] sm:$0xff] %v2048_v3  ;;  %1755 = vmatprep.subr.bf16.mxu1 %v1925_v1  ;;  %v1930_v7 = vld [vmem:[%s2591_s1 + $0x30] sm:$0xff]   ;;  %s2179_s27 = scalar_lea.vmem %s2590_s0, %s1704_s18  ;;  %vm251_vm2 = vcmask 1044484   ;;  %vm301_vm5 = vcmask 1043457  }
   0xe   : > { %176 = vst [vmem:[#allocation2 + $0x20] sm:$0xf] %v2048_v3  ;;  %177 = vst [vmem:[#allocation2 + $0x90] sm:$0xff] %v2048_v3  ;;  %v1927_v4 = vld [vmem:[%s2591_s1 + $0xb8] sm:$0xff]   ;;  %1722 = vmatpush3.bf16.msra.mxu0 %v1926_v2  ;;  %v1931_v8 = vld [vmem:[%s2591_s1 + $0xb0] sm:$0xff]   ;;  %vm315_vm12 = vcmask 1045508  }
   0xf   : > { %178 = vst [vmem:[#allocation2 + $0x98] sm:$0xff] %v2048_v3  ;;  %179 = vst [vmem:[#allocation2 + $0xa0] sm:$0xff] %v2048_v3  ;;  %1756 = vmatpush3.bf16.msra.mxu1 %v1927_v4  ;;  %1723 = vmatprep.subr.bf16.mxu0 %v1928_v5  ;;  %v1933_v10 = vld [vmem:[%s2591_s1 + $0xe8] sm:$0xff]   ;;  %v1936_v13 = vld [vmem:[%s2591_s1 + $0x60] sm:$0xff]   ;;  %vm190_vm3 = vsmask.f32 256 }
  0x10   : > { %180 = vst [vmem:[#allocation2 + $0xa8] sm:$0xff] %v2048_v3  ;;  %181 = vst [vmem:[#allocation2 + $0xb0] sm:$0xf] %v2048_v3  ;;  %1757 = vmatprep.subr.bf16.mxu1 %v1929_v6  ;;  %v1934_v11 = vld [vmem:[%s2591_s1 + $0x28] sm:$0xff]   ;;  %v1937_v14 = vld [vmem:[%s2591_s1 + $0xe0] sm:$0xff]   ;;  %s1912_s14 = smul.u32 20, %s2617_s13 }
  0x11   : > { %v1935_v12 = vld [vmem:[%s2591_s1 + $0xa8] sm:$0xff]   ;;  %v1938_v15 = vld [vmem:[%s2591_s1 + $0x20] sm:$0xff]   ;;  %v1940_v17 = vld [vmem:[%s2591_s1 + $0x58] sm:$0xff]   ;;  %vm191_vm4 = vsmask.f32 4368 }
  0x12   : > { %1724 = vmatpush3.bf16.msra.mxu0 %v1930_v7  ;;  %v1939_v16 = vld [vmem:[%s2591_s1 + $0xa0] sm:$0xff]   ;;  %v1941_v18 = vld [vmem:[%s2591_s1 + $0xd8] sm:$0xff]   ;;  %v1944_v21 = vld [vmem:[%s2591_s1 + $0x50] sm:$0xff]   ;;  %vm234_vm6 = vsmask.f32 7938  ;;  %s170_s17 = scalar_lea.vmem %s2593_s3, %s1912_s14 }
  0x13   : > { %1758 = vmatpush3.bf16.msra.mxu1 %v1931_v8  ;;  %1725 = vmatprep.subr.bf16.mxu0 %v1932_v9  ;;  %v1942_v19 = vld [vmem:[%s2591_s1 + $0x18] sm:$0xff]   ;;  %v1945_v22 = vld [vmem:[%s2591_s1 + $0xd0] sm:$0xff]   ;;  %v1948_v25 = vld [vmem:[%s2591_s1 + $0x48] sm:$0xff]   ;;  %vm274_vm10 = vsmask.f32 1280 }
  0x14   : > { %1759 = vmatprep.subr.bf16.mxu1 %v1933_v10  ;;  %v1943_v20 = vld [vmem:[%s2591_s1 + $0x98] sm:$0xff]   ;;  %v1946_v23 = vld [vmem:[%s2591_s1 + $0x10] sm:$0xff]   ;;  %v1949_v26 = vld [vmem:[%s2591_s1 + $0xc8] sm:$0xff]   ;;  %vm275_vm11 = vsmask.f32 5392 }
  0x15   : > { %v1947_v24 = vld [vmem:[%s2591_s1 + $0x90] sm:$0xff]   ;;  %v1950_v27 = vld [vmem:[%s2591_s1 + $0x8] sm:$0xff]   ;;  %v1952_v29 = vld [vmem:[%s2591_s1 + $0x40] sm:$0xff]   ;;  %vm302_vm13 = vsmask.f32 7942 }
  0x16   : > { %1726 = vmatpush3.bf16.msra.mxu0 %v1934_v11  ;;  %v1951_v28 = vld [vmem:[%s2591_s1 + $0x88] sm:$0xff]   ;;  %v1953_v30 = vld [vmem:[%s2591_s1 + $0xc0] sm:$0xff]   ;;  %v1962_v37 = vld [vmem:[%s2591_s1 + $0x178] sm:$0xff]  }
  0x17   : > { %1760 = vmatpush3.bf16.msra.mxu1 %v1935_v12  ;;  %1727 = vmatprep.subr.bf16.mxu0 %v1936_v13  ;;  %v1954_v31 = vld [vmem:[%s2591_s1] sm:$0xff]   ;;  %vm2214_vm7 = vmor %vm242_vm1, %vm251_vm2  ;;  %v1963_v47 = vld [vmem:[%s2591_s1 + $0x1f8] sm:$0xff]   ;;  %vm310_vm2 = vcmask 1041408  }
  0x18   : > { %1761 = vmatprep.subr.bf16.mxu1 %v1937_v14  ;;  %v1955_v32 = vld [vmem:[%s2591_s1 + $0x80] sm:$0xff]   ;;  %vm2220_vm8 = vmor %vm190_vm3, %vm191_vm4  ;;  %v304_v54 = vld [vmem:[#allocation2 + $0xc] sm:$0xe] }
  0x19   : > { %v2188_v33 = vld [vmem:[%s2179_s27] sm:$0xf]  ;;  %v2191_v34 = vld [vmem:[%s2179_s27 + $0x4] sm:$0xf]  ;;  %vm2231_vm9 = vmand %vm233_vm0, %vm234_vm6  ;;  %vm379_vm6 = vcmask 1046532  }
  0x1a   : > { %1728 = vmatpush3.bf16.msra.mxu0 %v1938_v15  ;;  %186 = vst [vmem:[#allocation2] sm:$0xf] %v2188_v33  ;;  %187 = vst [vmem:[#allocation2 + $0x24] sm:$0xf] %v2191_v34  ;;  %v2196_v35 = vshrl.u32 %v2188_v33, 16  ;;  %v2199_v36 = vshrl.u32 %v2191_v34, 16 }
  0x1b   : > { %1762 = vmatpush3.bf16.msra.mxu1 %v1939_v16  ;;  %1729 = vmatprep.subr.bf16.mxu0 %v1940_v17  ;;  %442 = vst [vmem:[#allocation2 + $0x44] sm:$0xf] %v2188_v33  ;;  %443 = vst [vmem:[#allocation2 + $0x68] sm:$0xf] %v2191_v34  ;;  %v2207_v38 = vshll.u32 %v2188_v33, 16  ;;  %v2210_v39 = vshll.u32 %v2191_v34, 16 }
  0x1c   : > { %1763 = vmatprep.subr.bf16.mxu1 %v1941_v18  ;;  %v253_v41 = vrot.slane %v2188_v33, 7  ;;  %v196_v43 = vrot.slane %v2196_v35, 7  ;;  %v204_v44 = vrot.slane %v2199_v36, 7  ;;  %v236_v45 = vld [vmem:[#allocation2 + $0x4] sm:$0xf]  ;;  %v255_v46 = vrot.slane %v2191_v34, 7  ;;  %vm303_vm14 = vmand %vm301_vm5, %vm302_vm13 }
  0x1d   : > { %v277_v50 = vrot.slane %v2196_v35, 6  ;;  %v278_v56 = vrot.slane %v2207_v38, 7  ;;  %v281_v57 = vrot.slane %v2199_v36, 6  ;;  %v282_v58 = vrot.slane %v2210_v39, 7  ;;  %vm2253_vm15 = vmor %vm274_vm10, %vm275_vm11  ;;  %v1964_v11 = vld [vmem:[%s2591_s1 + $0x138] sm:$0xff]   ;;  %v1966_v17 = vld [vmem:[%s2591_s1 + $0x170] sm:$0xff]  }
  0x1e   : > { %1730 = vmatpush3.bf16.msra.mxu0 %v1942_v19  ;;  %v254_v49 = vrot.slane %v253_v41, 4  ;;  %269 = vst [vmem:[#allocation2 + $0x8] sm:$0xe] %v253_v41  ;;  %v199_v51 = vor.u32 %v2207_v38, %v196_v43  ;;  %v200_v52 = vrot.slane %v196_v43, 4  ;;  %v207_v53 = vor.u32 %v2210_v39, %v204_v44  ;;  %vm2260_vm4 = vmor %vm310_vm2, %vm315_vm12  ;;  %v1965_v19 = vld [vmem:[%s2591_s1 + $0x1b8] sm:$0xff]  }
  0x1f   : > { %1764 = vmatpush3.bf16.msra.mxu1 %v1943_v20  ;;  %1731 = vmatprep.subr.bf16.mxu0 %v1944_v21  ;;  %v279_v61 = vor.u32 %v278_v56, %v277_v50  ;;  %v2247_v62 = vor.u32 %v282_v58, %v281_v57  ;;  %v317_v63 = vrot.slane %v2188_v33, 6  ;;  %v319_v1 = vrot.slane %v2191_v34, 6  ;;  %v1968_v20 = vld [vmem:[%s2591_s1 + $0x130] sm:$0xff]   ;;  %vm2349_vm13 = vmand %vm310_vm2, %vm274_vm10 }
  0x20   : > { %1765 = vmatprep.subr.bf16.mxu1 %v1945_v22  ;;  %v256_v55 = vsel %vm2214_vm7, %v254_v49, %v255_v46  ;;  %v208_v59 = vsel %vm2220_vm8, %v200_v52, %v207_v53  ;;  %v237_v60 = vsel %vm2231_vm9, %v199_v51, %v236_v45  ;;  %v341_v7 = vrot.slane %v2196_v35, 5  ;;  %v1967_v21 = vld [vmem:[%s2591_s1 + $0x1f0] sm:$0xff]   ;;  %v1970_v22 = vld [vmem:[%s2591_s1 + $0x168] sm:$0xff]  }
  0x21   : > { %270 = vst [vmem:[#allocation2 + $0x2c] sm:$0xf] %v256_v55  ;;  %238 = vst [vmem:[#allocation2 + $0x4] sm:$0xf] %v237_v60  ;;  %v280_v2 = vrot.slane %v279_v61, 4  ;;  %v305_v3 = vsel %vm303_vm14, %v279_v61, %v304_v54  ;;  %v318_v5 = vrot.slane %v317_v63, 4 }
  0x22   : > { %1732 = vmatpush3.bf16.msra.mxu0 %v1946_v23  ;;  %239 = vst [vmem:[#allocation2 + $0x28] sm:$0xf] %v208_v59  ;;  %333 = vst [vmem:[#allocation2 + $0x10] sm:$0xc] %v317_v63  ;;  %v342_v9 = vrot.slane %v2207_v38, 6  ;;  %v257_v10 = vrot.slane %v255_v46, 4 }
  0x23   : > { %1766 = vmatpush3.bf16.msra.mxu1 %v1947_v24  ;;  %1733 = vmatprep.subr.bf16.mxu0 %v1948_v25  ;;  %306 = vst [vmem:[#allocation2 + $0xc] sm:$0xe] %v305_v3  ;;  %v284_v6 = vsel %vm2253_vm15, %v280_v2, %v2247_v62  ;;  %v320_v8 = vsel %vm2260_vm4, %v318_v5, %v319_v1  ;;  %vm374_vm5 = vcmask 1042432   ;;  %v1956_v12 = vld [vmem:[#allocation2] ss:$36 sps:$4 sm:$0xff]   ;;  %v2276_v13 = vrot.slane %v204_v44, 4 }
  0x24   : > { %1767 = vmatprep.subr.bf16.mxu1 %v1949_v26  ;;  %307 = vst [vmem:[#allocation2 + $0x30] sm:$0xf] %v284_v6  ;;  %334 = vst [vmem:[#allocation2 + $0x34] sm:$0xf] %v320_v8  ;;  %v2278_v14 = vor.u32 %v342_v9, %v341_v7  ;;  %v345_v15 = vrot.slane %v2199_v36, 5  ;;  %v346_v18 = vrot.slane %v2210_v39, 6 }
  0x25   : > { %vm338_vm9 = vsmask.f32 2304  ;;  %vm339_vm11 = vsmask.f32 6416  ;;  %v381_v25 = vrot.slane %v2188_v33, 5  ;;  %v285_v26 = vrot.slane %v2247_v62, 4  ;;  %vm2366_vm10 = vmor %vm374_vm5, %vm379_vm6 }
  0x26   : > { %1734 = vmatpush3.bf16.msra.mxu0 %v1950_v27  ;;  %v344_v23 = vrot.slane %v2278_v14, 4  ;;  %v2298_v24 = vor.u32 %v346_v18, %v345_v15  ;;  %vm2331_vm12 = vmor %vm338_vm9, %vm339_vm11  ;;  %v1971_v45 = vld [vmem:[%s2591_s1 + $0x1e8] sm:$0xff]   ;;  %v383_v50 = vrot.slane %v2191_v34, 5  ;;  %v1979_v60 = vld [vmem:[%s2591_s1 + $0x160] sm:$0xff]   ;;  %v406_v33 = vrot.slane %v2196_v35, 4 }
  0x27   : > { %1768 = vmatpush3.bf16.msra.mxu1 %v1951_v28  ;;  %1735 = vmatprep.subr.bf16.mxu0 %v1952_v29  ;;  %v2303_v29 = vld [vmem:[%s2179_s27 + $0x8] sm:$0xf]  ;;  %397 = vst [vmem:[#allocation2 + $0x18] sm:$0x8] %v381_v25  ;;  %v1980_v8 = vld [vmem:[%s2591_s1 + $0x1e0] sm:$0xff]   ;;  %v1984_v18 = vld [vmem:[%s2591_s1 + $0x1d8] sm:$0xff]  }
  0x28   : > { %1769 = vmatprep.subr.bf16.mxu1 %v1953_v30  ;;  %v1959_v27 = vld [vmem:[#allocation2 + $0x8] ss:$36 sps:$4 sm:$0xff]   ;;  %188 = vst [vmem:[#allocation2 + $0x48] sm:$0xf] %v2303_v29  ;;  %444 = vst [vmem:[#allocation2 + $0x8c] sm:$0xf] %v2303_v29  ;;  %v348_v49 = vsel %vm2331_vm12, %v344_v23, %v2298_v24 }
  0x29   : > { %v1958_v16 = vld [vmem:[#allocation2 + $0x4] ss:$36 sps:$4 sm:$0xff]   ;;  %v2306_v30 = vld [vmem:[%s2179_s27 + $0xc] sm:$0xf]  ;;  %371 = vst [vmem:[#allocation2 + $0x38] sm:$0xf] %v348_v49 }
  0x2a   : > { %1736 = vmatpush3.bf16.msra.mxu0 %v1954_v31  ;;  %1203 = vmatprep.mubr.bf16.mxu0 %v1958_v16  ;;  %v1969_v31 = vld [vmem:[%s2591_s1 + $0x1b0] sm:$0xff]   ;;  %189 = vst [vmem:[#allocation2 + $0x6c] sm:$0xf] %v2306_v30  ;;  %v2322_v41 = vshrl.u32 %v2306_v30, 16  ;;  %v2325_v43 = vshll.u32 %v2306_v30, 16  ;;  %v1972_v46 = vld [vmem:[%s2591_s1 + $0x128] sm:$0xff]  }
  0x2b   : > { %1770 = vmatpush3.bf16.msra.mxu1 %v1955_v32  ;;  %1789 = vmatprep.subr.bf16.mxu0 %v1962_v37  ;;  %v1961_v28 = vld [vmem:[#allocation2 + $0xc] ss:$36 sps:$4 sm:$0xff]   ;;  %v2316_v32 = vshrl.u32 %v2303_v29, 16  ;;  %v2319_v37 = vshll.u32 %v2303_v29, 16  ;;  %445 = vst [vmem:[#allocation2 + $0xb0] sm:$0xf] %v2306_v30 }
  0x2c   : > { %1823 = vmatprep.subr.bf16.mxu1 %v1963_v47  ;;  %1259 = vmatprep.mubr.bf16.mxu1 %v1961_v28  ;;  %v258_v47 = vrot.slane %v2303_v29, 7  ;;  %v261_v48 = vrot.slane %v2306_v30, 7  ;;  %v222_v53 = vrot.slane %v2322_v41, 7  ;;  %v291_v58 = vrot.slane %v2322_v41, 6  ;;  %v1973_v62 = vld [vmem:[%s2591_s1 + $0x1a8] sm:$0xff]   ;;  %v1982_v16 = vld [vmem:[%s2591_s1 + $0x1a0] sm:$0xff]  }
  0x2d   : > { %1204 = vmatmul.mubr.bf16.vlgmr.msra.gmra.mxu0 %v1956_v12  ;;  %v213_v52 = vrot.slane %v2316_v32, 7  ;;  %v286_v54 = vrot.slane %v2316_v32, 6  ;;  %v287_v55 = vrot.slane %v2319_v37, 7  ;;  %v292_v59 = vrot.slane %v2325_v43, 7  ;;  %v1981_v12 = vld [vmem:[%s2591_s1 + $0x120] sm:$0xff]   ;;  %v1986_v28 = vld [vmem:[%s2591_s1 + $0x198] sm:$0xff]  }
  0x2e   : > { %1790 = vmatpush3.bf16.msra.mxu0 %v1964_v11  ;;  %1260 = vmatmul.mubr.bf16.vlgmr.msra.gmra.mxu1 %v1959_v27  ;;  %v259_v56 = vsel %vm2214_vm7, %v257_v10, %v258_v47  ;;  %v260_v57 = vrot.slane %v258_v47, 4  ;;  %v225_v3 = vor.u32 %v2325_v43, %v222_v53  ;;  %v263_v42 = vrot.slane %v261_v48, 4  ;;  %v1991_v51 = vld [vmem:[%s2591_s1 + $0x110] sm:$0xff]  }
  0x2f   : > { %1791 = vmatprep.subr.bf16.mxu0 %v1966_v17  ;;  %1824 = vmatpush3.bf16.msra.mxu1 %v1965_v19  ;;  %v216_v63 = vor.u32 %v2319_v37, %v213_v52  ;;  %v218_v2 = vrot.slane %v213_v52, 4  ;;  %271 = vst [vmem:[#allocation2 + $0x50] sm:$0xf] %v259_v56  ;;  %v288_v5 = vor.u32 %v287_v55, %v286_v54  ;;  %v1985_v19 = vld [vmem:[%s2591_s1 + $0x118] sm:$0xff]   ;;  %v382_v23 = vrot.slane %v381_v25, 4  ;;  %v1990_v25 = vld [vmem:[%s2591_s1 + $0x1d0] sm:$0xff]  }
  0x30   : > { %1825 = vmatprep.subr.bf16.mxu1 %v1967_v21  ;;  %v262_v6 = vsel %vm2214_vm7, %v260_v57, %v261_v48  ;;  %v293_v7 = vor.u32 %v292_v59, %v291_v58  ;;  %273 = vst [vmem:[#allocation2 + $0x98] sm:$0x1] %v263_v42  ;;  %vm2406_vm7 = vmand %vm242_vm1, %vm190_vm3  ;;  %v405_v27 = vrot.slane %v2207_v38, 5  ;;  %vm365_vm1 = vcmask 1043458   ;;  %v1992_v57 = vld [vmem:[%s2591_s1 + $0x190] sm:$0xff]   ;;  %v1995_v59 = vld [vmem:[%s2591_s1 + $0x148] sm:$0xff]  }
  0x31   : > { %v217_v9 = vsel %vm2220_vm8, %v2276_v13, %v216_v63  ;;  %v226_v10 = vsel %vm2220_vm8, %v218_v2, %v225_v3  ;;  %272 = vst [vmem:[#allocation2 + $0x74] sm:$0xf] %v262_v6  ;;  %v289_v11 = vsel %vm2253_vm15, %v285_v26, %v288_v5  ;;  %v290_v40 = vrot.slane %v288_v5, 4  ;;  %v1983_v13 = vld [vmem:[%s2591_s1 + $0x158] sm:$0xff]   ;;  %v1989_v26 = vld [vmem:[%s2591_s1 + $0x150] sm:$0xff]   ;;  %v1997_v2 = vld [vmem:[%s2591_s1 + $0x108] sm:$0xff]  }
  0x32   : > { %1792 = vmatpush3.bf16.msra.mxu0 %v1968_v20  ;;  %240 = vst [vmem:[#allocation2 + $0x4c] sm:$0xf] %v217_v9  ;;  %241 = vst [vmem:[#allocation2 + $0x70] sm:$0xf] %v226_v10  ;;  %v295_v17 = vrot.slane %v293_v7, 4  ;;  %v2437_v52 = vor.u32 %v406_v33, %v405_v27  ;;  %v321_v54 = vrot.slane %v319_v1, 4 }
  0x33   : > { %1793 = vmatprep.subr.bf16.mxu0 %v1970_v22  ;;  %1826 = vmatpush3.bf16.msra.mxu1 %v1969_v31  ;;  %308 = vst [vmem:[#allocation2 + $0x54] sm:$0xf] %v289_v11  ;;  %v294_v15 = vsel %vm2253_vm15, %v290_v40, %v293_v7  ;;  %v312_v20 = vld [vmem:[#allocation2 + $0x9c] sm:$0x3]  ;;  %v227_v22 = vrot.slane %v222_v53, 4  ;;  %v384_v31 = vsel %vm2366_vm10, %v382_v23, %v383_v50  ;;  %vm429_vm14 = vcmask 1043459  }
  0x34   : > { %1827 = vmatprep.subr.bf16.mxu1 %v1971_v45  ;;  %309 = vst [vmem:[#allocation2 + $0x78] sm:$0xf] %v294_v15  ;;  %v313_v21 = vsel %vm2349_vm13, %v295_v17, %v312_v20  ;;  %v244_v45 = vld [vmem:[#allocation2 + $0x94] sm:$0x1]  ;;  %398 = vst [vmem:[#allocation2 + $0x3c] sm:$0xf] %v384_v31 }
  0x35   : > { %314 = vst [vmem:[#allocation2 + $0x9c] sm:$0x3] %v313_v21  ;;  %v245_v35 = vsel %vm2406_vm7, %v227_v22, %v244_v45  ;;  %vm366_vm3 = vsmask.f32 7946  ;;  %vm402_vm8 = vsmask.f32 3328  ;;  %vm375_vm13 = vmand %vm374_vm5, %vm338_vm9 }
  0x36   : > { %1794 = vmatpush3.bf16.msra.mxu0 %v1972_v46  ;;  %v409_v46 = vrot.slane %v2210_v39, 5  ;;  %246 = vst [vmem:[#allocation2 + $0x94] sm:$0x1] %v245_v35  ;;  %v408_v58 = vrot.slane %v2437_v52, 4  ;;  %vm403_vm15 = vsmask.f32 7440 }
  0x37   : > { %1795 = vmatprep.subr.bf16.mxu0 %v1979_v60  ;;  %1828 = vmatpush3.bf16.msra.mxu1 %v1973_v62  ;;  %v322_v60 = vrot.slane %v2303_v29, 6  ;;  %v1996_v62 = vld [vmem:[%s2591_s1 + $0x1c8] sm:$0xff]   ;;  %v325_v7 = vrot.slane %v2306_v30, 6  ;;  %v349_v9 = vrot.slane %v2298_v24, 4  ;;  %v2000_v11 = vld [vmem:[%s2591_s1 + $0x1c0] sm:$0xff]   ;;  %v350_v15 = vrot.slane %v2316_v32, 5  ;;  %vm2489_vm6 = vmor %vm402_vm8, %vm403_vm15 }
  0x38   : > { %1829 = vmatprep.subr.bf16.mxu1 %v1980_v8  ;;  %v1978_v56 = vld [vmem:[#allocation2 + $0x50] ss:$36 sps:$4 sm:$0xff]   ;;  %v1998_v6 = vld [vmem:[%s2591_s1 + $0x188] sm:$0xff]   ;;  %v1999_v8 = vld [vmem:[%s2591_s1 + $0x140] sm:$0xff]   ;;  %vm430_vm2 = vsmask.f32 7950  ;;  %v410_v34 = vsel %vm2489_vm6, %v408_v58, %v409_v46 }
  0x39   : > { %v456_v47 = vld [vmem:[#allocation2 + $0x48] sm:$0xff]  ;;  %v323_v3 = vsel %vm2260_vm4, %v321_v54, %v322_v60  ;;  %v324_v5 = vrot.slane %v322_v60, 4  ;;  %v2001_v24 = vld [vmem:[%s2591_s1 + $0x100] sm:$0xff]   ;;  %v351_v17 = vrot.slane %v2319_v37, 6  ;;  %v368_v4 = vld [vmem:[#allocation2 + $0x14] sm:$0xc] }
  0x3a   : > { %1796 = vmatpush3.bf16.msra.mxu0 %v1981_v12  ;;  %v461_v48 = vld [vmem:[#allocation2 + $0x6c] sm:$0xff]  ;;  %335 = vst [vmem:[#allocation2 + $0x58] sm:$0xf] %v323_v3  ;;  %v385_v20 = vrot.slane %v383_v50, 4  ;;  %v432_v22 = vld [vmem:[#allocation2 + $0x1c] sm:$0x8]  ;;  %vm431_vm11 = vmand %vm429_vm14, %vm430_vm2 }
  0x3b   : > { %1797 = vmatprep.subr.bf16.mxu0 %v1983_v13  ;;  %v1974_v49 = vld [vmem:[#allocation2 + $0x4c] ss:$36 sps:$4 sm:$0xff]   ;;  %1830 = vmatpush3.bf16.msra.mxu1 %v1982_v16  ;;  %v1601_v53 = vcombine.low %v456_v47, %v461_v48  ;;  %v1976_v55 = vld [vmem:[#allocation2 + $0x54] ss:$36 sps:$4 sm:$0xff]   ;;  %v326_v40 = vsel %vm2260_vm4, %v324_v5, %v325_v7  ;;  %v2002_v16 = vld [vmem:[%s2591_s1 + $0x180] sm:$0xff]   ;;  %v352_v23 = vor.u32 %v351_v17, %v350_v15  ;;  %v411_v50 = vrot.slane %v2199_v36, 4 }
  0x3c   : > { %1831 = vmatprep.subr.bf16.mxu1 %v1984_v18  ;;  %1211 = vmatprep.mubr.bf16.mxu0 %v1974_v49  ;;  %v467_v1 = vld [vmem:[#allocation2 + $0x98] sm:$0xff]  ;;  %336 = vst [vmem:[#allocation2 + $0x7c] sm:$0xf] %v326_v40  ;;  %vm367_vm4 = vmand %vm365_vm1, %vm366_vm3  ;;  %v355_v18 = vrot.slane %v2322_v41, 5  ;;  %v414_v31 = vrot.slane %v2319_v37, 5  ;;  %v2049_v47 = vmov 0.0  }
  0x3d   : > { %1212 = vmatmul.mubr.bf16.gmra.mxu0 %v1601_v53  ;;  %1267 = vmatprep.mubr.bf16.mxu1 %v1976_v55  ;;  %v1613_v63 = vcombine.high %v467_v1, %v467_v1  ;;  %v466_v10 = vld [vmem:[#allocation2 + $0x90] sm:$0xff]  ;;  %v1612_v12 = vcombine.low %v467_v1, %v467_v1  ;;  %v369_v0 = vsel %vm367_vm4, %v2278_v14, %v368_v4  ;;  %v416_v38 = vrot.slane %v2316_v32, 4  ;;  %v376_v32 = vld [vmem:[#allocation2 + $0xa4] sm:$0x7]  ;;  %v2006_v60 = vld [vmem:[#allocation2 + $0x18] ss:$36 sps:$4 sm:$0xff]  }
  0x3e   : > { %1798 = vmatpush3.bf16.msra.mxu0 %v1985_v19  ;;  %1268 = vmatmul.mubr.bf16.gmra.mxu1 %v1978_v56  ;;  %v1611_v13 = vcombine.high %v466_v10, %v466_v10  ;;  %v1610_v42 = vcombine.low %v466_v10, %v466_v10  ;;  %v356_v19 = vrot.slane %v2325_v43, 6  ;;  %370 = vst [vmem:[#allocation2 + $0x14] sm:$0xc] %v369_v0  ;;  %435 = vst [vmem:[#allocation2 + $0x40] sm:$0xf] %v410_v34  ;;  %v2016_v5 = vld [vmem:[%s2591_s1 + $0x228] sm:$0xff]  }
  0x3f   : > { %1799 = vmatprep.subr.bf16.mxu0 %v1989_v26  ;;  %1832 = vmatpush3.bf16.msra.mxu1 %v1986_v28  ;;  %v386_v26 = vrot.slane %v2303_v29, 5  ;;  %v389_v28 = vrot.slane %v2306_v30, 5  ;;  %v433_v29 = vsel %vm431_vm11, %v405_v27, %v432_v22  ;;  %v353_v33 = vsel %vm2331_vm12, %v349_v9, %v352_v23  ;;  %v2009_v30 = vld [vmem:[%s2591_s1 + $0x238] sm:$0xff]   ;;  %v2003_v55 = vld [vmem:[#allocation2 + $0x10] ss:$36 sps:$4 sm:$0xff]   ;;  %v2018_v40 = vld [vmem:[%s2591_s1 + $0x220] sm:$0xff]  }
  0x40   : > { %1833 = vmatprep.subr.bf16.mxu1 %v1990_v25  ;;  %1275 = vmatprep.mubr.bf16.mxu1 %v1613_v63  ;;  %v357_v14 = vor.u32 %v356_v19, %v355_v18  ;;  %v354_v25 = vrot.slane %v352_v23, 4  ;;  %434 = vst [vmem:[#allocation2 + $0x1c] sm:$0x8] %v433_v29  ;;  %372 = vst [vmem:[#allocation2 + $0x5c] sm:$0xf] %v353_v33  ;;  %v412_v37 = vor.u32 %v411_v50, %v409_v46  ;;  %v2010_v63 = vld [vmem:[%s2591_s1 + $0x230] sm:$0xff]  }
  0x41   : > { %1219 = vmatprep.mubr.bf16.mxu0 %v1611_v13  ;;  %v387_v45 = vsel %vm2366_vm10, %v385_v20, %v386_v26  ;;  %v388_v36 = vrot.slane %v386_v26, 4  ;;  %v419_v48 = vrot.slane %v2325_v43, 5  ;;  %v421_v49 = vrot.slane %v2322_v41, 4  ;;  %v439_v46 = vld [vmem:[#allocation2 + $0xac] sm:$0xf]  ;;  %v2022_v13 = vld [vmem:[%s2591_s1 + $0x218] sm:$0xff]  }
  0x42   : > { %1800 = vmatpush3.bf16.msra.mxu0 %v1991_v51  ;;  %399 = vst [vmem:[#allocation2 + $0x60] sm:$0xf] %v387_v45  ;;  %v358_v27 = vsel %vm2331_vm12, %v354_v25, %v357_v14  ;;  %v413_v35 = vrot.slane %v412_v37, 4  ;;  %v417_v52 = vor.u32 %v416_v38, %v414_v31  ;;  %v327_v39 = vrot.slane %v325_v7, 4  ;;  %vm2526_vm12 = vmand %vm233_vm0, %vm402_vm8  ;;  %v2025_v15 = vld [vmem:[%s2591_s1 + $0x208] sm:$0xff]  }
  0x43   : > { %1801 = vmatprep.subr.bf16.mxu0 %v1995_v59  ;;  %1834 = vmatpush3.bf16.msra.mxu1 %v1992_v57  ;;  %373 = vst [vmem:[#allocation2 + $0x80] sm:$0xf] %v358_v27  ;;  %v390_v51 = vsel %vm2366_vm10, %v388_v36, %v389_v28  ;;  %v422_v41 = vor.u32 %v421_v49, %v419_v48  ;;  %v359_v44 = vrot.slane %v357_v14, 4  ;;  %v391_v61 = vrot.slane %v389_v28, 4  ;;  %v2013_v3 = vld [vmem:[#allocation2 + $0x58] ss:$36 sps:$4 sm:$0xff]  }
  0x44   : > { %1835 = vmatprep.subr.bf16.mxu1 %v1996_v62  ;;  %400 = vst [vmem:[#allocation2 + $0x84] sm:$0xf] %v390_v51  ;;  %v415_v53 = vsel %vm2489_vm6, %v413_v35, %v414_v31  ;;  %v418_v54 = vrot.slane %v417_v52, 4  ;;  %337 = vst [vmem:[#allocation2 + $0xa0] sm:$0x3] %v327_v39  ;;  %vm2050_vm0 = vmmov 0  }
  0x45   : > { %1220 = vmatmul.mubr.bf16.gmra.mxu0 %v1610_v42  ;;  %v2005_v56 = vld [vmem:[#allocation2 + $0x14] ss:$36 sps:$4 sm:$0xff]   ;;  %436 = vst [vmem:[#allocation2 + $0x64] sm:$0xf] %v415_v53  ;;  %v377_v57 = vsel %vm375_vm13, %v359_v44, %v376_v32  ;;  %401 = vst [vmem:[#allocation2 + $0xa8] sm:$0x7] %v391_v61 }
  0x46   : > { %1802 = vmatpush3.bf16.msra.mxu0 %v1997_v2  ;;  %1276 = vmatmul.mubr.bf16.gmra.mxu1 %v1612_v12  ;;  %v423_v58 = vrot.slane %v422_v41, 4  ;;  %v420_v59 = vsel %vm2489_vm6, %v418_v54, %v419_v48  ;;  %378 = vst [vmem:[#allocation2 + $0xa4] sm:$0x7] %v377_v57  ;;  %v2027_v17 = vld [vmem:[#allocation2 + $0x20] ss:$36 sps:$4 sm:$0xff]  }
  0x47   : > { %1803 = vmatprep.subr.bf16.mxu0 %v1999_v8  ;;  %1836 = vmatpush3.bf16.msra.mxu1 %v1998_v6  ;;  %v2008_v1 = vld [vmem:[#allocation2 + $0x1c] ss:$36 sps:$4 sm:$0xff]   ;;  %437 = vst [vmem:[#allocation2 + $0x88] sm:$0xf] %v420_v59  ;;  %v2028_v4 = vld [vmem:[#allocation2 + $0x68] ss:$36 sps:$4 sm:$0xff]  }
  0x48   : > { %1837 = vmatprep.subr.bf16.mxu1 %v2000_v11  ;;  %1315 = vmatprep.mubr.bf16.mxu0 %v2005_v56  ;;  %v440_v62 = vsel %vm2526_vm12, %v423_v58, %v439_v46  ;;  %v2029_v18 = vld [vmem:[#allocation2 + $0xb0] ss:$0 sps:$4 sm:$0xff]  }
  0x49   : > { %441 = vst [vmem:[#allocation2 + $0xac] sm:$0xf] %v440_v62  ;;  %1371 = vmatprep.mubr.bf16.mxu1 %v2008_v1 }
  0x4a   : > { %1804 = vmatpush3.bf16.msra.mxu0 %v2001_v24  ;;  %v2011_v2 = vld [vmem:[#allocation2 + $0x5c] ss:$36 sps:$4 sm:$0xff]   ;;  %v2024_v24 = vld [vmem:[%s2591_s1 + $0x210] sm:$0xff]  }
  0x4b   : > { %1868 = vmatprep.subr.bf16.mxu0 %v2049_v47  ;;  %1838 = vmatpush3.bf16.msra.mxu1 %v2002_v16  ;;  %v2017_v8 = vld [vmem:[#allocation2 + $0x60] ss:$36 sps:$4 sm:$0xff]  }
  0x4c   : > { %1896 = vmatprep.subr.bf16.mxu1 %v2049_v47  ;;  %v2026_v16 = vld [vmem:[%s2591_s1 + $0x200] sm:$0xff]  }
  0x4d   : > { %1316 = vmatmul.mubr.bf16.vlgmr.msra.gmra.mxu0 %v2003_v55  ;;  %v468_v6 = vld [vmem:[#allocation2 + $0xa0] sm:$0xff] }
  0x4e   : > { %1869 = vmatpush3.bf16.msra.mxu0 %v2009_v30  ;;  %1372 = vmatmul.mubr.bf16.vlgmr.msra.gmra.mxu1 %v2006_v60  ;;  %v2014_v7 = vld [vmem:[#allocation2 + $0x64] ss:$36 sps:$4 sm:$0xff]   ;;  %v1615_v9 = vcombine.high %v468_v6, %v468_v6  ;;  %v1614_v12 = vcombine.low %v468_v6, %v468_v6 }
  0x4f   : > { %1870 = vmatprep.subr.bf16.mxu0 %v2049_v47  ;;  %1904 = vmatpush3.bf16.msra.mxu1 %v2009_v30 }
  0x50   : > { %1323 = vmatprep.mubr.bf16.mxu0 %v2011_v2  ;;  %1897 = vmatprep.subr.bf16.mxu1 %v2049_v47  ;;  %v469_v10 = vld [vmem:[#allocation2 + $0xa8] sm:$0xff] }
  0x51   : > { %v1617_v11 = vcombine.high %v469_v10, %v469_v10  ;;  %1379 = vmatprep.mubr.bf16.mxu1 %v2014_v7  ;;  %v1616_v42 = vcombine.low %v469_v10, %v469_v10 }
  0x52   : > { %1871 = vmatpush3.bf16.msra.mxu0 %v2010_v63 }
  0x53   : > { %1872 = vmatprep.subr.bf16.mxu0 %v2049_v47  ;;  %1905 = vmatpush3.bf16.msra.mxu1 %v2010_v63 }
  0x54   : > { %1898 = vmatprep.subr.bf16.mxu1 %v2049_v47 }
  0x55   : > { %1324 = vmatmul.mubr.bf16.gmra.mxu0 %v2013_v3 }
  0x56   : > { %1873 = vmatpush3.bf16.msra.mxu0 %v2016_v5  ;;  %1380 = vmatmul.mubr.bf16.gmra.mxu1 %v2017_v8 }
  0x57   : > { %1874 = vmatprep.subr.bf16.mxu0 %v2049_v47  ;;  %1906 = vmatpush3.bf16.msra.mxu1 %v2016_v5 }
  0x58   : > { %1331 = vmatprep.mubr.bf16.mxu0 %v1615_v9  ;;  %1899 = vmatprep.subr.bf16.mxu1 %v2049_v47 }
  0x59   : > { %1387 = vmatprep.mubr.bf16.mxu1 %v1617_v11 }
  0x5a   : > { %1875 = vmatpush3.bf16.msra.mxu0 %v2018_v40 }
  0x5b   : > { %1876 = vmatprep.subr.bf16.mxu0 %v2049_v47  ;;  %1907 = vmatpush3.bf16.msra.mxu1 %v2018_v40 }
  0x5c   : > { %1900 = vmatprep.subr.bf16.mxu1 %v2049_v47 }
  0x5d   : > { %1332 = vmatmul.mubr.bf16.gmra.mxu0 %v1614_v12 }
  0x5e   : > { %1877 = vmatpush3.bf16.msra.mxu0 %v2022_v13  ;;  %1884 = vmatprep.mubr.msk.bf16.mxu0 %vm2050_vm0, %v2049_v47 }
  0x5f   : > { %1388 = vmatmul.mubr.bf16.gmra.mxu1 %v1616_v42  ;;  %1878 = vmatprep.subr.bf16.mxu0 %v2049_v47 }
  0x60   : > { %1908 = vmatpush3.bf16.msra.mxu1 %v2022_v13  ;;  %1888 = vmatprep.mubr.msk.bf16.mxu1 %vm2050_vm0, %v2049_v47 }
  0x61   : > { %1901 = vmatprep.subr.bf16.mxu1 %v2049_v47 }
  0x62   : > { %1879 = vmatpush3.bf16.msra.mxu0 %v2024_v24 }
  0x63   : > { %1880 = vmatprep.subr.bf16.mxu0 %v2049_v47 }
  0x64   : > { %1909 = vmatpush3.bf16.msra.mxu1 %v2024_v24 }
  0x65   : > { %1902 = vmatprep.subr.bf16.mxu1 %v2049_v47 }
  0x66   : > { %1881 = vmatpush3.bf16.msra.mxu0 %v2025_v15 }
  0x67   : > { %1882 = vmatprep.subr.bf16.mxu0 %v2049_v47 }
  0x68   : > { %1910 = vmatpush3.bf16.msra.mxu1 %v2025_v15 }
  0x69   : > { %1903 = vmatprep.subr.bf16.mxu1 %v2049_v47 }
  0x6a   : > { %1883 = vmatpush3.bf16.msra.mxu0 %v2026_v16 }
  0x6c   : > { %1911 = vmatpush3.bf16.msra.mxu1 %v2026_v16 }
  0x6d   : > { %1885 = vmatmul.mubr.bf16.vlgmr.msra.gmra.mxu0 %v2027_v17 }
  0x6f   : > { %1889 = vmatmul.mubr.bf16.vlgmr.msra.gmra.mxu1 %v2028_v4 }
  0x70   : > { %1892 = vmatprep.mubr.msk.bf16.mxu1 %vm2050_vm0, %v2049_v47 }
  0x77   : > { %1893 = vmatmul.mubr.bf16.gmra.mxu1 %v2029_v18 }
  0xed   : > { %v1737_v19 = vpop.f32.mrf.mxu0 }
  0xee   : > { %v1771_v20 = vpop.f32.mrf.mxu1 }
  0xef   : > { %v1738_v0 = vpop.f32.mrf.mxu0 }
  0xf0   : > { %v1772_v21 = vpop.f32.mrf.mxu1  ;;  %v1739_v2 = vadd.f32 %v1738_v0, %v1737_v19 }
  0xf1   : > { %v1740_v22 = vpop.f32.mrf.mxu0  ;;  %v1773_v3 = vadd.f32 %v1772_v21, %v1771_v20 }
  0xf2   : > { %v1774_v23 = vpop.f32.mrf.mxu1 }
  0xf3   : > { %v1741_v26 = vpop.f32.mrf.mxu0  ;;  %v1262_v11 = vadd.f32 %v1773_v3, %v1739_v2 }
  0xf4   : > { %v1775_v28 = vpop.f32.mrf.mxu1  ;;  %v1742_v40 = vadd.f32 %v1741_v26, %v1740_v22  ;;  %v1691_v22 = vld [vmem:[%s2592_s2] ss:$0 sm:$0xff] }
  0xf5   : > { %v1776_v12 = vadd.f32 %v1775_v28, %v1774_v23 }
  0xf7   : > { %v1265_v4 = vadd.f32 %v1776_v12, %v1742_v40 }
  0xfd   : > { %v1743_v34 = vpop.f32.mrf.mxu0 }
  0xfe   : > { %v1777_v14 = vpop.f32.mrf.mxu1 }
  0xff   : > { %v1744_v50 = vpop.f32.mrf.mxu0 }
 0x100   : > { %v1778_v31 = vpop.f32.mrf.mxu1  ;;  %v1745_v7 = vadd.f32 %v1744_v50, %v1743_v34 }
 0x101   : > { %v1746_v29 = vpop.f32.mrf.mxu0  ;;  %v1779_v8 = vadd.f32 %v1778_v31, %v1777_v14 }
 0x102   : > { %v1780_v33 = vpop.f32.mrf.mxu1 }
 0x103   : > { %v1747_v25 = vpop.f32.mrf.mxu0  ;;  %v1270_v42 = vadd.f32 %v1779_v8, %v1745_v7 }
 0x104   : > { %v1781_v45 = vpop.f32.mrf.mxu1  ;;  %v1748_v16 = vadd.f32 %v1747_v25, %v1746_v29 }
 0x105   : > { %v1749_v36 = vpop.f32.mrf.mxu0  ;;  %v1782_v17 = vadd.f32 %v1781_v45, %v1780_v33 }
 0x106   : > { %v1783_v47 = vpop.f32.mrf.mxu1 }
 0x107   : > { %v1750_v37 = vpop.f32.mrf.mxu0  ;;  %v1273_v50 = vadd.f32 %v1782_v17, %v1748_v16 }
 0x108   : > { %v1784_v38 = vpop.f32.mrf.mxu1  ;;  %v1751_v0 = vadd.f32 %v1750_v37, %v1749_v36 }
 0x109   : > { %v1752_v27 = vpop.f32.mrf.mxu0  ;;  %v1785_v20 = vadd.f32 %v1784_v38, %v1783_v47 }
 0x10a   : > { %v1786_v48 = vpop.f32.mrf.mxu1 }
 0x10b   : > { %v1753_v49 = vpop.f32.mrf.mxu0  ;;  %v1278_v29 = vadd.f32 %v1785_v20, %v1751_v0 }
 0x10c   : > { %v1787_v51 = vpop.f32.mrf.mxu1 }
 0x10d   : > { %v1805_v35 = vpop.f32.mrf.mxu0 }
 0x10e   : > { %v1839_v52 = vpop.f32.mrf.mxu1 }
 0x10f   : > { %v1806_v39 = vpop.f32.mrf.mxu0 }
 0x110   : > { %v1840_v32 = vpop.f32.mrf.mxu1  ;;  %v1807_v9 = vadd.f32 %v1806_v39, %v1805_v35 }
 0x111   : > { %v1808_v43 = vpop.f32.mrf.mxu0  ;;  %v1841_v18 = vadd.f32 %v1840_v32, %v1839_v52 }
 0x112   : > { %v1842_v41 = vpop.f32.mrf.mxu1  ;;  %v1318_v24 = vadd.f32 %v1807_v9, %v1262_v11 }
 0x113   : > { %v1809_v44 = vpop.f32.mrf.mxu0 }
 0x114   : > { %v1843_v61 = vpop.f32.mrf.mxu1  ;;  %v1810_v15 = vadd.f32 %v1809_v44, %v1808_v43  ;;  %v1374_v14 = vadd.f32 %v1841_v18, %v1318_v24 }
 0x115   : > { %v1811_v46 = vpop.f32.mrf.mxu0  ;;  %v1844_v23 = vadd.f32 %v1843_v61, %v1842_v41 }
 0x116   : > { %v1845_v53 = vpop.f32.mrf.mxu1  ;;  %v1321_v34 = vadd.f32 %v1810_v15, %v1265_v4 }
 0x117   : > { %v1812_v30 = vpop.f32.mrf.mxu0 }
 0x118   : > { %v1846_v55 = vpop.f32.mrf.mxu1  ;;  %v1813_v13 = vadd.f32 %v1812_v30, %v1811_v46  ;;  %v1377_v37 = vadd.f32 %v1844_v23, %v1321_v34 }
 0x119   : > { %v1814_v54 = vpop.f32.mrf.mxu0  ;;  %v1847_v19 = vadd.f32 %v1846_v55, %v1845_v53 }
 0x11a   : > { %v1848_v57 = vpop.f32.mrf.mxu1  ;;  %v1326_v27 = vadd.f32 %v1813_v13, %v1270_v42 }
 0x11b   : > { %v1815_v56 = vpop.f32.mrf.mxu0 }
 0x11c   : > { %v1849_v59 = vpop.f32.mrf.mxu1  ;;  %v1816_v21 = vadd.f32 %v1815_v56, %v1814_v54  ;;  %v1382_v28 = vadd.f32 %v1847_v19, %v1326_v27 }
 0x11d   : > { %v1817_v58 = vpop.f32.mrf.mxu0  ;;  %v1850_v25 = vadd.f32 %v1849_v59, %v1848_v57 }
 0x11e   : > { %v1329_v33 = vadd.f32 %v1816_v21, %v1273_v50 }
 0x11f   : > { %v1818_v60 = vpop.f32.mrf.mxu0  ;;  %v1851_v1 = vpop.f32.mrf.mxu1 }
 0x120   : > { %v1819_v31 = vadd.f32 %v1818_v60, %v1817_v58  ;;  %v1385_v44 = vadd.f32 %v1850_v25, %v1329_v33 }
 0x121   : > { %v1852_v62 = vpop.f32.mrf.mxu1  ;;  %v1820_v63 = vpop.f32.mrf.mxu0 }
 0x122   : > { %v1334_v38 = vadd.f32 %v1819_v31, %v1278_v29  ;;  %v1853_v52 = vadd.f32 %v1852_v62, %v1851_v1 }
 0x123   : > { %v1854_v5 = vpop.f32.mrf.mxu1  ;;  %v1821_v6 = vpop.f32.mrf.mxu0 }
 0x124   : > { %v1390_v58 = vadd.f32 %v1853_v52, %v1334_v38 }
 0x125   : > { %v1855_v10 = vpop.f32.mrf.mxu1 }
 0x12d   : > { %v1429_v48 = vpop.f32.mrf.mxu0 }
 0x12e   : > { %v1430_v26 = vadd.f32 %v1429_v48, %v1374_v14 }
 0x12f   : > { %v1437_v45 = vpop.f32.mrf.mxu1  ;;  %v1886_v49 = vpop.f32.mrf.mxu0 }
 0x130   : > { %v1458_v47 = vadd.f32 %v1691_v22, %v1430_v26  ;;  %v1438_v36 = vadd.f32 %v1437_v45, %v1382_v28 }
 0x131   : > { %v1890_v51 = vpop.f32.mrf.mxu1  ;;  %v1432_v35 = vpop.f32.mrf.mxu0 }
 0x132   : > { %v1468_v39 = vmin.f32 %v1458_v47, 0.0  ;;  %v1460_v32 = vadd.f32 %v1691_v22, %v1438_v36  ;;  %v1433_v43 = vadd.f32 %v1432_v35, %v1377_v37  ;;  %vm1463_vm5 = vcmp.gt.f32.partialorder %v1458_v47, 0.0 }
 0x133   : > { %v1440_v46 = vpop.f32.mrf.mxu1  ;;  %v1887_v41 = vpop.f32.mrf.mxu0 }
 0x134   : > { %v1473_v61 = vmul.f32 1.442695, %v1468_v39  ;;  %v1470_v30 = vmin.f32 %v1460_v32, 0.0  ;;  %v1459_v53 = vadd.f32 %v1691_v22, %v1433_v43  ;;  %v1441_v54 = vadd.f32 %v1440_v46, %v1385_v44 }
 0x135   : > { %v1891_v55 = vpop.f32.mrf.mxu1  ;;  %vm1465_vm10 = vcmp.gt.f32.partialorder %v1460_v32, 0.0 }
 0x136   : > { %2030 = vpow2.f32 %v1473_v61  ;;  %v1477_v56 = vmul.f32 1.442695, %v1470_v30  ;;  %v1469_v57 = vmin.f32 %v1459_v53, 0.0  ;;  %v1461_v59 = vadd.f32 %v1691_v22, %v1441_v54 }
 0x137   : > { %v1445_v60 = vpop.f32.mrf.mxu1  ;;  %vm1464_vm9 = vcmp.gt.f32.partialorder %v1459_v53, 0.0 }
 0x138   : > { %2032 = vpow2.f32 %v1477_v56  ;;  %v1475_v63 = vmul.f32 1.442695, %v1469_v57  ;;  %v1446_v1 = vadd.f32 %v1445_v60, %v1390_v58  ;;  %v1471_v62 = vmin.f32 %v1461_v59, 0.0 }
 0x139   : > { %v1894_v2 = vpop.f32.mrf.mxu1  ;;  %vm1466_vm7 = vcmp.gt.f32.partialorder %v1461_v59, 0.0 }
 0x13a   : > { %2034 = vpow2.f32 %v1475_v63  ;;  %v1462_v3 = vadd.f32 %v1691_v22, %v1446_v1  ;;  %v1479_v5 = vmul.f32 1.442695, %v1471_v62 }
 0x13b   : > { %v1448_v6 = vpop.f32.mrf.mxu1 }
 0x13c   : > { %v1472_v7 = vmin.f32 %v1462_v3, 0.0  ;;  %2036 = vpow2.f32 %v1479_v5  ;;  %vm1467_vm1 = vcmp.gt.f32.partialorder %v1462_v3, 0.0 }
 0x13d   : > { %v1895_v8 = vpop.f32.mrf.mxu1 }
 0x13e   : > { %v1481_v9 = vmul.f32 1.442695, %v1472_v7 }
 0x140   : > { %2038 = vpow2.f32 %v1481_v9 }
 0x143   : > { %v2031_v10 = vpop.eup %2030 }
 0x144   : > { %v1692_v11 = vadd.f32 -1.0, %v2031_v10 }
 0x145   : > { %v2033_v40 = vpop.eup %2032 }
 0x146   : > { %v1488_v12 = vmul.f32 1.6732632, %v1692_v11  ;;  %v1694_v13 = vadd.f32 -1.0, %v2033_v40 }
 0x147   : > { %v2035_v42 = vpop.eup %2034 }
 0x148   : > { %v1693_v24 = vadd.f32 -1.0, %v2035_v42  ;;  %v1490_v15 = vmul.f32 1.6732632, %v1694_v13  ;;  %v1493_v17 = vsel %vm1463_vm5, %v1458_v47, %v1488_v12 }
 0x149   : > { %v2037_v16 = vpop.eup %2036  ;;  %v1498_v20 = vmul.f32 1.050701, %v1493_v17 }
 0x14a   : > { %v1489_v4 = vmul.f32 1.6732632, %v1693_v24  ;;  %v1695_v18 = vadd.f32 -1.0, %v2037_v16  ;;  %v1495_v0 = vsel %vm1465_vm10, %v1460_v32, %v1490_v15 }
 0x14b   : > { %v1500_v48 = vmul.f32 1.050701, %v1495_v0 }
 0x14c   : > { %v1494_v27 = vsel %vm1464_vm9, %v1459_v53, %v1489_v4  ;;  %v1491_v34 = vmul.f32 1.6732632, %v1695_v18 }
 0x14d   : > { %v2039_v19 = vpop.eup %2038  ;;  %v1499_v21 = vmul.f32 1.050701, %v1494_v27 }
 0x14e   : > { %v1696_v14 = vadd.f32 -1.0, %v2039_v19  ;;  %v1496_v31 = vsel %vm1466_vm7, %v1461_v59, %v1491_v34 }
 0x14f   : > { %v1713_v50 = vpack.c.bf16 %v1499_v21, %v1498_v20  ;;  %v1501_v22 = vmul.f32 1.050701, %v1496_v31 }
 0x150   : > { %v1492_v23 = vmul.f32 1.6732632, %v1696_v14 }
 0x151   : > { %1714 = vst [vmem:[%s170_s17] sm:$0xff] %v1713_v50   ;;  %v1718_v26 = vpack.c.bf16 %v1501_v22, %v1500_v48 }
 0x152   : > { %v1497_v28 = vsel %vm1467_vm1, %v1462_v3, %v1492_v23 }
 0x153   : > { %v1502_v29 = vmul.f32 1.050701, %v1497_v28  ;;  %1720 = vst [vmem:[%s170_s17 + $0x8] sm:$0xff] %v1718_v26  }
 0x155   : > { %v1709_v33 = vpack.c.bf16 %v1502_v29, %v1502_v29 }
 0x157   : > { %1528 = vst [vmem:[%s170_s17 + $0x10] sm:$0xf] %v1709_v33 }
 0x158 PF: > { %s13_s12 = sadd.s32 1, %s2046_s12  }
 0x159   : > { %p10_p4 = scmp.ge.s32.totalorder %s13_s12, 4  }
 0x15b   :  { %12 = sbr.rel (!%p10_p4) target bundleno = 1 (0x1), region = 62 }

// kernel: _forward_impl.5
= control target key start
LH: loop header
LB: loop body
LE: loop exit
PB: predicated region body
PF: predicated region fallthrough
CT: control target
= control target key end

     0   :  { %s2108_s12 = smov 0   ;;  %s3065_s0 = inlined_call_operand.vmem [shape: bf16[2,80,64], index: 0, kind: input, shape index: {}]   ;;  %s3066_s1 = inlined_call_operand.vmem [shape: bf16[576,128], index: 1, kind: input, shape index: {}]   ;;  %s3067_s2 = inlined_call_operand.vmem [shape: f32[1,128], index: 2, kind: input, shape index: {}]   ;;  %s3068_s3 = inlined_call_operand.vmem [shape: f32[2,88,128], index: 3, kind: output, shape index: {}]  }
   0x1 LB: > { %s1741_s13 = sadd.s32 4294967295, %s2084_s12   ;;  %p1745_p0 = scmp.ge.s32.totalorder %s2084_s12, 1  ;;  %s2084_s12 = sphi %s2108_s12, %s13_s12  }
   0x2   : > { %p137_p1 = scmp.lt.s32.totalorder %s2084_s12, 3 }
   0x4   : > { %p138_p2 = pnand %p1745_p0, %p137_p1 }
   0x5   : > { %p161_p3 = scmp.lt.s32.totalorder (!%p138_p2), %s1741_s13, 1  ;;  %s2087_s24 = smov (!%p138_p2), 64  }
   0x6   : > { %141 = sbr.rel (%p138_p2) target bundleno = 477 (0x1dd), region = 32 }
   0xb   : > { %v1988_v0 = vld [vmem:[%s3066_s1 + $0xf8] sm:$0xff]   ;;  %s3084_s13 = smov (!%p161_p3, %s1741_s13), 1  ;;  %vm174_vm0 = vcmask 519168   ;;  %vm572_vm1 = vsmask.f32 2304  ;;  %v2086_v2 = vmov 0  }
   0xc   : > { %1886 = vmatprep.subr.bf16.mxu1 %v1988_v0  ;;  %v1989_v1 = vld [vmem:[%s3066_s1 + $0xb8] sm:$0xff]   ;;  %vm573_vm2 = vsmask.f32 6416  ;;  %s1976_s18 = smul.u32 40, %s3084_s13  ;;  %vm733_vm3 = vsmask.f32 3328 }
   0xd   : > { %1887 = vmatpush3.bf16.msra.mxu1 %v1989_v1  ;;  %vm734_vm4 = vsmask.f32 7440  ;;  %173 = vst [vmem:[#allocation2 + $0x8] sm:$0xff] %v2086_v2  ;;  %175 = vst.msk [vmem:[#allocation2 + $0x10] sm:$0xf] %vm174_vm0, %v2086_v2  ;;  %v1990_v3 = vld [vmem:[%s3066_s1 + $0x78] sm:$0xff]  }
   0xe   : > { %178 = vst.msk [vmem:[#allocation2 + $0xd8] sm:$0xf] %vm174_vm0, %v2086_v2  ;;  %172 = vst [vmem:[#allocation2] sm:$0xff] %v2086_v2  ;;  %s2130_s21 = scalar_lea.vmem %s3065_s0, %s1976_s18  ;;  %vm199_vm5 = vsmask.f32 256  ;;  %1834 = vmatprep.subr.bf16.mxu0 %v1990_v3  ;;  %v1991_v40 = vld [vmem:[%s3066_s1 + $0xf0] sm:$0xff]  }
   0xf   : > { %176 = vst [vmem:[#allocation2 + $0xc8] sm:$0xff] %v2086_v2  ;;  %177 = vst [vmem:[#allocation2 + $0xd0] sm:$0xff] %v2086_v2  ;;  %v2136_v4 = vld [vmem:[%s2130_s21] sm:$0xf]  ;;  %v2139_v5 = vld [vmem:[%s2130_s21 + $0x4] sm:$0xf]  ;;  %1888 = vmatprep.subr.bf16.mxu1 %v1991_v40 }
  0x10   : > { %vm200_vm6 = vsmask.f32 4368  ;;  %v2142_v6 = vld [vmem:[%s2130_s21 + $0x8] sm:$0xf]  ;;  %v2145_v7 = vshll.u32 %v2136_v4, 16  ;;  %v2150_v8 = vshrl.u32 %v2136_v4, 16  ;;  %vm2244_vm9 = vmor %vm572_vm1, %vm573_vm2 }
  0x11   : > { %837 = vst.msk [vmem:[#allocation2 + $0x24] sm:$0xf] %vm174_vm0, %v2136_v4  ;;  %v2153_v9 = vshrl.u32 %v2139_v5, 16  ;;  %v2156_v10 = vshll.u32 %v2139_v5, 16  ;;  %838 = vst.msk [vmem:[#allocation2 + $0x38] sm:$0xf] %vm174_vm0, %v2139_v5 }
  0x12   : > { %190 = vst.msk [vmem:[#allocation2 + $0x14] sm:$0xf] %vm174_vm0, %v2139_v5  ;;  %vm411_vm7 = vsmask.f32 1280  ;;  %839 = vst.msk [vmem:[#allocation2 + $0x4c] sm:$0xf] %vm174_vm0, %v2142_v6 }
  0x13   : > { %191 = vst.msk [vmem:[#allocation2 + $0x28] sm:$0xf] %vm174_vm0, %v2142_v6  ;;  %v2167_v11 = vld [vmem:[%s2130_s21 + $0xc] sm:$0xf]  ;;  %189 = vst.msk [vmem:[#allocation2] sm:$0xf] %vm174_vm0, %v2136_v4 }
  0x14   : > { %vm412_vm8 = vsmask.f32 5392  ;;  %v2172_v12 = vshrl.u32 %v2142_v6, 16  ;;  %v2175_v13 = vshll.u32 %v2142_v6, 16  ;;  %192 = vst.msk [vmem:[#allocation2 + $0x3c] sm:$0xf] %vm174_vm0, %v2167_v11  ;;  %vm2265_vm10 = vmor %vm733_vm3, %vm734_vm4 }
  0x15   : > { %840 = vst.msk [vmem:[#allocation2 + $0x60] sm:$0xf] %vm174_vm0, %v2167_v11  ;;  %v2182_v14 = vld [vmem:[%s2130_s21 + $0x10] sm:$0xf]  ;;  %v736_v15 = vrot.slane %v2145_v7, 5  ;;  %v737_v16 = vrot.slane %v2150_v8, 4  ;;  %vm2288_vm11 = vmor %vm199_vm5, %vm200_vm6 }
  0x16   : > { %v414_v17 = vrot.slane %v2150_v8, 6  ;;  %v415_v18 = vrot.slane %v2145_v7, 7  ;;  %193 = vst.msk [vmem:[#allocation2 + $0x50] sm:$0xf] %vm174_vm0, %v2182_v14  ;;  %841 = vst.msk [vmem:[#allocation2 + $0x74] sm:$0xf] %vm174_vm0, %v2182_v14 }
  0x17   : > { %v2193_v19 = vld [vmem:[%s2130_s21 + $0x14] sm:$0xf]  ;;  %v575_v20 = vrot.slane %v2150_v8, 5  ;;  %v576_v21 = vrot.slane %v2145_v7, 6  ;;  %v579_v22 = vrot.slane %v2153_v9, 5  ;;  %v580_v23 = vrot.slane %v2156_v10, 6  ;;  %785 = vrot.lane.b32.xlu0 %v736_v15, %s2087_s24  ;;  %vm2303_vm12 = vmor %vm411_vm7, %vm412_vm8 }
  0x18   : > { %842 = vst.msk [vmem:[#allocation2 + $0x88] sm:$0xf] %vm174_vm0, %v2193_v19  ;;  %194 = vst.msk [vmem:[#allocation2 + $0x64] sm:$0xf] %vm174_vm0, %v2193_v19  ;;  %v2204_v24 = vld [vmem:[%s2130_s21 + $0x18] sm:$0xf]  ;;  %v738_v25 = vor.u32 %v737_v16, %v736_v15  ;;  %v2207_v26 = vor.u32 %v415_v18, %v414_v17 }
  0x19   : > { %v205_v27 = vrot.slane %v2150_v8, 7  ;;  %v2211_v28 = vshrl.u32 %v2167_v11, 16  ;;  %843 = vst.msk [vmem:[#allocation2 + $0x9c] sm:$0xf] %vm174_vm0, %v2204_v24  ;;  %195 = vst.msk [vmem:[#allocation2 + $0x78] sm:$0xf] %vm174_vm0, %v2204_v24  ;;  %v577_v31 = vor.u32 %v576_v21, %v575_v20  ;;  %v2223_v32 = vor.u32 %v580_v23, %v579_v22 }
  0x1a   : > { %v2218_v29 = vld [vmem:[%s2130_s21 + $0x1c] sm:$0xf]  ;;  %v2221_v30 = vld [vmem:[%s2130_s21 + $0x20] sm:$0xf]  ;;  %v213_v33 = vrot.slane %v2153_v9, 7  ;;  %v2227_v34 = vshll.u32 %v2167_v11, 16  ;;  %463 = vrot.lane.b32.xlu1 %v2207_v26, %s2087_s24 }
  0x1b   : > { %196 = vst.msk [vmem:[#allocation2 + $0x8c] sm:$0xf] %vm174_vm0, %v2218_v29  ;;  %844 = vst.msk [vmem:[#allocation2 + $0xb0] sm:$0xf] %vm174_vm0, %v2218_v29  ;;  %v2238_v35 = vld [vmem:[%s2130_s21 + $0x24] sm:$0xf]  ;;  %624 = vrot.lane.b32.xlu0 %v577_v31, %s2087_s24  ;;  %v208_v45 = vor.u32 %v2145_v7, %v205_v27 }
  0x1c   : > { %197 = vst.msk [vmem:[#allocation2 + $0xa0] sm:$0xf] %vm174_vm0, %v2221_v30  ;;  %845 = vst.msk [vmem:[#allocation2 + $0xc4] sm:$0xf] %vm174_vm0, %v2221_v30  ;;  %v739_v36 = vrot.slane %v738_v25, 4  ;;  %v740_v38 = vrot.slane %v2156_v10, 5  ;;  %v216_v52 = vor.u32 %v2156_v10, %v213_v33 }
  0x1d   : > { %v418_v39 = vrot.slane %v2153_v9, 6  ;;  %198 = vst.msk [vmem:[#allocation2 + $0xb4] sm:$0xf] %vm174_vm0, %v2238_v35  ;;  %846 = vst.msk [vmem:[#allocation2 + $0xd8] sm:$0xf] %vm174_vm0, %v2238_v35  ;;  %v578_v41 = vrot.slane %v577_v31, 4 }
  0x1e   : > { %v209_v42 = vrot.slane %v205_v27, 4  ;;  %v419_v43 = vrot.slane %v2156_v10, 7  ;;  %v1992_v44 = vld [vmem:[%s3066_s1 + $0x38] sm:$0xff]   ;;  %v584_v47 = vrot.slane %v2172_v12, 5  ;;  %v585_v48 = vrot.slane %v2175_v13, 6  ;;  %v1993_v50 = vld [vmem:[%s3066_s1 + $0xb0] sm:$0xff]  }
  0x1f   : > { %v589_v49 = vrot.slane %v2211_v28, 5  ;;  %v582_v51 = vsel %vm2244_vm9, %v578_v41, %v2223_v32  ;;  %v590_v53 = vrot.slane %v2227_v34, 6  ;;  %1835 = vmatpush3.bf16.msra.mxu0 %v1992_v44  ;;  %v1994_v54 = vld [vmem:[%s3066_s1 + $0x70] sm:$0xff]   ;;  %v742_v57 = vrot.slane %v2153_v9, 4  ;;  %1889 = vmatpush3.bf16.msra.mxu1 %v1993_v50  ;;  %v1995_v60 = vld [vmem:[%s3066_s1 + $0xe8] sm:$0xff]   ;;  %s1977_s19 = smul.u32 88, %s3084_s13 }
  0x20   : > { %626 = vrot.lane.b32.xlu1 %v582_v51, %s2087_s24  ;;  %v586_v56 = vor.u32 %v585_v48, %v584_v47  ;;  %v745_v58 = vrot.slane %v2175_v13, 5  ;;  %v747_v59 = vrot.slane %v2172_v12, 4  ;;  %v417_v61 = vrot.slane %v2207_v26, 4  ;;  %1836 = vmatprep.subr.bf16.mxu0 %v1994_v54  ;;  %v1996_v3 = vld [vmem:[%s3066_s1 + $0x30] sm:$0xff]   ;;  %v1997_v21 = vld [vmem:[%s3066_s1 + $0xa8] sm:$0xff]   ;;  %v2001_v51 = vld [vmem:[%s3066_s1 + $0xa0] sm:$0xff]  }
  0x21   : > { %v741_v62 = vsel %vm2265_vm10, %v739_v36, %v740_v38  ;;  %v2307_v0 = vor.u32 %v419_v43, %v418_v39  ;;  %291 = vrot.lane.b32.xlu0 %v208_v45, %s2087_s24  ;;  %v743_v1 = vor.u32 %v742_v57, %v740_v38  ;;  %1890 = vmatprep.subr.bf16.mxu1 %v1995_v60  ;;  %v583_v8 = vrot.slane %v2223_v32, 4  ;;  %v1999_v36 = vld [vmem:[%s3066_s1 + $0xe0] sm:$0xff]   ;;  %v2000_v38 = vld [vmem:[%s3066_s1 + $0x28] sm:$0xff]   ;;  %s3028_s13 = scalar_lea.vmem %s3068_s3, %s1977_s19 }
  0x22   : > { %v748_v2 = vor.u32 %v747_v59, %v745_v58  ;;  %v217_v7 = vsel %vm2288_vm11, %v209_v42, %v216_v52  ;;  %v588_v10 = vrot.slane %v586_v56, 4  ;;  %v750_v15 = vrot.slane %v2227_v34, 5 }
  0x23   : > { %v2318_v16 = vor.u32 %v590_v53, %v589_v49  ;;  %v222_v17 = vrot.slane %v2172_v12, 7  ;;  %v423_v18 = vrot.slane %v2172_v12, 6  ;;  %v424_v20 = vrot.slane %v2175_v13, 7  ;;  %1837 = vmatpush3.bf16.msra.mxu0 %v1996_v3  ;;  %1891 = vmatpush3.bf16.msra.mxu1 %v1997_v21  ;;  %v1998_v12 = vld [vmem:[%s3066_s1 + $0x68] sm:$0xff]   ;;  %v2006_v21 = vld [vmem:[%s3066_s1 + $0x58] sm:$0xff]  }
  0x24   : > { %787 = vrot.lane.b32.xlu1 %v741_v62, %s2087_s24  ;;  %v421_v22 = vsel %vm2303_vm12, %v417_v61, %v2307_v0  ;;  %v744_v23 = vrot.slane %v743_v1, 4  ;;  %v231_v25 = vrot.slane %v2211_v28, 7  ;;  %v749_v26 = vrot.slane %v748_v2, 4  ;;  %1838 = vmatprep.subr.bf16.mxu0 %v1998_v12  ;;  %v2003_v62 = vld [vmem:[%s3066_s1 + $0xd8] sm:$0xff]   ;;  %v2007_v12 = vld [vmem:[%s3066_s1 + $0xd0] sm:$0xff]  }
  0x25   : > { %293 = vrot.lane.b32.xlu0 %v217_v7, %s2087_s24  ;;  %v587_v27 = vsel %vm2244_vm9, %v583_v8, %v586_v56  ;;  %v2337_v31 = vshrl.u32 %v2182_v14, 16  ;;  %v2340_v32 = vshll.u32 %v2182_v14, 16  ;;  %v592_v39 = vsel %vm2244_vm9, %v588_v10, %v2318_v16  ;;  %1892 = vmatprep.subr.bf16.mxu1 %v1999_v36  ;;  %v2005_v7 = vld [vmem:[%s3066_s1 + $0x98] sm:$0xff]  }
  0x26   : > { %v425_v40 = vor.u32 %v424_v20, %v423_v18  ;;  %v428_v41 = vrot.slane %v2211_v28, 6  ;;  %v429_v42 = vrot.slane %v2227_v34, 7  ;;  %v2357_v45 = vshrl.u32 %v2193_v19, 16 }
  0x27   : > { %v594_v43 = vrot.slane %v2337_v31, 5  ;;  %v595_v44 = vrot.slane %v2340_v32, 6  ;;  %v2360_v47 = vshll.u32 %v2193_v19, 16  ;;  %1839 = vmatpush3.bf16.msra.mxu0 %v2000_v38  ;;  %v752_v48 = vrot.slane %v2211_v28, 4  ;;  %v2002_v28 = vld [vmem:[%s3066_s1 + $0x60] sm:$0xff]   ;;  %1893 = vmatpush3.bf16.msra.mxu1 %v2001_v51 }
  0x28   : > { %465 = vrot.lane.b32.xlu1 %v421_v22, %s2087_s24  ;;  %v755_v49 = vrot.slane %v2340_v32, 5  ;;  %v757_v50 = vrot.slane %v2337_v31, 4  ;;  %v746_v52 = vsel %vm2265_vm10, %v744_v23, %v745_v58  ;;  %v218_v53 = vrot.slane %v213_v33, 4  ;;  %1840 = vmatprep.subr.bf16.mxu0 %v2002_v28 }
  0x29   : > { %628 = vrot.lane.b32.xlu0 %v587_v27, %s2087_s24  ;;  %v225_v54 = vor.u32 %v2175_v13, %v222_v17  ;;  %v422_v56 = vrot.slane %v2307_v0, 4  ;;  %v751_v57 = vsel %vm2265_vm10, %v749_v26, %v750_v15  ;;  %v227_v59 = vrot.slane %v222_v17, 4  ;;  %v2004_v0 = vld [vmem:[%s3066_s1 + $0x20] sm:$0xff]   ;;  %1894 = vmatprep.subr.bf16.mxu1 %v2003_v62 }
  0x2a   : > { %v234_v60 = vor.u32 %v2227_v34, %v231_v25  ;;  %v2382_v58 = vor.u32 %v595_v44, %v594_v43  ;;  %v427_v9 = vrot.slane %v425_v40, 4  ;;  %v2384_v33 = vor.u32 %v429_v42, %v428_v41  ;;  %v2009_v44 = vld [vmem:[%s3066_s1 + $0x90] sm:$0xff]  }
  0x2b   : > { %v593_v13 = vrot.slane %v2318_v16, 4  ;;  %v2387_v61 = vor.u32 %v752_v48, %v750_v15  ;;  %v599_v34 = vrot.slane %v2357_v45, 5  ;;  %v600_v1 = vrot.slane %v2360_v47, 6  ;;  %1841 = vmatpush3.bf16.msra.mxu0 %v2004_v0  ;;  %1895 = vmatpush3.bf16.msra.mxu1 %v2005_v7 }
  0x2c   : > { %630 = vrot.lane.b32.xlu1 %v592_v39, %s2087_s24  ;;  %v2400_v2 = vor.u32 %v757_v50, %v755_v49  ;;  %v760_v3 = vrot.slane %v2360_v47, 5  ;;  %v226_v8 = vsel %vm2288_vm11, %v218_v53, %v225_v54  ;;  %v2408_v10 = vrot.slane %v231_v25, 4  ;;  %1842 = vmatprep.subr.bf16.mxu0 %v2006_v21  ;;  %v2008_v39 = vld [vmem:[%s3066_s1 + $0x18] sm:$0xff]   ;;  %v2010_v53 = vld [vmem:[%s3066_s1 + $0x50] sm:$0xff]  }
  0x2d   : > { %789 = vrot.lane.b32.xlu0 %v746_v52, %s2087_s24  ;;  %v433_v15 = vrot.slane %v2337_v31, 6  ;;  %v235_v16 = vsel %vm2288_vm11, %v227_v59, %v234_v60  ;;  %v598_v17 = vrot.slane %v2382_v58, 4  ;;  %v240_v18 = vrot.slane %v2337_v31, 7  ;;  %1896 = vmatprep.subr.bf16.mxu1 %v2007_v12  ;;  %v2011_v59 = vld [vmem:[%s3066_s1 + $0xc8] sm:$0xff]  }
  0x2e   : > { %v434_v20 = vrot.slane %v2340_v32, 7  ;;  %v426_v22 = vsel %vm2303_vm12, %v422_v56, %v425_v40  ;;  %v754_v23 = vrot.slane %v2387_v61, 4  ;;  %v249_v25 = vrot.slane %v2357_v45, 7 }
  0x2f   : > { %v2425_v26 = vshrl.u32 %v2204_v24, 16  ;;  %v431_v27 = vsel %vm2303_vm12, %v427_v9, %v2384_v33  ;;  %v759_v31 = vrot.slane %v2400_v2, 4  ;;  %v2435_v36 = vrot.slane %v240_v18, 4  ;;  %1843 = vmatpush3.bf16.msra.mxu0 %v2008_v39  ;;  %1897 = vmatpush3.bf16.msra.mxu1 %v2009_v44 }
  0x30   : > { %791 = vrot.lane.b32.xlu1 %v751_v57, %s2087_s24  ;;  %v2438_v38 = vshll.u32 %v2204_v24, 16  ;;  %v2443_v40 = vor.u32 %v434_v20, %v433_v15  ;;  %v2447_v42 = vshrl.u32 %v2218_v29, 16  ;;  %v762_v43 = vrot.slane %v2357_v45, 4  ;;  %1844 = vmatprep.subr.bf16.mxu0 %v2010_v53 }
  0x31   : > { %295 = vrot.lane.b32.xlu0 %v226_v8, %s2087_s24  ;;  %v604_v41 = vrot.slane %v2425_v26, 5  ;;  %v2454_v48 = vor.u32 %v600_v1, %v599_v34  ;;  %v432_v50 = vrot.slane %v2384_v33, 4  ;;  %v2459_v52 = vshll.u32 %v2218_v29, 16  ;;  %1898 = vmatprep.subr.bf16.mxu1 %v2011_v59 }
  0x32   : > { %v605_v51 = vrot.slane %v2438_v38, 6  ;;  %v438_v54 = vrot.slane %v2357_v45, 6  ;;  %v2467_v56 = vor.u32 %v762_v43, %v760_v3  ;;  %v765_v28 = vrot.slane %v2438_v38, 5 }
  0x33   : > { %v767_v57 = vrot.slane %v2425_v26, 4  ;;  %v439_v60 = vrot.slane %v2360_v47, 7  ;;  %v603_v9 = vrot.slane %v2454_v48, 4  ;;  %v597_v33 = vsel %vm2244_vm9, %v593_v13, %v2382_v58  ;;  %v2012_v58 = vld [vmem:[%s3066_s1 + $0x10] sm:$0xff]  }
  0x34   : > { %297 = vrot.lane.b32.xlu1 %v235_v16, %s2087_s24  ;;  %v2477_v45 = vor.u32 %v605_v51, %v604_v41  ;;  %v243_v61 = vor.u32 %v2340_v32, %v240_v18  ;;  %v437_v62 = vrot.slane %v2443_v40, 4  ;;  %v609_v0 = vrot.slane %v2447_v42, 5  ;;  %1845 = vmatpush3.bf16.msra.mxu0 %v2012_v58  ;;  %v2014_v32 = vld [vmem:[%s3066_s1 + $0x48] sm:$0xff]  }
  0x35   : > { %467 = vrot.lane.b32.xlu0 %v426_v22, %s2087_s24  ;;  %v2487_v34 = vor.u32 %v2360_v47, %v249_v25  ;;  %v610_v1 = vrot.slane %v2459_v52, 6  ;;  %v770_v2 = vrot.slane %v2459_v52, 5  ;;  %v2491_v7 = vrot.slane %v249_v25, 4  ;;  %1846 = vmatprep.subr.bf16.mxu0 %v2014_v32 }
  0x36   : > { %v602_v13 = vsel %vm2244_vm9, %v598_v17, %v2454_v48  ;;  %v764_v8 = vrot.slane %v2467_v56, 4  ;;  %v2502_v15 = vor.u32 %v767_v57, %v765_v28  ;;  %v258_v16 = vrot.slane %v2425_v26, 7  ;;  %v2016_v48 = vld [vmem:[%s3066_s1 + $0x8] sm:$0xff]   ;;  %v2623_v56 = vld [vmem:[%s3066_s1 + $0x118] sm:$0xff]  }
  0x37   : > { %v2506_v18 = vor.u32 %v439_v60, %v438_v54  ;;  %v608_v20 = vrot.slane %v2477_v45, 4  ;;  %v267_v21 = vrot.slane %v2447_v42, 7  ;;  %v756_v17 = vsel %vm2265_vm10, %v754_v23, %v755_v49 }
  0x38   : > { %469 = vrot.lane.b32.xlu1 %v431_v27, %s2087_s24  ;;  %v761_v22 = vsel %vm2265_vm10, %v759_v31, %v760_v3  ;;  %v443_v25 = vrot.slane %v2425_v26, 6  ;;  %v444_v12 = vrot.slane %v2438_v38, 7  ;;  %v2013_v27 = vld [vmem:[%s3066_s1 + $0x88] sm:$0xff]   ;;  %v244_v47 = vsel %vm2288_vm11, %v2408_v10, %v243_v61  ;;  %1847 = vmatpush3.bf16.msra.mxu0 %v2016_v48 }
  0x39   : > { %632 = vrot.lane.b32.xlu0 %v597_v33, %s2087_s24  ;;  %v253_v49 = vsel %vm2288_vm11, %v2435_v36, %v2487_v34  ;;  %v2535_v3 = vshrl.u32 %v2221_v30, 16  ;;  %v2538_v23 = vshll.u32 %v2221_v30, 16  ;;  %v436_v26 = vsel %vm2303_vm12, %v432_v50, %v2443_v40  ;;  %1899 = vmatpush3.bf16.msra.mxu1 %v2013_v27  ;;  %v2015_v36 = vld [vmem:[%s3066_s1 + $0xc0] sm:$0xff]  }
  0x3a   : > { %v769_v31 = vrot.slane %v2502_v15, 4  ;;  %v2545_v39 = vshrl.u32 %v2238_v35, 16  ;;  %v2548_v10 = vshll.u32 %v2238_v35, 16  ;;  %v441_v40 = vsel %vm2303_vm12, %v437_v62, %v2506_v18  ;;  %1900 = vmatprep.subr.bf16.mxu1 %v2015_v36 }
  0x3b   : > { %v448_v41 = vrot.slane %v2447_v42, 6  ;;  %v614_v43 = vrot.slane %v2535_v3, 5  ;;  %v615_v44 = vrot.slane %v2538_v23, 6  ;;  %v445_v50 = vor.u32 %v444_v12, %v443_v25  ;;  %v2022_v12 = vld [vmem:[%s3066_s1] sm:$0xff]  }
  0x3c   : > { %634 = vrot.lane.b32.xlu1 %v602_v13, %s2087_s24  ;;  %v449_v51 = vrot.slane %v2459_v52, 7  ;;  %v772_v53 = vrot.slane %v2447_v42, 4  ;;  %v775_v54 = vrot.slane %v2538_v23, 5  ;;  %vm720_vm13 = vcmask 519171   ;;  %v2017_v13 = vld [vmem:[%s3066_s1 + $0x80] sm:$0xff]  }
  0x3d   : > { %793 = vrot.lane.b32.xlu0 %v756_v17, %s2087_s24  ;;  %vm398_vm14 = vcmask 519169   ;;  %v607_v57 = vsel %vm2244_vm9, %v603_v9, %v2477_v45  ;;  %v611_v59 = vor.u32 %v610_v1, %v609_v0  ;;  %v2570_v60 = vrot.slane %v258_v16, 4  ;;  %v2021_v9 = vld [vmem:[%s3066_s1 + $0x40] sm:$0xff]   ;;  %1901 = vmatpush3.bf16.msra.mxu1 %v2017_v13 }
  0x3e   : > { %v777_v33 = vrot.slane %v2535_v3, 4  ;;  %v2574_v61 = vor.u32 %v2438_v38, %v258_v16  ;;  %v616_v62 = vor.u32 %v615_v44, %v614_v43  ;;  %v619_v34 = vrot.slane %v2545_v39, 5  ;;  %1848 = vmatprep.subr.bf16.mxu0 %v2021_v9  ;;  %1968 = vmatprep.subr.bf16.mxu1 %v2623_v56 }
  0x3f   : > { %v620_v58 = vrot.slane %v2548_v10, 6  ;;  %v2588_v45 = vor.u32 %v2459_v52, %v267_v21  ;;  %v773_v0 = vor.u32 %v772_v53, %v770_v2  ;;  %v780_v1 = vrot.slane %v2548_v10, 5  ;;  %1849 = vmatpush3.bf16.msra.mxu0 %v2022_v12 }
  0x40   : > { %795 = vrot.lane.b32.xlu1 %v761_v22, %s2087_s24  ;;  %v782_v15 = vrot.slane %v2545_v39, 4  ;;  %v442_v16 = vrot.slane %v2506_v18, 4  ;;  %v447_v17 = vrot.slane %v445_v50, 4  ;;  %v2595_v22 = vor.u32 %v449_v51, %v448_v41  ;;  %1948 = vmatprep.subr.bf16.mxu0 %v2623_v56 }
  0x41   : > { %299 = vrot.lane.b32.xlu0 %v244_v47, %s2087_s24  ;;  %v778_v25 = vor.u32 %v777_v33, %v775_v54  ;;  %v612_v27 = vsel %vm2244_vm9, %v608_v20, %v611_v59  ;;  %v766_v18 = vsel %vm2265_vm10, %v764_v8, %v765_v28  ;;  %v771_v32 = vsel %vm2265_vm10, %v769_v31, %v770_v2 }
  0x42   : > { %v613_v47 = vrot.slane %v611_v59, 4  ;;  %v618_v36 = vrot.slane %v616_v62, 4  ;;  %v2617_v20 = vor.u32 %v620_v58, %v619_v34  ;;  %v276_v38 = vrot.slane %v2535_v3, 7 }
  0x43   : > { %v271_v52 = vsel %vm2288_vm11, %v2570_v60, %v2588_v45  ;;  %v774_v28 = vrot.slane %v773_v0, 4  ;;  %v2630_v2 = vor.u32 %v782_v15, %v780_v1  ;;  %v285_v8 = vrot.slane %v2545_v39, 7 }
  0x44   : > { %301 = vrot.lane.b32.xlu1 %v253_v49, %s2087_s24  ;;  %v262_v49 = vsel %vm2288_vm11, %v2491_v7, %v2574_v61  ;;  %v2635_v31 = vsel %vm2303_vm12, %v442_v16, %v445_v50  ;;  %v2640_v41 = vsel %vm2303_vm12, %v447_v17, %v2595_v22  ;;  %v2644_v43 = vrot.slane %v267_v21, 4 }
  0x45   : > { %471 = vrot.lane.b32.xlu0 %v436_v26, %s2087_s24  ;;  %v779_v26 = vrot.slane %v778_v25, 4  ;;  %v2651_v44 = vsel %vm2244_vm9, %v613_v47, %v616_v62  ;;  %v623_v48 = vrot.slane %v2617_v20, 4  ;;  %v680_v50 = vrot.slane %v2136_v4, 5 }
  0x46   : > { %v358_v51 = vrot.slane %v2136_v4, 7  ;;  %v2659_v42 = vsel %vm2244_vm9, %v618_v36, %v2617_v20  ;;  %v2662_v21 = vor.u32 %v2538_v23, %v276_v38  ;;  %v2664_v53 = vrot.slane %v276_v38, 4 }
  0x47   : > { %v2670_v59 = vsel %vm2265_vm10, %v774_v28, %v775_v54  ;;  %v784_v33 = vrot.slane %v2630_v2, 4  ;;  %v2676_v37 = vor.u32 %v2548_v10, %v285_v8  ;;  %721 = vst.msk [vmem:[#allocation2 + $0xc] sm:$0x8] %vm720_vm13, %v680_v50  ;;  %vm559_vm15 = vcmask 519170  }
  0x48   : > { %473 = vrot.lane.b32.xlu1 %v441_v40, %s2087_s24  ;;  %v519_v40 = vrot.slane %v2136_v4, 6  ;;  %399 = vst.msk [vmem:[#allocation2 + $0x4] sm:$0xe] %vm398_vm14, %v358_v51  ;;  %v2682_v4 = vsel %vm2265_vm10, %v779_v26, %v780_v1  ;;  %v454_v54 = vrot.slane %v2538_v23, 7  ;;  %vm516_vm2 = vcmask 1041408  }
  0x49   : > { %636 = vrot.lane.b32.xlu0 %v607_v57, %s2087_s24  ;;  %v453_v57 = vrot.slane %v2535_v3, 6  ;;  %v458_v62 = vrot.slane %v2545_v39, 6  ;;  %vm517_vm4 = vcmask 1045508   ;;  %v521_v58 = vrot.slane %v2139_v5, 6 }
  0x4a   : > { %560 = vst.msk [vmem:[#allocation2 + $0x8] sm:$0xc] %vm559_vm15, %v519_v40  ;;  %v520_v34 = vrot.slane %v519_v40, 4  ;;  %v459_v13 = vrot.slane %v2548_v10, 7  ;;  %vm2690_vm6 = vmor %vm516_vm2, %vm517_vm4  ;;  %vm677_vm8 = vcmask 1042432   ;;  %vm678_vm9 = vcmask 1046532  }
  0x4b   : > { %v681_v9 = vrot.slane %v680_v50, 4  ;;  %v682_v1 = vrot.slane %v2139_v5, 5  ;;  %vm355_vm10 = vcmask 1040384   ;;  %vm356_vm13 = vcmask 1044484   ;;  %vm2699_vm14 = vmor %vm677_vm8, %vm678_vm9 }
  0x4c   : > { %638 = vrot.lane.b32.xlu1 %v612_v27, %s2087_s24  ;;  %v522_v0 = vsel %vm2690_vm6, %v520_v34, %v521_v58  ;;  %v359_v16 = vrot.slane %v358_v51, 4  ;;  %v360_v17 = vrot.slane %v2139_v5, 7  ;;  %v523_v25 = vrot.slane %v521_v58, 4  ;;  %vm2708_vm15 = vmor %vm355_vm10, %vm356_vm13 }
  0x4d   : > { %797 = vrot.lane.b32.xlu0 %v766_v18, %s2087_s24  ;;  %561 = vst.msk [vmem:[#allocation2 + $0x1c] sm:$0xf] %vm174_vm0, %v522_v0  ;;  %v524_v12 = vrot.slane %v2142_v6, 6  ;;  %v683_v27 = vsel %vm2699_vm14, %v681_v9, %v682_v1  ;;  %v527_v47 = vrot.slane %v2167_v11, 6  ;;  %v684_v36 = vrot.slane %v682_v1, 4 }
  0x4e   : > { %v685_v38 = vrot.slane %v2142_v6, 5  ;;  %722 = vst.msk [vmem:[#allocation2 + $0x20] sm:$0xf] %vm174_vm0, %v683_v27  ;;  %v361_v5 = vsel %vm2708_vm15, %v359_v16, %v360_v17  ;;  %v688_v26 = vrot.slane %v2167_v11, 5  ;;  %v362_v40 = vrot.slane %v360_v17, 4 }
  0x4f   : > { %v526_v28 = vrot.slane %v524_v12, 4  ;;  %400 = vst.msk [vmem:[#allocation2 + $0x18] sm:$0xf] %vm174_vm0, %v361_v5  ;;  %v363_v34 = vrot.slane %v2142_v6, 7  ;;  %v366_v9 = vrot.slane %v2167_v11, 7  ;;  %v529_v7 = vrot.slane %v527_v47, 4 }
  0x50   : > { %799 = vrot.lane.b32.xlu1 %v771_v32, %s2087_s24  ;;  %v525_v32 = vsel %vm2690_vm6, %v523_v25, %v524_v12  ;;  %v686_v50 = vsel %vm2699_vm14, %v684_v36, %v685_v38  ;;  %v687_v51 = vrot.slane %v685_v38, 4  ;;  %v530_v61 = vrot.slane %v2182_v14, 6 }
  0x51   : > { %303 = vrot.lane.b32.xlu0 %v262_v49, %s2087_s24  ;;  %562 = vst.msk [vmem:[#allocation2 + $0x30] sm:$0xf] %vm174_vm0, %v525_v32  ;;  %v528_v58 = vsel %vm2690_vm6, %v526_v28, %v527_v47  ;;  %723 = vst.msk [vmem:[#allocation2 + $0x34] sm:$0xf] %vm174_vm0, %v686_v50  ;;  %v364_v49 = vsel %vm2708_vm15, %v362_v40, %v363_v34  ;;  %v365_v0 = vrot.slane %v363_v34, 4  ;;  %v533_v11 = vrot.slane %v2193_v19, 6 }
  0x52   : > { %563 = vst.msk [vmem:[#allocation2 + $0x44] sm:$0xf] %vm174_vm0, %v528_v58  ;;  %v689_v6 = vsel %vm2699_vm14, %v687_v51, %v688_v26  ;;  %401 = vst.msk [vmem:[#allocation2 + $0x2c] sm:$0xf] %vm174_vm0, %v364_v49  ;;  %v531_v1 = vsel %vm2690_vm6, %v529_v7, %v530_v61  ;;  %v532_v60 = vrot.slane %v530_v61, 4  ;;  %v690_v45 = vrot.slane %v688_v26, 4 }
  0x53   : > { %724 = vst.msk [vmem:[#allocation2 + $0x48] sm:$0xf] %vm174_vm0, %v689_v6  ;;  %v367_v16 = vsel %vm2708_vm15, %v365_v0, %v366_v9  ;;  %564 = vst.msk [vmem:[#allocation2 + $0x58] sm:$0xf] %vm174_vm0, %v531_v1  ;;  %v694_v17 = vrot.slane %v2193_v19, 5  ;;  %v368_v25 = vrot.slane %v366_v9, 4  ;;  %v280_v46 = vsel %vm2288_vm11, %v2644_v43, %v2662_v21 }
  0x54   : > { %305 = vrot.lane.b32.xlu1 %v271_v52, %s2087_s24  ;;  %v691_v52 = vrot.slane %v2182_v14, 5  ;;  %v369_v12 = vrot.slane %v2182_v14, 7  ;;  %402 = vst.msk [vmem:[#allocation2 + $0x40] sm:$0xf] %vm174_vm0, %v367_v16  ;;  %v534_v27 = vsel %vm2690_vm6, %v532_v60, %v533_v11  ;;  %v535_v5 = vrot.slane %v533_v11, 4 }
  0x55   : > { %475 = vrot.lane.b32.xlu0 %v2635_v31, %s2087_s24  ;;  %v372_v31 = vrot.slane %v2193_v19, 7  ;;  %565 = vst.msk [vmem:[#allocation2 + $0x6c] sm:$0xf] %vm174_vm0, %v534_v27  ;;  %v536_v32 = vrot.slane %v2204_v24, 6  ;;  %v539_v19 = vrot.slane %v2218_v29, 6  ;;  %v696_v26 = vrot.slane %v694_v17, 4 }
  0x56   : > { %v692_v47 = vsel %vm2699_vm14, %v690_v45, %v691_v52  ;;  %v693_v36 = vrot.slane %v691_v52, 4  ;;  %v370_v14 = vsel %vm2708_vm15, %v368_v25, %v369_v12  ;;  %v371_v38 = vrot.slane %v369_v12, 4 }
  0x57   : > { %725 = vst.msk [vmem:[#allocation2 + $0x5c] sm:$0xf] %vm174_vm0, %v692_v47  ;;  %403 = vst.msk [vmem:[#allocation2 + $0x54] sm:$0xf] %vm174_vm0, %v370_v14  ;;  %v537_v51 = vsel %vm2690_vm6, %v535_v5, %v536_v32  ;;  %v538_v40 = vrot.slane %v536_v32, 4  ;;  %v700_v34 = vrot.slane %v2218_v29, 5 }
  0x58   : > { %477 = vrot.lane.b32.xlu1 %v2640_v41, %s2087_s24  ;;  %v695_v28 = vsel %vm2699_vm14, %v693_v36, %v694_v17  ;;  %v697_v41 = vrot.slane %v2204_v24, 5  ;;  %v373_v50 = vsel %vm2708_vm15, %v371_v38, %v372_v31  ;;  %566 = vst.msk [vmem:[#allocation2 + $0x80] sm:$0xf] %vm174_vm0, %v537_v51  ;;  %v375_v7 = vrot.slane %v2204_v24, 7  ;;  %v327_v14 = vld [vmem:[#allocation2] sm:$0xf] }
  0x59   : > { %640 = vrot.lane.b32.xlu0 %v2651_v44, %s2087_s24  ;;  %726 = vst.msk [vmem:[#allocation2 + $0x70] sm:$0xf] %vm174_vm0, %v695_v28  ;;  %404 = vst.msk [vmem:[#allocation2 + $0x68] sm:$0xf] %vm174_vm0, %v373_v50  ;;  %v374_v44 = vrot.slane %v372_v31, 4  ;;  %v540_v61 = vsel %vm2690_vm6, %v538_v40, %v539_v19  ;;  %v378_v6 = vrot.slane %v2218_v29, 7 }
  0x5a   : > { %v698_v58 = vsel %vm2699_vm14, %v696_v26, %v697_v41  ;;  %v699_v9 = vrot.slane %v697_v41, 4  ;;  %v541_v49 = vrot.slane %v539_v19, 4  ;;  %v542_v0 = vrot.slane %v2221_v30, 6  ;;  %567 = vst.msk [vmem:[#allocation2 + $0x94] sm:$0xf] %vm174_vm0, %v540_v61  ;;  %v2037_v40 = vld [vmem:[%s3066_s1 + $0x110] sm:$0xff]  }
  0x5b   : > { %727 = vst.msk [vmem:[#allocation2 + $0x84] sm:$0xf] %vm174_vm0, %v698_v58  ;;  %v376_v24 = vsel %vm2708_vm15, %v374_v44, %v375_v7  ;;  %v377_v1 = vrot.slane %v375_v7, 4  ;;  %v702_v45 = vrot.slane %v700_v34, 4  ;;  %v703_v52 = vrot.slane %v2221_v30, 5  ;;  %v2040_v7 = vld [vmem:[%s3066_s1 + $0x108] sm:$0xff]  }
  0x5c   : > { %642 = vrot.lane.b32.xlu1 %v2659_v42, %s2087_s24  ;;  %v701_v11 = vsel %vm2699_vm14, %v699_v9, %v700_v34  ;;  %v545_v42 = vrot.slane %v2238_v35, 6  ;;  %405 = vst.msk [vmem:[#allocation2 + $0x7c] sm:$0xf] %vm174_vm0, %v376_v24  ;;  %v543_v29 = vsel %vm2690_vm6, %v541_v49, %v542_v0  ;;  %v544_v60 = vrot.slane %v542_v0, 4  ;;  %v2044_v49 = vld [vmem:[%s3066_s1 + $0x100] sm:$0xff]  }
  0x5d   : > { %801 = vrot.lane.b32.xlu0 %v2670_v59, %s2087_s24  ;;  %728 = vst.msk [vmem:[#allocation2 + $0x98] sm:$0xf] %vm174_vm0, %v701_v11  ;;  %v379_v16 = vsel %vm2708_vm15, %v377_v1, %v378_v6  ;;  %568 = vst.msk [vmem:[#allocation2 + $0xa8] sm:$0xf] %vm174_vm0, %v543_v29  ;;  %v706_v25 = vrot.slane %v2238_v35, 5  ;;  %vm570_vm2 = vcmask 517120   ;;  %v455_v59 = vor.u32 %v454_v54, %v453_v57 }
  0x5e   : > { %v547_v17 = vrot.slane %v545_v42, 4  ;;  %406 = vst.msk [vmem:[#allocation2 + $0x90] sm:$0xf] %vm174_vm0, %v379_v16  ;;  %v546_v12 = vsel %vm2690_vm6, %v544_v60, %v545_v42  ;;  %v704_v27 = vsel %vm2699_vm14, %v702_v45, %v703_v52  ;;  %v705_v47 = vrot.slane %v703_v52, 4 }
  0x5f   : > { %569 = vst.msk [vmem:[#allocation2 + $0xbc] sm:$0xf] %vm174_vm0, %v546_v12  ;;  %729 = vst.msk [vmem:[#allocation2 + $0xac] sm:$0xf] %vm174_vm0, %v704_v27  ;;  %v708_v36 = vrot.slane %v706_v25, 4  ;;  %vm731_vm4 = vcmask 518144  }
  0x60   : > { %803 = vrot.lane.b32.xlu1 %v2682_v4, %s2087_s24  ;;  %571 = vst.msk [vmem:[#allocation2 + $0xd0] sm:$0x3] %vm570_vm2, %v547_v17  ;;  %v380_v3 = vrot.slane %v378_v6, 4  ;;  %v381_v23 = vrot.slane %v2221_v30, 7  ;;  %v452_v4 = vrot.slane %v2595_v22, 4  ;;  %v707_v57 = vsel %vm2699_vm14, %v705_v47, %v706_v25 }
  0x61   : > { %644 = vrot.lane.b32.xlu0 %v623_v48, %s2087_s24  ;;  %v384_v54 = vrot.slane %v2238_v35, 7  ;;  %730 = vst.msk [vmem:[#allocation2 + $0xc0] sm:$0xf] %vm174_vm0, %v707_v57  ;;  %vm409_vm6 = vcmask 516096   ;;  %v289_v22 = vsel %vm2288_vm11, %v2664_v53, %v2676_v37  ;;  %v457_v43 = vrot.slane %v455_v59, 4 }
  0x62   : > { %732 = vst.msk [vmem:[#allocation2 + $0xd4] sm:$0x7] %vm731_vm4, %v708_v36  ;;  %v382_v30 = vsel %vm2708_vm15, %v380_v3, %v381_v23  ;;  %v383_v20 = vrot.slane %v381_v23, 4  ;;  %v460_v48 = vor.u32 %v459_v13, %v458_v62  ;;  %v456_v2 = vsel %vm2303_vm12, %v452_v4, %v455_v59  ;;  %v499_v37 = vld [vmem:[#allocation2 + $0x4] sm:$0xe] }
  0x63   : > { %407 = vst.msk [vmem:[#allocation2 + $0xa4] sm:$0xf] %vm174_vm0, %v382_v30  ;;  %v386_v35 = vrot.slane %v384_v54, 4  ;;  %v290_v10 = vrot.slane %v285_v8, 4  ;;  %vm819_vm11 = vsmask.f32 7950 }
  0x64   : > { %805 = vrot.lane.b32.xlu1 %v784_v33, %s2087_s24  ;;  %v385_v21 = vsel %vm2708_vm15, %v383_v20, %v384_v54  ;;  %v461_v55 = vsel %vm2303_vm12, %v457_v43, %v460_v48  ;;  %v462_v53 = vrot.slane %v460_v48, 4  ;;  %vm496_vm8 = vcmask 1043969   ;;  %v821_v33 = vld [vmem:[#allocation2 + $0xc] sm:$0x8]  ;;  %v660_v62 = vld [vmem:[#allocation2 + $0x8] sm:$0xc] }
  0x65   : > { %307 = vrot.lane.b32.xlu0 %v280_v46, %s2087_s24  ;;  %408 = vst.msk [vmem:[#allocation2 + $0xb8] sm:$0xf] %vm174_vm0, %v385_v21  ;;  %vm818_vm0 = vcmask 1043971   ;;  %vm497_vm9 = vsmask.f32 7942  ;;  %vm657_vm13 = vcmask 1043970  }
  0x66   : > { %410 = vst.msk [vmem:[#allocation2 + $0xcc] sm:$0x1] %vm409_vm6, %v386_v35  ;;  %vm820_vm10 = vmand %vm818_vm0, %vm819_vm11  ;;  %vm658_vm12 = vsmask.f32 7946  ;;  %vm324_vm2 = vcmask 1043968   ;;  %vm672_vm0 = vcmask 1042944  }
  0x67   : > { %vm498_vm14 = vmand %vm496_vm8, %vm497_vm9  ;;  %vm325_vm4 = vsmask.f32 7938 }
  0x68   : > { %309 = vrot.lane.b32.xlu1 %v289_v22, %s2087_s24  ;;  %vm659_vm15 = vmand %vm657_vm13, %vm658_vm12  ;;  %vm1310_vm13 = vcmask 523264  }
  0x69   : > { %479 = vrot.lane.b32.xlu0 %v456_v2, %s2087_s24  ;;  %vm326_vm6 = vmand %vm324_vm2, %vm325_vm4 }
  0x6a   : > { %vm673_vm11 = vmand %vm672_vm0, %vm572_vm1  ;;  %vm340_vm1 = vcmask 1040896  }
  0x6b   : > { %vm833_vm8 = vmand %vm324_vm2, %vm733_vm3  ;;  %vm511_vm3 = vcmask 1041920  }
  0x6c   : > { %481 = vrot.lane.b32.xlu1 %v461_v55, %s2087_s24  ;;  %vm341_vm9 = vmand %vm340_vm1, %vm199_vm5 }
  0x6d   : > { %311 = vrot.lane.b32.xlu0 %v290_v10, %s2087_s24 }
  0x70   : > { %483 = vrot.lane.b32.xlu1 %v462_v53, %s2087_s24 }
  0x89   : > { %v786_v63 = vpop.permute.xlu0 %785 }
  0x8a   : > { %v822_v39 = vsel %vm820_vm10, %v786_v63, %v821_v33  ;;  %vm512_vm10 = vmand %vm511_vm3, %vm411_vm7 }
  0x8b   : > { %823 = vst [vmem:[#allocation2 + $0xc] sm:$0x8] %v822_v39 }
  0x8c   : > { %v464_v8 = vpop.permute.xlu1 %463 }
  0x8d   : > { %v500_v13 = vsel %vm498_vm14, %v464_v8, %v499_v37  ;;  %v625_v15 = vpop.permute.xlu0 %624 }
  0x8e   : > { %501 = vst [vmem:[#allocation2 + $0x4] sm:$0xe] %v500_v13  ;;  %v661_v18 = vsel %vm659_vm15, %v625_v15, %v660_v62  ;;  %v674_v13 = vld [vmem:[#allocation2 + $0xd0] sm:$0x7] }
  0x8f   : > { %662 = vst [vmem:[#allocation2 + $0x8] sm:$0xc] %v661_v18 }
  0x92   : > { %v627_v31 = vpop.permute.xlu1 %626 }
  0x93   : > { %663 = vst.msk [vmem:[#allocation2 + $0x1c] sm:$0xf] %vm324_vm2, %v627_v31  ;;  %v292_v38 = vpop.permute.xlu0 %291 }
  0x94   : > { %v328_v5 = vsel %vm326_vm6, %v292_v38, %v327_v14 }
  0x95   : > { %329 = vst [vmem:[#allocation2] sm:$0xf] %v328_v5 }
  0x96   : > { %v788_v32 = vpop.permute.xlu1 %787 }
  0x97   : > { %824 = vst.msk [vmem:[#allocation2 + $0x20] sm:$0xf] %vm324_vm2, %v788_v32  ;;  %v294_v28 = vpop.permute.xlu0 %293  ;;  %v834_v32 = vld [vmem:[#allocation2 + $0xd4] sm:$0xf] }
  0x98   : > { %331 = vst.msk [vmem:[#allocation2 + $0x14] sm:$0xf] %vm324_vm2, %v294_v28 }
  0x9a   : > { %v466_v19 = vpop.permute.xlu1 %465  ;;  %v2018_v50 = vld [vmem:[#allocation2 + $0x8] ss:$20 sps:$4 sm:$0xff]  }
  0x9b   : > { %502 = vst.msk [vmem:[#allocation2 + $0x18] sm:$0xf] %vm324_vm2, %v466_v19  ;;  %v629_v26 = vpop.permute.xlu0 %628 }
  0x9c   : > { %664 = vst.msk [vmem:[#allocation2 + $0x30] sm:$0xf] %vm324_vm2, %v629_v26 }
  0x9e   : > { %v631_v41 = vpop.permute.xlu1 %630  ;;  %v2020_v51 = vld [vmem:[#allocation2 + $0xc] ss:$20 sps:$4 sm:$0xff]  }
  0x9f   : > { %665 = vst.msk [vmem:[#allocation2 + $0x44] sm:$0xf] %vm324_vm2, %v631_v41  ;;  %v790_v34 = vpop.permute.xlu0 %789  ;;  %1441 = vmatprep.mubr.bf16.mxu1 %v2020_v51  ;;  %v2023_v9 = vld [vmem:[#allocation2] ss:$20 sps:$4 sm:$0xff]  }
  0xa0   : > { %825 = vst.msk [vmem:[#allocation2 + $0x34] sm:$0xf] %vm324_vm2, %v790_v34  ;;  %1442 = vmatmul.mubr.bf16.vlgmr.msra.gmra.mxu1 %v2018_v50 }
  0xa1   : > { %1972 = vmatpush3.bf16.msra.mxu1 %v2623_v56 }
  0xa2   : > { %v792_v58 = vpop.permute.xlu1 %791  ;;  %v2025_v44 = vld [vmem:[#allocation2 + $0x4] ss:$20 sps:$4 sm:$0xff]   ;;  %1969 = vmatprep.subr.bf16.mxu1 %v2037_v40 }
  0xa3   : > { %826 = vst.msk [vmem:[#allocation2 + $0x48] sm:$0xf] %vm324_vm2, %v792_v58  ;;  %v296_v61 = vpop.permute.xlu0 %295  ;;  %1361 = vmatprep.mubr.bf16.mxu0 %v2025_v44 }
  0xa4   : > { %332 = vst.msk [vmem:[#allocation2 + $0x28] sm:$0xf] %vm324_vm2, %v296_v61  ;;  %1362 = vmatmul.mubr.bf16.vlgmr.msra.gmra.mxu0 %v2023_v9 }
  0xa5   : > { %1949 = vmatpush3.bf16.msra.mxu0 %v2623_v56  ;;  %1973 = vmatpush3.bf16.msra.mxu1 %v2037_v40 }
  0xa6   : > { %v298_v6 = vpop.permute.xlu1 %297  ;;  %1950 = vmatprep.subr.bf16.mxu0 %v2037_v40  ;;  %1970 = vmatprep.subr.bf16.mxu1 %v2040_v7 }
  0xa7   : > { %333 = vst.msk [vmem:[#allocation2 + $0x3c] sm:$0xf] %vm324_vm2, %v298_v6  ;;  %v468_v0 = vpop.permute.xlu0 %467  ;;  %v854_v24 = vld [vmem:[#allocation2 + $0x30] sm:$0xff] }
  0xa8   : > { %503 = vst.msk [vmem:[#allocation2 + $0x2c] sm:$0xf] %vm324_vm2, %v468_v0 }
  0xa9   : > { %1951 = vmatpush3.bf16.msra.mxu0 %v2037_v40  ;;  %1974 = vmatpush3.bf16.msra.mxu1 %v2040_v7 }
  0xaa   : > { %v470_v11 = vpop.permute.xlu1 %469  ;;  %v857_v1 = vld [vmem:[#allocation2 + $0x44] sm:$0xff]  ;;  %1952 = vmatprep.subr.bf16.mxu0 %v2040_v7  ;;  %1971 = vmatprep.subr.bf16.mxu1 %v2044_v49 }
  0xab   : > { %v2026_v42 = vld [vmem:[#allocation2 + $0x34] ss:$20 sps:$4 sm:$0xff]   ;;  %504 = vst.msk [vmem:[#allocation2 + $0x40] sm:$0xf] %vm324_vm2, %v470_v11  ;;  %v1755_v56 = vcombine.low %v854_v24, %v857_v1  ;;  %v633_v29 = vpop.permute.xlu0 %632 }
  0xac   : > { %1449 = vmatprep.mubr.bf16.mxu1 %v2026_v42  ;;  %666 = vst.msk [vmem:[#allocation2 + $0x58] sm:$0xf] %vm324_vm2, %v633_v29  ;;  %v2048_v1 = vld [vmem:[#allocation2 + $0x60] ss:$20 sps:$4 sm:$0xff]  }
  0xad   : > { %1450 = vmatmul.mubr.bf16.gmra.mxu1 %v1755_v56  ;;  %1953 = vmatpush3.bf16.msra.mxu0 %v2040_v7  ;;  %v342_v7 = vld [vmem:[#allocation2 + $0xc8] sm:$0x1] }
  0xae   : > { %v635_v60 = vpop.permute.xlu1 %634  ;;  %1975 = vmatpush3.bf16.msra.mxu1 %v2044_v49  ;;  %1954 = vmatprep.subr.bf16.mxu0 %v2044_v49 }
  0xaf   : > { %667 = vst.msk [vmem:[#allocation2 + $0x6c] sm:$0xf] %vm324_vm2, %v635_v60  ;;  %v794_v45 = vpop.permute.xlu0 %793  ;;  %v853_v16 = vld [vmem:[#allocation2 + $0x28] sm:$0xff] }
  0xb0   : > { %827 = vst.msk [vmem:[#allocation2 + $0x5c] sm:$0xf] %vm324_vm2, %v794_v45  ;;  %v2049_v45 = vld [vmem:[#allocation2 + $0x88] ss:$20 sps:$4 sm:$0xff]  }
  0xb1   : > { %1955 = vmatpush3.bf16.msra.mxu0 %v2044_v49  ;;  %v513_v49 = vld [vmem:[#allocation2 + $0xcc] sm:$0x3] }
  0xb2   : > { %v796_v52 = vpop.permute.xlu1 %795  ;;  %v856_v17 = vld [vmem:[#allocation2 + $0x3c] sm:$0xff] }
  0xb3   : > { %v2028_v25 = vld [vmem:[#allocation2 + $0x2c] ss:$20 sps:$4 sm:$0xff]   ;;  %828 = vst.msk [vmem:[#allocation2 + $0x70] sm:$0xf] %vm324_vm2, %v796_v52  ;;  %v1753_v59 = vcombine.low %v853_v16, %v856_v17  ;;  %v300_v12 = vpop.permute.xlu0 %299  ;;  %v2052_v52 = vld [vmem:[#allocation2 + $0xb0] ss:$20 sps:$4 sm:$0xff]  }
  0xb4   : > { %1369 = vmatprep.mubr.bf16.mxu0 %v2028_v25  ;;  %334 = vst.msk [vmem:[#allocation2 + $0x50] sm:$0xf] %vm324_vm2, %v300_v12  ;;  %v2053_v12 = vld [vmem:[#allocation2 + $0xd8] ss:$0 sps:$4 sm:$0xff]  }
  0xb5   : > { %1370 = vmatmul.mubr.bf16.gmra.mxu0 %v1753_v59  ;;  %v2054_v59 = vld [vmem:[#allocation2 + $0x10] ss:$20 sps:$4 sm:$0xff]  }
  0xb6   : > { %v302_v27 = vpop.permute.xlu1 %301 }
  0xb7   : > { %335 = vst.msk [vmem:[#allocation2 + $0x64] sm:$0xf] %vm324_vm2, %v302_v27  ;;  %v472_v47 = vpop.permute.xlu0 %471  ;;  %v860_v3 = vld [vmem:[#allocation2 + $0x58] sm:$0xff] }
  0xb8   : > { %505 = vst.msk [vmem:[#allocation2 + $0x54] sm:$0xf] %vm324_vm2, %v472_v47  ;;  %v2055_v27 = vld [vmem:[#allocation2 + $0x38] ss:$20 sps:$4 sm:$0xff]  }
  0xba   : > { %v474_v36 = vpop.permute.xlu1 %473  ;;  %v863_v23 = vld [vmem:[#allocation2 + $0x6c] sm:$0xff] }
  0xbb   : > { %v2030_v4 = vld [vmem:[#allocation2 + $0x5c] ss:$20 sps:$4 sm:$0xff]   ;;  %506 = vst.msk [vmem:[#allocation2 + $0x68] sm:$0xf] %vm324_vm2, %v474_v36  ;;  %v1760_v57 = vcombine.low %v860_v3, %v863_v23  ;;  %v637_v54 = vpop.permute.xlu0 %636 }
  0xbc   : > { %1457 = vmatprep.mubr.bf16.mxu1 %v2030_v4  ;;  %668 = vst.msk [vmem:[#allocation2 + $0x80] sm:$0xf] %vm324_vm2, %v637_v54 }
  0xbd   : > { %1458 = vmatmul.mubr.bf16.gmra.mxu1 %v1760_v57 }
  0xbe   : > { %v639_v46 = vpop.permute.xlu1 %638 }
  0xbf   : > { %669 = vst.msk [vmem:[#allocation2 + $0x94] sm:$0xf] %vm324_vm2, %v639_v46  ;;  %v798_v30 = vpop.permute.xlu0 %797  ;;  %v859_v35 = vld [vmem:[#allocation2 + $0x50] sm:$0xff] }
  0xc0   : > { %829 = vst.msk [vmem:[#allocation2 + $0x84] sm:$0xf] %vm324_vm2, %v798_v30 }
  0xc2   : > { %v800_v20 = vpop.permute.xlu1 %799  ;;  %v862_v22 = vld [vmem:[#allocation2 + $0x64] sm:$0xff] }
  0xc3   : > { %v2033_v43 = vld [vmem:[#allocation2 + $0x54] ss:$20 sps:$4 sm:$0xff]   ;;  %830 = vst.msk [vmem:[#allocation2 + $0x98] sm:$0xf] %vm324_vm2, %v800_v20  ;;  %v1758_v48 = vcombine.low %v859_v35, %v862_v22  ;;  %v304_v21 = vpop.permute.xlu0 %303 }
  0xc4   : > { %1377 = vmatprep.mubr.bf16.mxu0 %v2033_v43  ;;  %336 = vst.msk [vmem:[#allocation2 + $0x78] sm:$0xf] %vm324_vm2, %v304_v21 }
  0xc5   : > { %1378 = vmatmul.mubr.bf16.gmra.mxu0 %v1758_v48 }
  0xc6   : > { %v306_v2 = vpop.permute.xlu1 %305 }
  0xc7   : > { %337 = vst.msk [vmem:[#allocation2 + $0x8c] sm:$0xf] %vm324_vm2, %v306_v2  ;;  %v476_v55 = vpop.permute.xlu0 %475  ;;  %v866_v53 = vld [vmem:[#allocation2 + $0x80] sm:$0xff] }
  0xc8   : > { %507 = vst.msk [vmem:[#allocation2 + $0x7c] sm:$0xf] %vm324_vm2, %v476_v55 }
  0xca   : > { %v478_v10 = vpop.permute.xlu1 %477  ;;  %v869_v33 = vld [vmem:[#allocation2 + $0x94] sm:$0xff] }
  0xcb   : > { %v2035_v63 = vld [vmem:[#allocation2 + $0x84] ss:$20 sps:$4 sm:$0xff]   ;;  %508 = vst.msk [vmem:[#allocation2 + $0x90] sm:$0xf] %vm324_vm2, %v478_v10  ;;  %v1765_v37 = vcombine.low %v866_v53, %v869_v33  ;;  %v641_v39 = vpop.permute.xlu0 %640 }
  0xcc   : > { %1465 = vmatprep.mubr.bf16.mxu1 %v2035_v63  ;;  %670 = vst.msk [vmem:[#allocation2 + $0xa8] sm:$0xf] %vm324_vm2, %v641_v39 }
  0xcd   : > { %1466 = vmatmul.mubr.bf16.gmra.mxu1 %v1765_v37 }
  0xce   : > { %v643_v8 = vpop.permute.xlu1 %642 }
  0xcf   : > { %671 = vst.msk [vmem:[#allocation2 + $0xbc] sm:$0xf] %vm324_vm2, %v643_v8  ;;  %v802_v62 = vpop.permute.xlu0 %801  ;;  %v865_v18 = vld [vmem:[#allocation2 + $0x78] sm:$0xff] }
  0xd0   : > { %831 = vst.msk [vmem:[#allocation2 + $0xac] sm:$0xf] %vm324_vm2, %v802_v62 }
  0xd2   : > { %v804_v15 = vpop.permute.xlu1 %803  ;;  %v868_v31 = vld [vmem:[#allocation2 + $0x8c] sm:$0xff] }
  0xd3   : > { %v2038_v14 = vld [vmem:[#allocation2 + $0x7c] ss:$20 sps:$4 sm:$0xff]   ;;  %832 = vst.msk [vmem:[#allocation2 + $0xc0] sm:$0xf] %vm324_vm2, %v804_v15  ;;  %v1763_v38 = vcombine.low %v865_v18, %v868_v31  ;;  %v645_v5 = vpop.permute.xlu0 %644 }
  0xd4   : > { %1385 = vmatprep.mubr.bf16.mxu0 %v2038_v14  ;;  %v675_v28 = vsel %vm673_vm11, %v645_v5, %v674_v13 }
  0xd5   : > { %1386 = vmatmul.mubr.bf16.gmra.mxu0 %v1763_v38  ;;  %676 = vst [vmem:[#allocation2 + $0xd0] sm:$0x7] %v675_v28 }
  0xd6   : > { %v806_v19 = vpop.permute.xlu1 %805 }
  0xd7   : > { %v835_v26 = vsel %vm833_vm8, %v806_v19, %v834_v32  ;;  %v308_v41 = vpop.permute.xlu0 %307  ;;  %v872_v51 = vld [vmem:[#allocation2 + $0xa8] sm:$0xff] }
  0xd8   : > { %836 = vst [vmem:[#allocation2 + $0xd4] sm:$0xf] %v835_v26  ;;  %338 = vst.msk [vmem:[#allocation2 + $0xa0] sm:$0xf] %vm324_vm2, %v308_v41 }
  0xda   : > { %v310_v50 = vpop.permute.xlu1 %309  ;;  %v875_v40 = vld [vmem:[#allocation2 + $0xbc] sm:$0xff] }
  0xdb   : > { %v2041_v34 = vld [vmem:[#allocation2 + $0xac] ss:$20 sps:$4 sm:$0xff]   ;;  %339 = vst.msk [vmem:[#allocation2 + $0xb4] sm:$0xf] %vm324_vm2, %v310_v50  ;;  %v1770_v58 = vcombine.low %v872_v51, %v875_v40  ;;  %v480_v9 = vpop.permute.xlu0 %479 }
  0xdc   : > { %1473 = vmatprep.mubr.bf16.mxu1 %v2041_v34  ;;  %509 = vst.msk [vmem:[#allocation2 + $0xa4] sm:$0xf] %vm324_vm2, %v480_v9 }
  0xdd   : > { %1474 = vmatmul.mubr.bf16.gmra.mxu1 %v1770_v58 }
  0xde   : > { %v482_v44 = vpop.permute.xlu1 %481 }
  0xdf   : > { %510 = vst.msk [vmem:[#allocation2 + $0xb8] sm:$0xf] %vm324_vm2, %v482_v44  ;;  %v878_v61 = vld [vmem:[#allocation2 + $0xd0] sm:$0xff]  ;;  %v312_v0 = vpop.permute.xlu0 %311 }
  0xe0   : > { %v1776_v6 = vcombine.high %v878_v61, %v878_v61  ;;  %v343_v11 = vsel %vm341_vm9, %v312_v0, %v342_v7  ;;  %v1775_v56 = vcombine.low %v878_v61, %v878_v61 }
  0xe1   : > { %344 = vst [vmem:[#allocation2 + $0xc8] sm:$0x1] %v343_v11 }
  0xe2   : > { %1481 = vmatprep.mubr.bf16.mxu1 %v1776_v6  ;;  %v484_v24 = vpop.permute.xlu1 %483  ;;  %v2047_v60 = vld [vmem:[#allocation2 + $0xa0] ss:$20 sps:$4 sm:$0xff]  }
  0xe3   : > { %v514_v42 = vsel %vm512_vm10, %v484_v24, %v513_v49  ;;  %v2962_v24 = vld [vmem:[%s3067_s2] ss:$0 sm:$0xff] }
  0xe4   : > { %515 = vst [vmem:[#allocation2 + $0xcc] sm:$0x3] %v514_v42 }
  0xe5   : > { %1482 = vmatmul.mubr.bf16.gmra.mxu1 %v1775_v56 }
  0xe6   : > { %v2045_v29 = vld [vmem:[#allocation2 + $0xa4] ss:$20 sps:$4 sm:$0xff]   ;;  %1960 = vmatprep.mubr.msk.bf16.mxu1 %vm1310_vm13, %v2048_v1 }
  0xe7   : > { %1393 = vmatprep.mubr.bf16.mxu0 %v2045_v29 }
  0xe8   : > { %1394 = vmatmul.mubr.bf16.gmra.mxu0 %v2047_v60 }
  0xeb   : > { %v877_v16 = vld [vmem:[#allocation2 + $0xc8] sm:$0xff] }
  0xec   : > { %v1774_v17 = vcombine.high %v877_v16, %v877_v16  ;;  %v1773_v25 = vcombine.low %v877_v16, %v877_v16 }
  0xed   : > { %1961 = vmatmul.mubr.msk.bf16.vlgmr.msra.gmra.mxu1 %vm1310_vm13, %v2049_v45 }
  0xee   : > { %1401 = vmatprep.mubr.bf16.mxu0 %v1774_v17  ;;  %1964 = vmatprep.mubr.msk.bf16.mxu1 %vm1310_vm13, %v2052_v52 }
  0xf0   : > { %1402 = vmatmul.mubr.bf16.gmra.mxu0 %v1773_v25 }
  0xf1   : > { %1956 = vmatprep.mubr.msk.bf16.mxu0 %vm1310_vm13, %v2054_v59 }
  0xf5   : > { %1965 = vmatmul.mubr.msk.bf16.gmra.mxu1 %vm1310_vm13, %v2053_v12 }
  0xf8   : > { %1957 = vmatmul.mubr.msk.bf16.vlgmr.msra.gmra.mxu0 %vm1310_vm13, %v2055_v27 }
 0x160   : > { %v2929_v47 = vpop.f32.mrf.mxu1 }
 0x162   : > { %v2931_v36 = vpop.f32.mrf.mxu1 }
 0x164   : > { %v2933_v3 = vpop.f32.mrf.mxu1  ;;  %v2935_v23 = vpop.f32.mrf.mxu0 }
 0x166   : > { %v2937_v4 = vpop.f32.mrf.mxu1  ;;  %v1851_v54 = vpop.f32.mrf.mxu0 }
 0x168   : > { %v2943_v30 = vpop.f32.mrf.mxu0 }
 0x16a   : > { %v2947_v35 = vpop.f32.mrf.mxu0 }
 0x16d   : > { %v2939_v57 = vpop.f32.mrf.mxu1 }
 0x16f   : > { %v2941_v46 = vpop.f32.mrf.mxu1 }
 0x171   : > { %v2945_v20 = vpop.f32.mrf.mxu1 }
 0x173   : > { %v2949_v22 = vpop.f32.mrf.mxu1 }
 0x175   : > { %v1856_v43 = vpop.f32.mrf.mxu0 }
 0x177   : > { %v1857_v21 = vpop.f32.mrf.mxu0 }
 0x179   : > { %v2951_v55 = vpop.f32.mrf.mxu0 }
 0x17b   : > { %v2953_v53 = vpop.f32.mrf.mxu0 }
 0x17d   : > { %v1914_v48 = vpop.f32.mrf.mxu1 }
 0x17f   : > { %v1915_v2 = vpop.f32.mrf.mxu1 }
 0x180   : > { %v1916_v61 = vadd.f32 %v1915_v2, %v1914_v48 }
 0x181   : > { %v1917_v10 = vpop.f32.mrf.mxu1 }
 0x183   : > { %v1918_v33 = vpop.f32.mrf.mxu1 }
 0x184   : > { %v1919_v25 = vadd.f32 %v1918_v33, %v1917_v10  ;;  %v1910_v33 = vadd.f32 %v2941_v46, %v2939_v57 }
 0x185   : > { %v1862_v63 = vpop.f32.mrf.mxu0 }
 0x187   : > { %v1863_v39 = vpop.f32.mrf.mxu0 }
 0x188   : > { %v1864_v58 = vadd.f32 %v1863_v39, %v1862_v63  ;;  %v1858_v39 = vadd.f32 %v1857_v21, %v1856_v43  ;;  %v1904_v21 = vadd.f32 %v2931_v36, %v2929_v47 }
 0x189   : > { %v1865_v62 = vpop.f32.mrf.mxu0 }
 0x18a   : > { %v1460_v56 = vadd.f32 %v1916_v61, %v1864_v58 }
 0x18b   : > { %v1866_v15 = vpop.f32.mrf.mxu0 }
 0x18c   : > { %v1867_v29 = vadd.f32 %v1866_v15, %v1865_v62 }
 0x18d   : > { %v1920_v37 = vpop.f32.mrf.mxu1 }
 0x18e   : > { %v1463_v62 = vadd.f32 %v1919_v25, %v1867_v29 }
 0x18f   : > { %v1921_v8 = vpop.f32.mrf.mxu1 }
 0x190   : > { %v1922_v9 = vadd.f32 %v1921_v8, %v1920_v37  ;;  %v1852_v37 = vadd.f32 %v1851_v54, %v2935_v23 }
 0x191   : > { %v1923_v13 = vpop.f32.mrf.mxu1 }
 0x193   : > { %v1924_v18 = vpop.f32.mrf.mxu1 }
 0x194   : > { %v1925_v1 = vadd.f32 %v1924_v18, %v1923_v13 }
 0x195   : > { %v1868_v31 = vpop.f32.mrf.mxu0 }
 0x197   : > { %v1869_v38 = vpop.f32.mrf.mxu0 }
 0x198   : > { %v1870_v51 = vadd.f32 %v1869_v38, %v1868_v31 }
 0x199   : > { %v1871_v28 = vpop.f32.mrf.mxu0 }
 0x19a   : > { %v1468_v49 = vadd.f32 %v1922_v9, %v1870_v51  ;;  %v1861_v9 = vadd.f32 %v2953_v53, %v2951_v55 }
 0x19b   : > { %v1872_v41 = vpop.f32.mrf.mxu0 }
 0x19c   : > { %v1873_v6 = vadd.f32 %v1872_v41, %v1871_v28 }
 0x19d   : > { %v1926_v14 = vpop.f32.mrf.mxu1 }
 0x19e   : > { %v1471_v17 = vadd.f32 %v1925_v1, %v1873_v6 }
 0x19f   : > { %v1927_v5 = vpop.f32.mrf.mxu1 }
 0x1a0   : > { %v1928_v15 = vadd.f32 %v1927_v5, %v1926_v14 }
 0x1a1   : > { %v2955_v32 = vpop.f32.mrf.mxu1 }
 0x1a3   : > { %v2957_v19 = vpop.f32.mrf.mxu1 }
 0x1a5   : > { %v1932_v26 = vpop.f32.mrf.mxu1 }
 0x1a7   : > { %v1933_v50 = vpop.f32.mrf.mxu1 }
 0x1a8   : > { %v1874_v40 = vpop.f32.mrf.mxu0  ;;  %v1934_v38 = vadd.f32 %v1933_v50, %v1932_v26  ;;  %v1452_v50 = vadd.f32 %v1910_v33, %v1858_v39 }
 0x1a9   : > { %v1935_v34 = vpop.f32.mrf.mxu1 }
 0x1aa   : > { %v1875_v44 = vpop.f32.mrf.mxu0 }
 0x1ab   : > { %v1936_v7 = vpop.f32.mrf.mxu1  ;;  %v1876_v27 = vadd.f32 %v1875_v44, %v1874_v40  ;;  %v1931_v44 = vadd.f32 %v2957_v19, %v2955_v32 }
 0x1ac   : > { %v1877_v0 = vpop.f32.mrf.mxu0 }
 0x1ad   : > { %v1962_v11 = vpop.f32.mrf.mxu1  ;;  %v1476_v43 = vadd.f32 %v1928_v15, %v1876_v27 }
 0x1ae   : > { %v1548_v42 = vadd.f32 %v1962_v11, %v1468_v49  ;;  %v1878_v60 = vpop.f32.mrf.mxu0  ;;  %v1913_v11 = vadd.f32 %v2949_v22, %v2945_v20 }
 0x1af   : > { %v1539_v45 = vpop.f32.mrf.mxu1  ;;  %v1879_v14 = vadd.f32 %v1878_v60, %v1877_v0  ;;  %v1444_v0 = vadd.f32 %v1904_v21, %v1852_v37 }
 0x1b0   : > { %v2965_v52 = vadd.f32 %v2962_v24, %v1548_v42  ;;  %v1540_v16 = vadd.f32 %v1539_v45, %v1460_v56  ;;  %v1880_v59 = vpop.f32.mrf.mxu0  ;;  %v1855_v42 = vadd.f32 %v2947_v35, %v2943_v30  ;;  %v1455_v22 = vadd.f32 %v1913_v11, %v1861_v9 }
 0x1b1   : > { %v1963_v12 = vpop.f32.mrf.mxu1  ;;  %v1479_v32 = vadd.f32 %v1931_v44, %v1879_v14 }
 0x1b2   : > { %v1604_v48 = vmin.f32 %v2965_v52, 0.0  ;;  %v2969_v2 = vadd.f32 %v2962_v24, %v1540_v16  ;;  %v1551_v63 = vadd.f32 %v1963_v12, %v1471_v17  ;;  %v1881_v8 = vpop.f32.mrf.mxu0  ;;  %v1907_v17 = vadd.f32 %v2937_v4, %v2933_v3 }
 0x1b3   : > { %v1542_v13 = vpop.f32.mrf.mxu1  ;;  %v1882_v28 = vadd.f32 %v1881_v8, %v1880_v59  ;;  %vm1593_vm5 = vcmp.gt.f32.partialorder %v2965_v52, 0.0 }
 0x1b4   : > { %v1621_v18 = vmul.f32 1.442695, %v1604_v48  ;;  %v1602_v31 = vmin.f32 %v2969_v2, 0.0  ;;  %v2974_v10 = vadd.f32 %v2962_v24, %v1551_v63  ;;  %v1543_v41 = vadd.f32 %v1542_v13, %v1463_v62  ;;  %v1883_v51 = vpop.f32.mrf.mxu0 }
 0x1b5   : > { %v1966_v40 = vpop.f32.mrf.mxu1  ;;  %v1484_v34 = vadd.f32 %v1934_v38, %v1882_v28  ;;  %v1447_v39 = vadd.f32 %v1907_v17, %v1855_v42  ;;  %vm1591_vm7 = vcmp.gt.f32.partialorder %v2969_v2, 0.0 }
 0x1b6   : > { %2056 = vpow2.f32 %v1621_v18  ;;  %v1617_v23 = vmul.f32 1.442695, %v1602_v31  ;;  %v1605_v54 = vmin.f32 %v2974_v10, 0.0  ;;  %v2982_v5 = vadd.f32 %v2962_v24, %v1543_v41  ;;  %v1884_v58 = vpop.f32.mrf.mxu0 }
 0x1b7   : > { %v1555_v57 = vpop.f32.mrf.mxu1  ;;  %v1564_v47 = vadd.f32 %v1966_v40, %v1484_v34  ;;  %vm1594_vm12 = vcmp.gt.f32.partialorder %v2974_v10, 0.0 }
 0x1b8   : > { %2058 = vpow2.f32 %v1617_v23  ;;  %v1623_v46 = vmul.f32 1.442695, %v1605_v54  ;;  %v1556_v26 = vadd.f32 %v1555_v57, %v1476_v43  ;;  %v1603_v7 = vmin.f32 %v2982_v5, 0.0  ;;  %v1958_v36 = vpop.f32.mrf.mxu0 }
 0x1b9   : > { %v1967_v61 = vpop.f32.mrf.mxu1  ;;  %v1532_v49 = vadd.f32 %v1958_v36, %v1452_v50  ;;  %v2995_v55 = vadd.f32 %v2962_v24, %v1564_v47  ;;  %vm1592_vm14 = vcmp.gt.f32.partialorder %v2982_v5, 0.0 }
 0x1ba   : > { %2060 = vpow2.f32 %v1623_v46  ;;  %v2990_v6 = vadd.f32 %v2962_v24, %v1556_v26  ;;  %v1619_v1 = vmul.f32 1.442695, %v1603_v7  ;;  %v1523_v53 = vpop.f32.mrf.mxu0 }
 0x1bb   : > { %v1558_v19 = vpop.f32.mrf.mxu1  ;;  %v3001_v29 = vadd.f32 %v2962_v24, %v1532_v49  ;;  %v1524_v60 = vadd.f32 %v1523_v53, %v1444_v0  ;;  %v1608_v45 = vmin.f32 %v2995_v55, 0.0  ;;  %vm1597_vm2 = vcmp.gt.f32.partialorder %v2995_v55, 0.0 }
 0x1bc   : > { %v1606_v56 = vmin.f32 %v2990_v6, 0.0  ;;  %2062 = vpow2.f32 %v1619_v1  ;;  %v1559_v20 = vadd.f32 %v1558_v19, %v1479_v32  ;;  %v1959_v16 = vpop.f32.mrf.mxu0  ;;  %vm1595_vm15 = vcmp.gt.f32.partialorder %v2990_v6, 0.0 }
 0x1bd   : > { %v1600_v59 = vmin.f32 %v3001_v29, 0.0  ;;  %v3008_v30 = vadd.f32 %v2962_v24, %v1524_v60  ;;  %v1629_v35 = vmul.f32 1.442695, %v1608_v45  ;;  %v1535_v27 = vadd.f32 %v1959_v16, %v1455_v22 }
 0x1be   : > { %v1625_v25 = vmul.f32 1.442695, %v1606_v56  ;;  %v3011_v12 = vadd.f32 %v2962_v24, %v1559_v20  ;;  %v1526_v48 = vpop.f32.mrf.mxu0  ;;  %vm1589_vm4 = vcmp.gt.f32.partialorder %v3001_v29, 0.0 }
 0x1bf   : > { %v1613_v63 = vmul.f32 1.442695, %v1600_v59  ;;  %v1598_v37 = vmin.f32 %v3008_v30, 0.0  ;;  %v3016_v4 = vadd.f32 %v2962_v24, %v1535_v27  ;;  %v1527_v62 = vadd.f32 %v1526_v48, %v1447_v39 }
 0x1c0   : > { %2064 = vpow2.f32 %v1625_v25  ;;  %v1607_v3 = vmin.f32 %v3011_v12, 0.0  ;;  %vm1587_vm6 = vcmp.gt.f32.partialorder %v3008_v30, 0.0  ;;  %vm1596_vm0 = vcmp.gt.f32.partialorder %v3011_v12, 0.0 }
 0x1c1   : > { %2066 = vpow2.f32 %v1629_v35  ;;  %v1609_v8 = vmul.f32 1.442695, %v1598_v37  ;;  %v1601_v18 = vmin.f32 %v3016_v4, 0.0  ;;  %v3021_v33 = vadd.f32 %v2962_v24, %v1527_v62 }
 0x1c2   : > { %2068 = vpow2.f32 %v1613_v63  ;;  %v1627_v15 = vmul.f32 1.442695, %v1607_v3  ;;  %vm1590_vm11 = vcmp.gt.f32.partialorder %v3016_v4, 0.0 }
 0x1c3   : > { %v2057_v13 = vpop.eup %2056  ;;  %2070 = vpow2.f32 %v1609_v8  ;;  %v1615_v28 = vmul.f32 1.442695, %v1601_v18  ;;  %v1599_v40 = vmin.f32 %v3021_v33, 0.0  ;;  %vm1588_vm8 = vcmp.gt.f32.partialorder %v3021_v33, 0.0 }
 0x1c4   : > { %v1827_v31 = vadd.f32 -1.0, %v2057_v13  ;;  %2072 = vpow2.f32 %v1627_v15 }
 0x1c5   : > { %v2059_v38 = vpop.eup %2058  ;;  %2074 = vpow2.f32 %v1615_v28  ;;  %v1611_v21 = vmul.f32 1.442695, %v1599_v40 }
 0x1c6   : > { %v1648_v41 = vmul.f32 1.6732632, %v1827_v31  ;;  %v1825_v51 = vadd.f32 -1.0, %v2059_v38 }
 0x1c7   : > { %v2061_v23 = vpop.eup %2060  ;;  %2076 = vpow2.f32 %v1611_v21 }
 0x1c8   : > { %v1659_v24 = vsel %vm1593_vm5, %v2965_v52, %v1648_v41  ;;  %v1646_v54 = vmul.f32 1.6732632, %v1825_v51  ;;  %v1828_v43 = vadd.f32 -1.0, %v2061_v23 }
 0x1c9   : > { %v1670_v14 = vmul.f32 1.050701, %v1659_v24  ;;  %v2063_v34 = vpop.eup %2062 }
 0x1ca   : > { %v1657_v58 = vsel %vm1591_vm7, %v2969_v2, %v1646_v54  ;;  %v1649_v57 = vmul.f32 1.6732632, %v1828_v43  ;;  %v1826_v26 = vadd.f32 -1.0, %v2063_v34 }
 0x1cb   : > { %1681 = vst [vmem:[%s3028_s13 + $0x30] sm:$0xff] %v1670_v14  ;;  %v1668_v46 = vmul.f32 1.050701, %v1657_v58 }
 0x1cc   : > { %v1660_v52 = vsel %vm1594_vm12, %v2974_v10, %v1649_v57  ;;  %v1647_v44 = vmul.f32 1.6732632, %v1826_v26 }
 0x1cd   : > { %v2065_v50 = vpop.eup %2064  ;;  %1679 = vst [vmem:[%s3028_s13 + $0x20] sm:$0xff] %v1668_v46  ;;  %v1671_v9 = vmul.f32 1.050701, %v1660_v52 }
 0x1ce   : > { %v2067_v7 = vpop.eup %2066  ;;  %v1829_v47 = vadd.f32 -1.0, %v2065_v50  ;;  %v1658_v36 = vsel %vm1592_vm14, %v2982_v5, %v1647_v44 }
 0x1cf   : > { %v2069_v2 = vpop.eup %2068  ;;  %1682 = vst [vmem:[%s3028_s13 + $0x38] sm:$0xff] %v1671_v9  ;;  %v1831_v61 = vadd.f32 -1.0, %v2067_v7  ;;  %v1669_v49 = vmul.f32 1.050701, %v1658_v36 }
 0x1d0   : > { %v1650_v0 = vmul.f32 1.6732632, %v1829_v47  ;;  %v1823_v11 = vadd.f32 -1.0, %v2069_v2  ;;  %v2071_v1 = vpop.eup %2070 }
 0x1d1   : > { %v1652_v53 = vmul.f32 1.6732632, %v1831_v61  ;;  %v2073_v10 = vpop.eup %2072  ;;  %1680 = vst [vmem:[%s3028_s13 + $0x28] sm:$0xff] %v1669_v49  ;;  %v1821_v42 = vadd.f32 -1.0, %v2071_v1 }
 0x1d2   : > { %v1661_v32 = vsel %vm1595_vm15, %v2990_v6, %v1650_v0  ;;  %v1644_v19 = vmul.f32 1.6732632, %v1823_v11  ;;  %v1830_v60 = vadd.f32 -1.0, %v2073_v10  ;;  %v2075_v45 = vpop.eup %2074 }
 0x1d3   : > { %v1663_v5 = vsel %vm1597_vm2, %v2995_v55, %v1652_v53  ;;  %v1672_v56 = vmul.f32 1.050701, %v1661_v32  ;;  %v1642_v16 = vmul.f32 1.6732632, %v1821_v42  ;;  %v1824_v25 = vadd.f32 -1.0, %v2075_v45 }
 0x1d4   : > { %v1674_v20 = vmul.f32 1.050701, %v1663_v5  ;;  %v1655_v22 = vsel %vm1589_vm4, %v3001_v29, %v1644_v19  ;;  %v1651_v6 = vmul.f32 1.6732632, %v1830_v60  ;;  %v2077_v59 = vpop.eup %2076 }
 0x1d5   : > { %1683 = vst [vmem:[%s3028_s13 + $0x40] sm:$0xff] %v1672_v56  ;;  %v1666_v17 = vmul.f32 1.050701, %v1655_v22  ;;  %v1653_v55 = vsel %vm1587_vm6, %v3008_v30, %v1642_v16  ;;  %v1645_v27 = vmul.f32 1.6732632, %v1824_v25  ;;  %v1822_v63 = vadd.f32 -1.0, %v2077_v59 }
 0x1d6   : > { %1685 = vst [vmem:[%s3028_s13 + $0x50] sm:$0xff] %v1674_v20  ;;  %v1664_v35 = vmul.f32 1.050701, %v1653_v55  ;;  %v1662_v29 = vsel %vm1596_vm0, %v3011_v12, %v1651_v6 }
 0x1d7   : > { %1677 = vst [vmem:[%s3028_s13 + $0x10] sm:$0xff] %v1666_v17  ;;  %v1673_v48 = vmul.f32 1.050701, %v1662_v29  ;;  %v1656_v37 = vsel %vm1590_vm11, %v3016_v4, %v1645_v27  ;;  %v1643_v30 = vmul.f32 1.6732632, %v1822_v63 }
 0x1d8   : > { %1675 = vst [vmem:[%s3028_s13] sm:$0xff] %v1664_v35  ;;  %v1667_v39 = vmul.f32 1.050701, %v1656_v37 }
 0x1d9   : > { %1684 = vst [vmem:[%s3028_s13 + $0x48] sm:$0xff] %v1673_v48  ;;  %v1654_v3 = vsel %vm1588_vm8, %v3021_v33, %v1643_v30 }
 0x1da   : > { %1678 = vst [vmem:[%s3028_s13 + $0x18] sm:$0xff] %v1667_v39  ;;  %v1665_v8 = vmul.f32 1.050701, %v1654_v3 }
 0x1dc   : > { %1676 = vst [vmem:[%s3028_s13 + $0x8] sm:$0xff] %v1665_v8 }
 0x1dd PF: > { %s13_s12 = sadd.s32 1, %s2084_s12  }
 0x1de   : > { %p10_p4 = scmp.ge.s32.totalorder %s13_s12, 4  }
 0x1e0   :  { %12 = sbr.rel (!%p10_p4) target bundleno = 1 (0x1), region = 62 }

</bundles_post_ra>
